<compile_context>
chip_gen: v6e
topology: v6e:2x2x1
jax: 0.10.0
libtpu: 0.0.40
codegen_flags: <defaults>
</compile_context>

<pallas_src>
import functools
import math

import numpy as np

import jax
import jax.numpy as jnp
from jax.experimental import pallas as pl
from jax.experimental.pallas import tpu as pltpu


def _ltsf_kernel(ri_ref, w_ref, scale_ref, sel_ref, o_ref,
                 prev_s, prev_welch, prev_lwsel,
                 *, eps, tt, multi_block, mm_dtype):
    """One (batch-chunk, time-block) grid step.

    ri_ref    : (1, 2, Tt, N)     stacked real / imag STFT tile
    w_ref     : (1, nmat, Tt, Tt) banded causal-mean blocks
                                  multi_block: [wm_diag, wm_sub, wr_diag, wr_sub]
                                  single     : [wm_diag, wr_diag]
    scale_ref : (1, N)            per-lane power-spectrum scale (0 on pad lanes)
    sel_ref   : (N, Bc)           per-batch-slot freq sum, -1/ln(10), pad mask
    o_ref     : (1, Bc, Tt)       lane-dense flatness output
    prev_*    : VMEM scratch carrying the previous time block (the r/m halo)
    """
    t = pl.program_id(1)

    def mm(a, b):
        return jnp.dot(a.astype(mm_dtype), b.astype(mm_dtype),
                       preferred_element_type=jnp.float32)

    if multi_block:
        # Reset the halo carry at the start of every batch chunk.
        @pl.when(t == 0)
        def _():
            prev_s[...] = jnp.zeros_like(prev_s)
            prev_welch[...] = jnp.zeros_like(prev_welch)
            prev_lwsel[...] = jnp.zeros_like(prev_lwsel)

    re = ri_ref[0, 0]                          # (Tt, N)
    im = ri_ref[0, 1]                          # (Tt, N)
    sel = sel_ref[...]                         # (N, Bc)
    wm_d = w_ref[0, 0]
    wr_d = w_ref[0, 2] if multi_block else w_ref[0, 1]

    # Power spectrum with /m, /sample_rate, *sum(win^2), the x2 on interior
    # bins and the lane-padding zeroing folded into one per-lane vector.
    s = (re * re + im * im) * scale_ref[...]

    # Causal Welch mean over the last min(i, m) frames (banded matmul; the
    # sub-diagonal block pulls the halo from the previous time block).
    welch = mm(wm_d, s)
    if multi_block:
        welch = welch + mm(w_ref[0, 1], prev_s[...])

    # Since gm = exp(G) - eps with G = Wr @ log(welch+eps), we have
    # log(gm+eps) == G exactly; reassociating through the tiny (N, Bc)
    # selector gives  G @ sel = Wr @ (log(welch+eps) @ sel)  and kills the
    # wide log-domain matmul entirely.
    lwsel = mm(jnp.log(welch + eps), sel)      # (Tt, Bc)
    am = mm(wr_d, welch)                       # (Tt, N)
    gsel = mm(wr_d, lwsel)                     # (Tt, Bc)
    if multi_block:
        am = am + mm(w_ref[0, 3], prev_welch[...])
        gsel = gsel + mm(w_ref[0, 3], prev_lwsel[...])

    res = gsel - mm(jnp.log(am + eps), sel)    # (Tt, Bc)

    if multi_block:
        prev_s[...] = s
        prev_welch[...] = welch
        prev_lwsel[...] = lwsel

    # Frame 0 of the utterance is exactly zero in the reference implementation.
    grow = t * tt + jax.lax.broadcasted_iota(jnp.int32, res.shape, 0)
    res = jnp.where(grow == 0, 0.0, res)

    # Lane-dense store: (Bc, Tt) with the time axis on lanes.
    o_ref[0] = res.T


def long_term_spectral_flatness(x, *, sample_rate=16000, win_length=25,
                                m=10, r=30, eps=1e-5,
                                matmul_dtype=jnp.float32):
    """x: (B, T, F, 2) float32 STFT (real/imag). Returns (B, T, 1) flatness."""
    B, T, F, two = x.shape
    assert two == 2

    # Deterministic "parameter": torch.hamming_window(win_length) (periodic).
    nwin = np.arange(win_length, dtype=np.float64)
    window = 0.54 - 0.46 * np.cos(2.0 * np.pi * nwin / win_length)
    win_sq_sum = float(np.sum(window * window))
    scale = win_sq_sum / (float(sample_rate) * float(m))

    # ---------------- tiling ----------------
    Fp = ((F + 127) // 128) * 128

    # Fold batch items onto the lane axis (target ~2K lanes).  Keep N a
    # multiple of 256 for the 256-wide MXU where possible, and make sure the
    # "parallel" chunk axis has >= 2 steps when the batch allows it (v7x has
    # two TensorCores) without dropping below 256 lanes per step.
    Bc = max(1, min(B, 2048 // Fp))
    if Fp % 256 != 0 and Bc >= 2:
        Bc = (Bc // 2) * 2
    if B > 1 and -(-B // Bc) == 1 and (-(-B // 2)) * Fp >= 256:
        Bc = -(-B // 2)
    Bp = -(-B // Bc) * Bc
    nchunks = Bp // Bc
    N = Bc * Fp

    # Band-tile the time axis: causal windows are only m/r frames wide, so a
    # diagonal + sub-diagonal (Tt, Tt) band pair (with the previous block
    # carried in scratch) replaces the dense (Tp, Tp) matrices.
    if T <= 128:
        Tt = ((T + 7) // 8) * 8          # single time block
    else:
        Tt = 128                         # multiple of 128 (lane-dense out), >= r
    Tp = -(-T // Tt) * Tt
    nblocks = Tp // Tt
    multi_block = nblocks > 1

    # ---------------- constant operands (numpy, baked in at trace time) -----
    def band_pair(block_start, w):
        """(diag, sub) causal-mean band blocks; `sub` multiplies the previous
        Tt frames.  Row i averages frames j in [max(0, i-w), i-1]."""
        i = block_start + np.arange(Tt)[:, None]
        coeff = 1.0 / np.maximum(np.minimum(i, w), 1).astype(np.float64)
        jd = block_start + np.arange(Tt)[None, :]
        js = block_start - Tt + np.arange(Tt)[None, :]
        md = (jd < i) & (jd >= i - w)
        ms = (js < i) & (js >= i - w) & (js >= 0)
        return np.where(md, coeff, 0.0), np.where(ms, coeff, 0.0)

    wm0_d, _ = band_pair(0, m)           # first time block (partial windows)
    wr0_d, _ = band_pair(0, r)
    if multi_block:
        # For every block t >= 1 the band blocks are identical (Tt >= m, r).
        wm1_d, wm1_s = band_pair(Tt, m)
        wr1_d, wr1_s = band_pair(Tt, r)
        zero = np.zeros((Tt, Tt))
        wmat = np.stack([np.stack([wm0_d, zero, wr0_d, zero]),
                         np.stack([wm1_d, wm1_s, wr1_d, wr1_s])]
                        ).astype(np.float32)                  # (2, 4, Tt, Tt)
        nvar, nmat = 2, 4
    else:
        wmat = np.stack([np.stack([wm0_d, wr0_d])]).astype(np.float32)
        nvar, nmat = 1, 2                                     # (1, 2, Tt, Tt)

    # Per-lane scale: x2 on interior bins 1..F-2, 0 on lane padding, per slot.
    fbin = np.arange(Fp)
    lane_scale = np.where((fbin >= 1) & (fbin <= F - 2), 2.0 * scale, scale)
    lane_scale = np.where(fbin < F, lane_scale, 0.0)
    scale_vec = np.tile(lane_scale, Bc)[None, :].astype(np.float32)   # (1, N)

    # Selector: per-batch-slot frequency sum with -1/ln(10) and pad mask.
    inv_ln10 = 1.0 / math.log(10.0)
    lane = np.arange(N)
    valid = (lane % Fp) < F
    owner = lane // Fp
    sel = np.where((owner[:, None] == np.arange(Bc)[None, :]) & valid[:, None],
                   -inv_ln10, 0.0).astype(np.float32)                 # (N, Bc)

    # ---------------- input layout: one fused pad+transpose pass ------------
    xp = jnp.pad(x.astype(jnp.float32),
                 ((0, Bp - B), (0, Tp - T), (0, Fp - F), (0, 0)))
    xp = xp.reshape(nchunks, Bc, Tp, Fp, 2)
    ri = jnp.transpose(xp, (0, 4, 2, 1, 3)).reshape(nchunks, 2, Tp, N)

    # ---------------- pallas call -------------------------------------------
    try:
        vmem_cap = int(pltpu.get_tpu_info().vmem_capacity_bytes)
    except Exception:
        vmem_cap = 64 * 1024 * 1024
    vmem_limit = max(16 * 1024 * 1024, min(48 * 1024 * 1024, int(0.6 * vmem_cap)))

    if nvar > 1:
        w_map = lambda c, t: (jnp.minimum(t, 1), 0, 0, 0)
    else:
        w_map = lambda c, t: (0, 0, 0, 0)

    if multi_block:
        scratch = [pltpu.VMEM((Tt, N), jnp.float32),
                   pltpu.VMEM((Tt, N), jnp.float32),
                   pltpu.VMEM((Tt, Bc), jnp.float32)]
    else:
        scratch = [pltpu.VMEM((8, 128), jnp.float32)] * 3    # unused dummies

    kernel = functools.partial(_ltsf_kernel, eps=float(eps), tt=Tt,
                               multi_block=multi_block, mm_dtype=matmul_dtype)

    out = pl.pallas_call(
        kernel,
        out_shape=jax.ShapeDtypeStruct((nchunks, Bc, Tp), jnp.float32),
        grid=(nchunks, nblocks),
        in_specs=[
            pl.BlockSpec((1, 2, Tt, N), lambda c, t: (c, 0, t, 0)),
            pl.BlockSpec((1, nmat, Tt, Tt), w_map),
            pl.BlockSpec((1, N), lambda c, t: (0, 0)),
            pl.BlockSpec((N, Bc), lambda c, t: (0, 0)),
        ],
        out_specs=pl.BlockSpec((1, Bc, Tt), lambda c, t: (c, 0, t)),
        scratch_shapes=scratch,
        compiler_params=pltpu.CompilerParams(
            dimension_semantics=("parallel", "arbitrary"),
            vmem_limit_bytes=vmem_limit,
        ),
    )(ri, jnp.asarray(wmat), jnp.asarray(scale_vec), jnp.asarray(sel))

    flat = out.reshape(Bp, Tp)[:B, :T]            # (B, T)
    return flat[..., None]


def _reference(x, *, sample_rate=16000, win_length=25, m=10, r=30, eps=1e-5):
    """Pure-JAX transcription of the torch loops (for validation only)."""
    B, T, F, _ = x.shape
    nwin = jnp.arange(win_length, dtype=jnp.float32)
    window = 0.54 - 0.46 * jnp.cos(2.0 * jnp.pi * nwin / win_length)
    s = (x[..., 0] ** 2 + x[..., 1] ** 2) / m
    s = s / sample_rate * jnp.sum(window ** 2)
    s = s.at[..., 1:-1].multiply(2.0)

    def sliding(v, w):
        rows = [jnp.zeros((B, F), jnp.float32)]
        for i in range(1, T):
            rows.append(jnp.mean(v[:, max(0, i - w):i, :], axis=1))
        return jnp.stack(rows, axis=1)

    welch = sliding(s, m)
    am = sliding(welch, r)
    gm = jnp.exp(sliding(jnp.log(welch + eps), r)) - eps
    gm = gm.at[:, 0, :].set(0.0)
    am = am.at[:, 0, :].set(0.0)
    return -jnp.sum(jnp.log10((gm + eps) / (am + eps)), axis=-1, keepdims=True)


if __name__ == "__main__":
    key0, key1 = jax.random.split(jax.random.PRNGKey(0))

    ltsf = jax.jit(functools.partial(long_term_spectral_flatness, sample_rate=16000))
    ref_fn = jax.jit(functools.partial(_reference, sample_rate=16000))

    # Case 1: multi-time-block (band-tiled halo carry) + two batch chunks.
    B, T, F = 3, 140, 33               # e.g. n_fft=64 -> 33 bins, 1.4 s of frames
    x = jax.random.normal(key0, (B, T, F, 2), dtype=jnp.float32)
    out = jax.block_until_ready(ltsf(x))
    assert out.shape == (B, T, 1)
    assert bool(jnp.all(jnp.isfinite(out)))
    ref = ref_fn(x)
    assert bool(jnp.allclose(out, ref, atol=2e-3, rtol=2e-3)), "case-1 mismatch vs reference"

    # Case 2: small single-time-block, single-chunk path.
    B2, T2, F2 = 2, 48, 33
    x2 = jax.random.normal(key1, (B2, T2, F2, 2), dtype=jnp.float32)
    out2 = jax.block_until_ready(ltsf(x2))
    assert out2.shape == (B2, T2, 1)
    assert bool(jnp.all(jnp.isfinite(out2)))
    ref2 = ref_fn(x2)
    assert bool(jnp.allclose(out2, ref2, atol=2e-3, rtol=2e-3)), "case-2 mismatch vs reference"

    print("KERNEL_OK")
</pallas_src>

<mosaic_0001>
module attributes {stable_mosaic.version = 11 : i64} {
  func.func @_ltsf_kernel(%arg0: i32, %arg1: i32, %arg2: memref<1x2x128x256xf32, #tpu.memory_space<vmem>>, %arg3: memref<1x4x128x128xf32, #tpu.memory_space<vmem>>, %arg4: memref<1x256xf32, #tpu.memory_space<vmem>>, %arg5: memref<256x2xf32, #tpu.memory_space<vmem>>, %arg6: memref<1x2x128xf32, #tpu.memory_space<vmem>>, %arg7: memref<128x256xf32, #tpu.memory_space<vmem>>, %arg8: memref<128x256xf32, #tpu.memory_space<vmem>>, %arg9: memref<128x2xf32, #tpu.memory_space<vmem>>) attributes {dimension_semantics = [#tpu.dimension_semantics<parallel>, #tpu.dimension_semantics<arbitrary>], iteration_bounds = array<i64: 2, 2>, scalar_prefetch = 0 : i64, scratch_operands = 3 : i64, tpu.core_type = #tpu.core_type<tc>, window_params = [{transform_indices = @transform_0, window_bounds = array<i64: 1, 2, 128, 256>}, {transform_indices = @transform_1, window_bounds = array<i64: 1, 4, 128, 128>}, {pipeline_mode = #tpu.pipeline_mode<synchronous>, transform_indices = @transform_2, window_bounds = array<i64: 1, 256>}, {pipeline_mode = #tpu.pipeline_mode<synchronous>, transform_indices = @transform_3, window_bounds = array<i64: 256, 2>}, {transform_indices = @transform_4, window_bounds = array<i64: 1, 2, 128>}]} {
    %c0_i32 = arith.constant 0 : i32
    %0 = arith.cmpi eq, %arg1, %c0_i32 : i32
    %1 = arith.extui %0 : i1 to i32
    %c0_i32_0 = arith.constant 0 : i32
    %2 = arith.cmpi ne, %1, %c0_i32_0 : i32
    scf.if %2 {
      %cst_55 = arith.constant 0.000000e+00 : f32
      %60 = vector.broadcast %cst_55 : f32 to vector<128x256xf32>
      %c0_56 = arith.constant 0 : index
      %c0_57 = arith.constant 0 : index
      %61 = vector.load %arg7[%c0_56, %c0_57] : memref<128x256xf32, #tpu.memory_space<vmem>>, vector<128x256xf32>
      tpu.vector_store %arg7[%c0_56, %c0_57], %60 {strides = array<i32>} : memref<128x256xf32, #tpu.memory_space<vmem>>, vector<128x256xf32>,
      %cst_58 = arith.constant 0.000000e+00 : f32
      %62 = vector.broadcast %cst_58 : f32 to vector<128x256xf32>
      %c0_59 = arith.constant 0 : index
      %c0_60 = arith.constant 0 : index
      %63 = vector.load %arg8[%c0_59, %c0_60] : memref<128x256xf32, #tpu.memory_space<vmem>>, vector<128x256xf32>
      tpu.vector_store %arg8[%c0_59, %c0_60], %62 {strides = array<i32>} : memref<128x256xf32, #tpu.memory_space<vmem>>, vector<128x256xf32>,
      %cst_61 = arith.constant 0.000000e+00 : f32
      %64 = vector.broadcast %cst_61 : f32 to vector<128x2xf32>
      %c0_62 = arith.constant 0 : index
      %c0_63 = arith.constant 0 : index
      %65 = vector.load %arg9[%c0_62, %c0_63] : memref<128x2xf32, #tpu.memory_space<vmem>>, vector<128x2xf32>
      tpu.vector_store %arg9[%c0_62, %c0_63], %64 {strides = array<i32>} : memref<128x2xf32, #tpu.memory_space<vmem>>, vector<128x2xf32>,
    } else {
    }
    %c0 = arith.constant 0 : index
    %c0_1 = arith.constant 0 : index
    %c0_2 = arith.constant 0 : index
    %c0_3 = arith.constant 0 : index
    %3 = vector.load %arg2[%c0, %c0_1, %c0_2, %c0_3] : memref<1x2x128x256xf32, #tpu.memory_space<vmem>>, vector<1x1x128x256xf32>
    %4 = vector.shape_cast %3 : vector<1x1x128x256xf32> to vector<128x256xf32>
    %c0_4 = arith.constant 0 : index
    %c1 = arith.constant 1 : index
    %c0_5 = arith.constant 0 : index
    %c0_6 = arith.constant 0 : index
    %5 = vector.load %arg2[%c0_4, %c1, %c0_5, %c0_6] : memref<1x2x128x256xf32, #tpu.memory_space<vmem>>, vector<1x1x128x256xf32>
    %6 = vector.shape_cast %5 : vector<1x1x128x256xf32> to vector<128x256xf32>
    %c0_7 = arith.constant 0 : index
    %c0_8 = arith.constant 0 : index
    %7 = vector.load %arg5[%c0_7, %c0_8] : memref<256x2xf32, #tpu.memory_space<vmem>>, vector<256x2xf32>
    %c0_9 = arith.constant 0 : index
    %c0_10 = arith.constant 0 : index
    %c0_11 = arith.constant 0 : index
    %c0_12 = arith.constant 0 : index
    %8 = vector.load %arg3[%c0_9, %c0_10, %c0_11, %c0_12] : memref<1x4x128x128xf32, #tpu.memory_space<vmem>>, vector<1x1x128x128xf32>
    %9 = vector.shape_cast %8 : vector<1x1x128x128xf32> to vector<128x128xf32>
    %c0_13 = arith.constant 0 : index
    %c2 = arith.constant 2 : index
    %c0_14 = arith.constant 0 : index
    %c0_15 = arith.constant 0 : index
    %10 = vector.load %arg3[%c0_13, %c2, %c0_14, %c0_15] : memref<1x4x128x128xf32, #tpu.memory_space<vmem>>, vector<1x1x128x128xf32>
    %11 = vector.shape_cast %10 : vector<1x1x128x128xf32> to vector<128x128xf32>
    %12 = arith.mulf %4, %4 : vector<128x256xf32>
    %13 = arith.mulf %6, %6 : vector<128x256xf32>
    %14 = arith.addf %12, %13 : vector<128x256xf32>
    %c0_16 = arith.constant 0 : index
    %c0_17 = arith.constant 0 : index
    %15 = vector.load %arg4[%c0_16, %c0_17] : memref<1x256xf32, #tpu.memory_space<vmem>>, vector<1x256xf32>
    %16 = vector.broadcast %15 : vector<1x256xf32> to vector<128x256xf32>
    %17 = arith.mulf %14, %16 : vector<128x256xf32>
    %cst = arith.constant dense<0.000000e+00> : vector<128x256xf32>
    %18 = tpu.matmul %9, %17, %cst {dimension_numbers = #tpu.dot_dimension_numbers<[1], [0], [0], [1], [0, 0, 1, 1], [], []>} : vector<128x128xf32>, vector<128x256xf32>, vector<128x256xf32> -> vector<128x256xf32>
    %c0_18 = arith.constant 0 : index
    %c1_19 = arith.constant 1 : index
    %c0_20 = arith.constant 0 : index
    %c0_21 = arith.constant 0 : index
    %19 = vector.load %arg3[%c0_18, %c1_19, %c0_20, %c0_21] : memref<1x4x128x128xf32, #tpu.memory_space<vmem>>, vector<1x1x128x128xf32>
    %20 = vector.shape_cast %19 : vector<1x1x128x128xf32> to vector<128x128xf32>
    %c0_22 = arith.constant 0 : index
    %c0_23 = arith.constant 0 : index
    %21 = vector.load %arg7[%c0_22, %c0_23] : memref<128x256xf32, #tpu.memory_space<vmem>>, vector<128x256xf32>
    %cst_24 = arith.constant dense<0.000000e+00> : vector<128x256xf32>
    %22 = tpu.matmul %20, %21, %cst_24 {dimension_numbers = #tpu.dot_dimension_numbers<[1], [0], [0], [1], [0, 0, 1, 1], [], []>} : vector<128x128xf32>, vector<128x256xf32>, vector<128x256xf32> -> vector<128x256xf32>
    %23 = arith.addf %18, %22 : vector<128x256xf32>
    %cst_25 = arith.constant 9.99999974E-6 : f32
    %24 = vector.broadcast %cst_25 : f32 to vector<128x256xf32>
    %25 = arith.addf %23, %24 : vector<128x256xf32>
    %26 = math.log %25 : vector<128x256xf32>
    %cst_26 = arith.constant dense<0.000000e+00> : vector<128x2xf32>
    %27 = tpu.matmul %26, %7, %cst_26 {dimension_numbers = #tpu.dot_dimension_numbers<[1], [0], [0], [1], [0, 0, 1, 1], [], []>} : vector<128x256xf32>, vector<256x2xf32>, vector<128x2xf32> -> vector<128x2xf32>
    %cst_27 = arith.constant dense<0.000000e+00> : vector<128x256xf32>
    %28 = tpu.matmul %11, %23, %cst_27 {dimension_numbers = #tpu.dot_dimension_numbers<[1], [0], [0], [1], [0, 0, 1, 1], [], []>} : vector<128x128xf32>, vector<128x256xf32>, vector<128x256xf32> -> vector<128x256xf32>
    %cst_28 = arith.constant dense<0.000000e+00> : vector<128x2xf32>
    %29 = tpu.matmul %11, %27, %cst_28 {dimension_numbers = #tpu.dot_dimension_numbers<[1], [0], [0], [1], [0, 0, 1, 1], [], []>} : vector<128x128xf32>, vector<128x2xf32>, vector<128x2xf32> -> vector<128x2xf32>
    %c0_29 = arith.constant 0 : index
    %c3 = arith.constant 3 : index
    %c0_30 = arith.constant 0 : index
    %c0_31 = arith.constant 0 : index
    %30 = vector.load %arg3[%c0_29, %c3, %c0_30, %c0_31] : memref<1x4x128x128xf32, #tpu.memory_space<vmem>>, vector<1x1x128x128xf32>
    %31 = vector.shape_cast %30 : vector<1x1x128x128xf32> to vector<128x128xf32>
    %c0_32 = arith.constant 0 : index
    %c0_33 = arith.constant 0 : index
    %32 = vector.load %arg8[%c0_32, %c0_33] : memref<128x256xf32, #tpu.memory_space<vmem>>, vector<128x256xf32>
    %cst_34 = arith.constant dense<0.000000e+00> : vector<128x256xf32>
    %33 = tpu.matmul %31, %32, %cst_34 {dimension_numbers = #tpu.dot_dimension_numbers<[1], [0], [0], [1], [0, 0, 1, 1], [], []>} : vector<128x128xf32>, vector<128x256xf32>, vector<128x256xf32> -> vector<128x256xf32>
    %34 = arith.addf %28, %33 : vector<128x256xf32>
    %c0_35 = arith.constant 0 : index
    %c3_36 = arith.constant 3 : index
    %c0_37 = arith.constant 0 : index
    %c0_38 = arith.constant 0 : index
    %35 = vector.load %arg3[%c0_35, %c3_36, %c0_37, %c0_38] : memref<1x4x128x128xf32, #tpu.memory_space<vmem>>, vector<1x1x128x128xf32>
    %36 = vector.shape_cast %35 : vector<1x1x128x128xf32> to vector<128x128xf32>
    %c0_39 = arith.constant 0 : index
    %c0_40 = arith.constant 0 : index
    %37 = vector.load %arg9[%c0_39, %c0_40] : memref<128x2xf32, #tpu.memory_space<vmem>>, vector<128x2xf32>
    %cst_41 = arith.constant dense<0.000000e+00> : vector<128x2xf32>
    %38 = tpu.matmul %36, %37, %cst_41 {dimension_numbers = #tpu.dot_dimension_numbers<[1], [0], [0], [1], [0, 0, 1, 1], [], []>} : vector<128x128xf32>, vector<128x2xf32>, vector<128x2xf32> -> vector<128x2xf32>
    %39 = arith.addf %29, %38 : vector<128x2xf32>
    %cst_42 = arith.constant 9.99999974E-6 : f32
    %40 = vector.broadcast %cst_42 : f32 to vector<128x256xf32>
    %41 = arith.addf %34, %40 : vector<128x256xf32>
    %42 = math.log %41 : vector<128x256xf32>
    %cst_43 = arith.constant dense<0.000000e+00> : vector<128x2xf32>
    %43 = tpu.matmul %42, %7, %cst_43 {dimension_numbers = #tpu.dot_dimension_numbers<[1], [0], [0], [1], [0, 0, 1, 1], [], []>} : vector<128x256xf32>, vector<256x2xf32>, vector<128x2xf32> -> vector<128x2xf32>
    %44 = arith.subf %39, %43 : vector<128x2xf32>
    %c0_44 = arith.constant 0 : index
    %c0_45 = arith.constant 0 : index
    %45 = vector.load %arg7[%c0_44, %c0_45] : memref<128x256xf32, #tpu.memory_space<vmem>>, vector<128x256xf32>
    tpu.vector_store %arg7[%c0_44, %c0_45], %17 {strides = array<i32>} : memref<128x256xf32, #tpu.memory_space<vmem>>, vector<128x256xf32>,
    %c0_46 = arith.constant 0 : index
    %c0_47 = arith.constant 0 : index
    %46 = vector.load %arg8[%c0_46, %c0_47] : memref<128x256xf32, #tpu.memory_space<vmem>>, vector<128x256xf32>
    tpu.vector_store %arg8[%c0_46, %c0_47], %23 {strides = array<i32>} : memref<128x256xf32, #tpu.memory_space<vmem>>, vector<128x256xf32>,
    %c0_48 = arith.constant 0 : index
    %c0_49 = arith.constant 0 : index
    %47 = vector.load %arg9[%c0_48, %c0_49] : memref<128x2xf32, #tpu.memory_space<vmem>>, vector<128x2xf32>
    tpu.vector_store %arg9[%c0_48, %c0_49], %27 {strides = array<i32>} : memref<128x2xf32, #tpu.memory_space<vmem>>, vector<128x2xf32>,
    %c128_i32 = arith.constant 128 : i32
    %48 = arith.muli %arg1, %c128_i32 : i32
    %49 = tpu.iota {dimensions = array<i32: 0>} : vector<128x2xi32>
    %50 = vector.broadcast %48 : i32 to vector<128x2xi32>
    %51 = arith.addi %50, %49 : vector<128x2xi32>
    %c0_i32_50 = arith.constant 0 : i32
    %52 = vector.broadcast %c0_i32_50 : i32 to vector<128x2xi32>
    %53 = arith.cmpi eq, %51, %52 : vector<128x2xi32>
    %cst_51 = arith.constant 0.000000e+00 : f32
    %54 = vector.broadcast %cst_51 : f32 to vector<128x2xf32>
    %55 = arith.select %53, %54, %44 : vector<128x2xi1>, vector<128x2xf32>
    %56 = tpu.transpose %55, [1, 0] : vector<128x2xf32> -> vector<2x128xf32>
    %c0_52 = arith.constant 0 : index
    %c0_53 = arith.constant 0 : index
    %c0_54 = arith.constant 0 : index
    %57 = vector.load %arg6[%c0_52, %c0_53, %c0_54] : memref<1x2x128xf32, #tpu.memory_space<vmem>>, vector<1x2x128xf32>
    %58 = vector.shape_cast %57 : vector<1x2x128xf32> to vector<2x128xf32>
    %59 = vector.shape_cast %56 : vector<2x128xf32> to vector<1x2x128xf32>
    tpu.vector_store %arg6[%c0_52, %c0_53, %c0_54], %59 {strides = array<i32>} : memref<1x2x128xf32, #tpu.memory_space<vmem>>, vector<1x2x128xf32>,
    return
  }
  func.func @transform_0(%arg0: i32, %arg1: i32) -> (i32, i32, i32, i32) {
    %c0_i32 = arith.constant 0 : i32
    %c0_i32_0 = arith.constant 0 : i32
    %c0_i32_1 = arith.constant 0 : i32
    return %arg0, %c0_i32, %arg1, %c0_i32_0 : i32, i32, i32, i32
  }
  func.func @transform_1(%arg0: i32, %arg1: i32) -> (i32, i32, i32, i32) {
    %c1_i32 = arith.constant 1 : i32
    %0 = arith.minsi %arg1, %c1_i32 : i32
    %c0_i32 = arith.constant 0 : i32
    %c0_i32_0 = arith.constant 0 : i32
    %c0_i32_1 = arith.constant 0 : i32
    %c0_i32_2 = arith.constant 0 : i32
    return %0, %c0_i32, %c0_i32_0, %c0_i32_1 : i32, i32, i32, i32
  }
  func.func @transform_2(%arg0: i32, %arg1: i32) -> (i32, i32) {
    %c0_i32 = arith.constant 0 : i32
    %c0_i32_0 = arith.constant 0 : i32
    %c0_i32_1 = arith.constant 0 : i32
    return %c0_i32, %c0_i32_0 : i32, i32
  }
  func.func @transform_3(%arg0: i32, %arg1: i32) -> (i32, i32) {
    %c0_i32 = arith.constant 0 : i32
    %c0_i32_0 = arith.constant 0 : i32
    %c0_i32_1 = arith.constant 0 : i32
    return %c0_i32, %c0_i32_0 : i32, i32
  }
  func.func @transform_4(%arg0: i32, %arg1: i32) -> (i32, i32, i32) {
    %c0_i32 = arith.constant 0 : i32
    %c0_i32_0 = arith.constant 0 : i32
    return %arg0, %c0_i32, %arg1 : i32, i32, i32
  }
}

</mosaic_0001>

<bundles_post_ra>
// kernel: long_term_spectral_flatness.1
= control target key start
LH: loop header
LB: loop body
LE: loop exit
PB: predicated region body
PF: predicated region fallthrough
CT: control target
= control target key end

     0   :  { %s3332_s15 = smov 0   ;;  %s3334_s16 = smov 0   ;;  %s4876_s0 = inlined_call_operand.vmem [shape: f32[2,2,256,256], index: 0, kind: input, shape index: {}]   ;;  %s4877_s1 = inlined_call_operand.vmem [shape: f32[2,4,128,128], index: 1, kind: input, shape index: {}]   ;;  %s4878_s2 = inlined_call_operand.vmem [shape: f32[1,256], index: 2, kind: input, shape index: {}]   ;;  %s4879_s3 = inlined_call_operand.vmem [shape: f32[256,2], index: 3, kind: input, shape index: {}]   ;;  %s4880_s4 = inlined_call_operand.vmem [shape: f32[2,2,256], index: 4, kind: output, shape index: {}]  }
   0x1   :  { %s3336_s17 = smov 0   ;;  %s3338_s18 = smov 0  }
   0x2   :  { %s3340_s19 = smov 0   ;;  %s3342_s20 = smov 0  }
   0x3   :  { %s3344_s21 = smov 0  }
   0x4 LB: > { %s23_s22 = sadd.s32 1, %s3295_s19  ;;  %s26_s23 = sadd.s32 1, %s3299_s20  ;;  %s3303_s21 = sphi %s3344_s21, %s14_s21   ;;  %s3299_s20 = sphi %s3342_s20, %s5013_s20   ;;  %s3295_s19 = sphi %s3340_s19, %s5012_s19   ;;  %s3291_s18 = sphi %s3338_s18, %s5011_s18   ;;  %s3287_s17 = sphi %s3336_s17, %s5010_s17   ;;  %s3283_s16 = sphi %s3334_s16, %s5009_s16   ;;  %s3279_s15 = sphi %s3332_s15, %s5008_s15  }
   0x5   : > { %p24_p0 = scmp.ge.s32.totalorder %s23_s22, 2  ;;  %p42_p1 = scmp.ne.s32.totalorder %s3283_s16, %s3279_s15 }
   0x6   : > { %p43_p2 = scmp.eq.s32.totalorder %s3303_s21, 0  ;;  %s35_s27 = sadd.s32 1, %s3283_s16 }
   0x7   : > { %s5015_s22 = smov (%p24_p0, %s23_s22), 0  ;;  %s5017_s23 = smov (!%p24_p0, %s26_s23), %s3299_s20 }
   0x8   : > { %p44_p3 = por %p43_p2, %p42_p1  ;;  %p28_p4 = scmp.ge.s32.totalorder %s5017_s23, 2 }
   0x9   : > { %s31_s24 = ssub.s32 %s3295_s19, %s5015_s22  ;;  %p2590_p6 = scmp.ge.s32.totalorder %s3303_s21, 4 }
   0xa   : > { %s5019_s23 = smov (%p28_p4, %s5017_s23), 0 }
   0xb   : > { %s30_s25 = ssub.s32 %s3299_s20, %s5019_s23  ;;  %174 = sbr.rel (%p2590_p6) target bundleno = 55 (0x37), region = 24 }
   0xc   : > { %s32_s26 = sor.u32 %s31_s24, %s30_s25 }
   0xd   : > { %p33_p5 = scmp.eq.s32.totalorder %s32_s26, 0 }
   0xf   : > { %s3383_s28 = scalar_select %p33_p5, %s3283_s16, %s35_s27  }
  0x10   : > { %177 = sbr.rel (!%p44_p3) target bundleno = 55 (0x37), region = 28  ;;  %s179_s29 = sand.u32 (%p44_p3), 1, %s3283_s16  }
  0x11   : > { %s2689_s30 = sshll.u32 (%p44_p3), %s3295_s19, 5  ;;  %s2591_s5 = sshll.u32 (%p44_p3), %s179_s29, 9 }
  0x12   : > { %s2594_s6 = sshll.u32 (%p44_p3), %s3299_s20, 7  ;;  %s3397_s12 = scalar_lea.vmem (%p44_p3), [#allocation5], %s2591_s5 }
  0x13   : > { %s185_s7 = sadd.s32 (%p44_p3), %s2689_s30, %s2594_s6 }
  0x14   : > { %s2595_s8 = sshll.u32 (%p44_p3), %s185_s7, 3 }
  0x15   : > { %s3392_s11 = scalar_lea.vmem %s4876_s0, %s2595_s8 }
  0x16   : > { %v200_v0 = vld [vmem:[%s3392_s11] sm:$0xff]  ;;  %v202_v1 = vld [vmem:[%s3392_s11 + $0x8] sm:$0xff]  ;;  %v204_v2 = vld [vmem:[%s3392_s11 + $0x10] sm:$0xff] }
  0x17   : > { %201 = vst [vmem:[%s3397_s12] sm:$0xff] %v200_v0  ;;  %203 = vst [vmem:[%s3397_s12 + $0x8] sm:$0xff] %v202_v1  ;;  %v206_v3 = vld [vmem:[%s3392_s11 + $0x18] sm:$0xff]  ;;  %v208_v4 = vld [vmem:[%s3392_s11 + $0x20] sm:$0xff] }
  0x18   : > { %205 = vst [vmem:[%s3397_s12 + $0x10] sm:$0xff] %v204_v2  ;;  %v210_v5 = vld [vmem:[%s3392_s11 + $0x28] sm:$0xff]  ;;  %207 = vst [vmem:[%s3397_s12 + $0x18] sm:$0xff] %v206_v3  ;;  %v212_v6 = vld [vmem:[%s3392_s11 + $0x30] sm:$0xff] }
  0x19   : > { %209 = vst [vmem:[%s3397_s12 + $0x20] sm:$0xff] %v208_v4  ;;  %211 = vst [vmem:[%s3397_s12 + $0x28] sm:$0xff] %v210_v5  ;;  %v214_v7 = vld [vmem:[%s3392_s11 + $0x38] sm:$0xff]  ;;  %v216_v8 = vld [vmem:[%s3392_s11 + $0x40] sm:$0xff] }
  0x1a   : > { %213 = vst [vmem:[%s3397_s12 + $0x30] sm:$0xff] %v212_v6  ;;  %215 = vst [vmem:[%s3397_s12 + $0x38] sm:$0xff] %v214_v7  ;;  %v218_v9 = vld [vmem:[%s3392_s11 + $0x48] sm:$0xff]  ;;  %v220_v10 = vld [vmem:[%s3392_s11 + $0x50] sm:$0xff] }
  0x1b   : > { %217 = vst [vmem:[%s3397_s12 + $0x40] sm:$0xff] %v216_v8  ;;  %v222_v11 = vld [vmem:[%s3392_s11 + $0x58] sm:$0xff]  ;;  %219 = vst [vmem:[%s3397_s12 + $0x48] sm:$0xff] %v218_v9  ;;  %v224_v12 = vld [vmem:[%s3392_s11 + $0x60] sm:$0xff] }
  0x1c   : > { %221 = vst [vmem:[%s3397_s12 + $0x50] sm:$0xff] %v220_v10  ;;  %223 = vst [vmem:[%s3397_s12 + $0x58] sm:$0xff] %v222_v11  ;;  %v226_v13 = vld [vmem:[%s3392_s11 + $0x68] sm:$0xff]  ;;  %v228_v14 = vld [vmem:[%s3392_s11 + $0x70] sm:$0xff] }
  0x1d   : > { %225 = vst [vmem:[%s3397_s12 + $0x60] sm:$0xff] %v224_v12  ;;  %227 = vst [vmem:[%s3397_s12 + $0x68] sm:$0xff] %v226_v13  ;;  %v230_v15 = vld [vmem:[%s3392_s11 + $0x78] sm:$0xff]  ;;  %v232_v16 = vld [vmem:[%s3392_s11 + $0x80] sm:$0xff] }
  0x1e   : > { %229 = vst [vmem:[%s3397_s12 + $0x70] sm:$0xff] %v228_v14  ;;  %v234_v17 = vld [vmem:[%s3392_s11 + $0x88] sm:$0xff]  ;;  %231 = vst [vmem:[%s3397_s12 + $0x78] sm:$0xff] %v230_v15  ;;  %v236_v18 = vld [vmem:[%s3392_s11 + $0x90] sm:$0xff] }
  0x1f   : > { %233 = vst [vmem:[%s3397_s12 + $0x80] sm:$0xff] %v232_v16  ;;  %235 = vst [vmem:[%s3397_s12 + $0x88] sm:$0xff] %v234_v17  ;;  %v238_v19 = vld [vmem:[%s3392_s11 + $0x98] sm:$0xff]  ;;  %v240_v20 = vld [vmem:[%s3392_s11 + $0xa0] sm:$0xff] }
  0x20   : > { %237 = vst [vmem:[%s3397_s12 + $0x90] sm:$0xff] %v236_v18  ;;  %239 = vst [vmem:[%s3397_s12 + $0x98] sm:$0xff] %v238_v19  ;;  %v242_v21 = vld [vmem:[%s3392_s11 + $0xa8] sm:$0xff]  ;;  %v244_v22 = vld [vmem:[%s3392_s11 + $0xb0] sm:$0xff] }
  0x21   : > { %241 = vst [vmem:[%s3397_s12 + $0xa0] sm:$0xff] %v240_v20  ;;  %v246_v23 = vld [vmem:[%s3392_s11 + $0xb8] sm:$0xff]  ;;  %243 = vst [vmem:[%s3397_s12 + $0xa8] sm:$0xff] %v242_v21  ;;  %v248_v24 = vld [vmem:[%s3392_s11 + $0xc0] sm:$0xff] }
  0x22   : > { %245 = vst [vmem:[%s3397_s12 + $0xb0] sm:$0xff] %v244_v22  ;;  %247 = vst [vmem:[%s3397_s12 + $0xb8] sm:$0xff] %v246_v23  ;;  %v250_v25 = vld [vmem:[%s3392_s11 + $0xc8] sm:$0xff]  ;;  %v252_v26 = vld [vmem:[%s3392_s11 + $0xd0] sm:$0xff] }
  0x23   : > { %249 = vst [vmem:[%s3397_s12 + $0xc0] sm:$0xff] %v248_v24  ;;  %251 = vst [vmem:[%s3397_s12 + $0xc8] sm:$0xff] %v250_v25  ;;  %v254_v27 = vld [vmem:[%s3392_s11 + $0xd8] sm:$0xff]  ;;  %v256_v28 = vld [vmem:[%s3392_s11 + $0xe0] sm:$0xff] }
  0x24   : > { %253 = vst [vmem:[%s3397_s12 + $0xd0] sm:$0xff] %v252_v26  ;;  %v258_v29 = vld [vmem:[%s3392_s11 + $0xe8] sm:$0xff]  ;;  %255 = vst [vmem:[%s3397_s12 + $0xd8] sm:$0xff] %v254_v27  ;;  %v260_v30 = vld [vmem:[%s3392_s11 + $0xf0] sm:$0xff] }
  0x25   : > { %257 = vst [vmem:[%s3397_s12 + $0xe0] sm:$0xff] %v256_v28  ;;  %259 = vst [vmem:[%s3397_s12 + $0xe8] sm:$0xff] %v258_v29  ;;  %v262_v31 = vld [vmem:[%s3392_s11 + $0xf8] sm:$0xff]  ;;  %v264_v32 = vld [vmem:[%s3392_s11 + $0x200] sm:$0xff] }
  0x26   : > { %261 = vst [vmem:[%s3397_s12 + $0xf0] sm:$0xff] %v260_v30  ;;  %263 = vst [vmem:[%s3397_s12 + $0xf8] sm:$0xff] %v262_v31  ;;  %v266_v33 = vld [vmem:[%s3392_s11 + $0x208] sm:$0xff]  ;;  %v268_v34 = vld [vmem:[%s3392_s11 + $0x210] sm:$0xff] }
  0x27   : > { %265 = vst [vmem:[%s3397_s12 + $0x100] sm:$0xff] %v264_v32  ;;  %v270_v35 = vld [vmem:[%s3392_s11 + $0x218] sm:$0xff]  ;;  %267 = vst [vmem:[%s3397_s12 + $0x108] sm:$0xff] %v266_v33  ;;  %v272_v36 = vld [vmem:[%s3392_s11 + $0x220] sm:$0xff] }
  0x28   : > { %269 = vst [vmem:[%s3397_s12 + $0x110] sm:$0xff] %v268_v34  ;;  %271 = vst [vmem:[%s3397_s12 + $0x118] sm:$0xff] %v270_v35  ;;  %v274_v37 = vld [vmem:[%s3392_s11 + $0x228] sm:$0xff]  ;;  %v276_v38 = vld [vmem:[%s3392_s11 + $0x230] sm:$0xff] }
  0x29   : > { %273 = vst [vmem:[%s3397_s12 + $0x120] sm:$0xff] %v272_v36  ;;  %275 = vst [vmem:[%s3397_s12 + $0x128] sm:$0xff] %v274_v37  ;;  %v278_v39 = vld [vmem:[%s3392_s11 + $0x238] sm:$0xff]  ;;  %v280_v40 = vld [vmem:[%s3392_s11 + $0x240] sm:$0xff] }
  0x2a   : > { %277 = vst [vmem:[%s3397_s12 + $0x130] sm:$0xff] %v276_v38  ;;  %v282_v41 = vld [vmem:[%s3392_s11 + $0x248] sm:$0xff]  ;;  %279 = vst [vmem:[%s3397_s12 + $0x138] sm:$0xff] %v278_v39  ;;  %v284_v42 = vld [vmem:[%s3392_s11 + $0x250] sm:$0xff] }
  0x2b   : > { %281 = vst [vmem:[%s3397_s12 + $0x140] sm:$0xff] %v280_v40  ;;  %283 = vst [vmem:[%s3397_s12 + $0x148] sm:$0xff] %v282_v41  ;;  %v286_v43 = vld [vmem:[%s3392_s11 + $0x258] sm:$0xff]  ;;  %v288_v44 = vld [vmem:[%s3392_s11 + $0x260] sm:$0xff] }
  0x2c   : > { %285 = vst [vmem:[%s3397_s12 + $0x150] sm:$0xff] %v284_v42  ;;  %287 = vst [vmem:[%s3397_s12 + $0x158] sm:$0xff] %v286_v43  ;;  %v290_v45 = vld [vmem:[%s3392_s11 + $0x268] sm:$0xff]  ;;  %v292_v46 = vld [vmem:[%s3392_s11 + $0x270] sm:$0xff] }
  0x2d   : > { %289 = vst [vmem:[%s3397_s12 + $0x160] sm:$0xff] %v288_v44  ;;  %v294_v47 = vld [vmem:[%s3392_s11 + $0x278] sm:$0xff]  ;;  %291 = vst [vmem:[%s3397_s12 + $0x168] sm:$0xff] %v290_v45  ;;  %v296_v48 = vld [vmem:[%s3392_s11 + $0x280] sm:$0xff] }
  0x2e   : > { %293 = vst [vmem:[%s3397_s12 + $0x170] sm:$0xff] %v292_v46  ;;  %295 = vst [vmem:[%s3397_s12 + $0x178] sm:$0xff] %v294_v47  ;;  %v298_v49 = vld [vmem:[%s3392_s11 + $0x288] sm:$0xff]  ;;  %v300_v50 = vld [vmem:[%s3392_s11 + $0x290] sm:$0xff] }
  0x2f   : > { %297 = vst [vmem:[%s3397_s12 + $0x180] sm:$0xff] %v296_v48  ;;  %299 = vst [vmem:[%s3397_s12 + $0x188] sm:$0xff] %v298_v49  ;;  %v302_v51 = vld [vmem:[%s3392_s11 + $0x298] sm:$0xff]  ;;  %v304_v52 = vld [vmem:[%s3392_s11 + $0x2a0] sm:$0xff] }
  0x30   : > { %301 = vst [vmem:[%s3397_s12 + $0x190] sm:$0xff] %v300_v50  ;;  %v306_v53 = vld [vmem:[%s3392_s11 + $0x2a8] sm:$0xff]  ;;  %303 = vst [vmem:[%s3397_s12 + $0x198] sm:$0xff] %v302_v51  ;;  %v308_v54 = vld [vmem:[%s3392_s11 + $0x2b0] sm:$0xff] }
  0x31   : > { %305 = vst [vmem:[%s3397_s12 + $0x1a0] sm:$0xff] %v304_v52  ;;  %307 = vst [vmem:[%s3397_s12 + $0x1a8] sm:$0xff] %v306_v53  ;;  %v310_v55 = vld [vmem:[%s3392_s11 + $0x2b8] sm:$0xff]  ;;  %v312_v56 = vld [vmem:[%s3392_s11 + $0x2c0] sm:$0xff] }
  0x32   : > { %309 = vst [vmem:[%s3397_s12 + $0x1b0] sm:$0xff] %v308_v54  ;;  %311 = vst [vmem:[%s3397_s12 + $0x1b8] sm:$0xff] %v310_v55  ;;  %v314_v57 = vld [vmem:[%s3392_s11 + $0x2c8] sm:$0xff]  ;;  %v316_v58 = vld [vmem:[%s3392_s11 + $0x2d0] sm:$0xff] }
  0x33   : > { %313 = vst [vmem:[%s3397_s12 + $0x1c0] sm:$0xff] %v312_v56  ;;  %v318_v59 = vld [vmem:[%s3392_s11 + $0x2d8] sm:$0xff]  ;;  %315 = vst [vmem:[%s3397_s12 + $0x1c8] sm:$0xff] %v314_v57  ;;  %v320_v60 = vld [vmem:[%s3392_s11 + $0x2e0] sm:$0xff] }
  0x34   : > { %317 = vst [vmem:[%s3397_s12 + $0x1d0] sm:$0xff] %v316_v58  ;;  %319 = vst [vmem:[%s3397_s12 + $0x1d8] sm:$0xff] %v318_v59  ;;  %v322_v61 = vld [vmem:[%s3392_s11 + $0x2e8] sm:$0xff]  ;;  %v324_v62 = vld [vmem:[%s3392_s11 + $0x2f0] sm:$0xff] }
  0x35   : > { %321 = vst [vmem:[%s3397_s12 + $0x1e0] sm:$0xff] %v320_v60  ;;  %323 = vst [vmem:[%s3397_s12 + $0x1e8] sm:$0xff] %v322_v61  ;;  %v326_v63 = vld [vmem:[%s3392_s11 + $0x2f8] sm:$0xff] }
  0x36   : > { %325 = vst [vmem:[%s3397_s12 + $0x1f0] sm:$0xff] %v324_v62  ;;  %327 = vst [vmem:[%s3397_s12 + $0x1f8] sm:$0xff] %v326_v63 }
  0x37 PF: > { %p2596_p7 = scmp.ge.s32.totalorder %s3303_s21, 1  ;;  %p344_p8 = scmp.lt.s32.totalorder %s3303_s21, 5 }
  0x39   : > { %p345_p9 = pnand %p2596_p7, %p344_p8 }
  0x3b   : > { %348 = sbr.rel (%p345_p9) target bundleno = 1029 (0x405), region = 55 }
  0x40   : > { %s351_s13 = sand.u32 1, %s3279_s15   ;;  %p387_p10 = scmp.lt.s32.totalorder %s3287_s17, 1 }
  0x41   : > { %s2597_s14 = sshll.u32 %s351_s13, 9  ;;  %p396_p11 = scmp.lt.s32.totalorder %s3291_s18, 1 }
  0x42   : > { %s388_s24 = scalar_select %p387_p10, %s3287_s17, 1 }
  0x43   : > { %s5021_s18 = smov (!%p396_p11, %s3291_s18), 1  ;;  %s3541_s15 = scalar_lea.vmem [#allocation5], %s2597_s14 }
  0x44   : > { %s390_s25 = scalar_select %p387_p10, %s388_s24, 1 }
  0x45   : > { %s2603_s26 = sshll.u32 %s5021_s18, 1  ;;  %p2605_p12 = scmp.ne.s32.totalorder %s3287_s17, 0 }
  0x46   : > { %s2690_s27 = sshll.u32 %s390_s25, 9  ;;  %s401_s29 = sadd.s32 %s2603_s26, %s388_s24 }
  0x47   : > { %s3534_s6 = scalar_lea.vmem %s4877_s1, %s2690_s27  ;;  %s2604_s7 = sshll.u32 %s401_s29, 1 }
  0x48   : > { %s3539_s10 = scalar_lea.vmem %s4880_s4, %s2604_s7  ;;  %407 = sbr.rel (%p2605_p12) target bundleno = 118 (0x76), region = 63 }
  0x4d   : > { %vm472_vm0 = vcmask 15360   ;;  %v3305_v0 = vmov 0.0  }
  0x4e   : > { %408 = vst [vmem:[#allocation2 + $0xb0] sm:$0xff] %v3305_v0  ;;  %409 = vst [vmem:[#allocation2] sm:$0xff] %v3305_v0 }
  0x4f   : > { %410 = vst [vmem:[#allocation2 + $0xd8] sm:$0xff] %v3305_v0  ;;  %411 = vst [vmem:[#allocation2 + $0x18] sm:$0xff] %v3305_v0 }
  0x50   : > { %412 = vst [vmem:[#allocation2 + $0x50] sm:$0xff] %v3305_v0  ;;  %413 = vst [vmem:[#allocation2 + $0x68] sm:$0xff] %v3305_v0 }
  0x51   : > { %414 = vst [vmem:[#allocation2 + $0x30] sm:$0xff] %v3305_v0  ;;  %415 = vst [vmem:[#allocation2 + $0x48] sm:$0xff] %v3305_v0 }
  0x52   : > { %416 = vst [vmem:[#allocation2 + $0x80] sm:$0xff] %v3305_v0  ;;  %417 = vst [vmem:[#allocation2 + $0x88] sm:$0xff] %v3305_v0 }
  0x53   : > { %418 = vst [vmem:[#allocation2 + $0xe8] sm:$0xff] %v3305_v0  ;;  %419 = vst [vmem:[#allocation2 + $0xb8] sm:$0xff] %v3305_v0 }
  0x54   : > { %420 = vst [vmem:[#allocation2 + $0x60] sm:$0xff] %v3305_v0  ;;  %421 = vst [vmem:[#allocation2 + $0xf0] sm:$0xff] %v3305_v0 }
  0x55   : > { %422 = vst [vmem:[#allocation2 + $0x8] sm:$0xff] %v3305_v0  ;;  %423 = vst [vmem:[#allocation2 + $0x78] sm:$0xff] %v3305_v0 }
  0x56   : > { %424 = vst [vmem:[#allocation2 + $0x38] sm:$0xff] %v3305_v0  ;;  %425 = vst [vmem:[#allocation2 + $0x58] sm:$0xff] %v3305_v0 }
  0x57   : > { %426 = vst [vmem:[#allocation2 + $0x40] sm:$0xff] %v3305_v0  ;;  %427 = vst [vmem:[#allocation2 + $0xc8] sm:$0xff] %v3305_v0 }
  0x58   : > { %428 = vst [vmem:[#allocation2 + $0xe0] sm:$0xff] %v3305_v0  ;;  %429 = vst [vmem:[#allocation2 + $0x90] sm:$0xff] %v3305_v0 }
  0x59   : > { %430 = vst [vmem:[#allocation2 + $0x70] sm:$0xff] %v3305_v0  ;;  %431 = vst [vmem:[#allocation2 + $0xc0] sm:$0xff] %v3305_v0 }
  0x5a   : > { %432 = vst [vmem:[#allocation2 + $0xa8] sm:$0xff] %v3305_v0  ;;  %433 = vst [vmem:[#allocation2 + $0xd0] sm:$0xff] %v3305_v0 }
  0x5b   : > { %434 = vst [vmem:[#allocation2 + $0x10] sm:$0xff] %v3305_v0  ;;  %435 = vst [vmem:[#allocation2 + $0x28] sm:$0xff] %v3305_v0 }
  0x5c   : > { %436 = vst [vmem:[#allocation2 + $0xa0] sm:$0xff] %v3305_v0  ;;  %437 = vst [vmem:[#allocation2 + $0xf8] sm:$0xff] %v3305_v0 }
  0x5d   : > { %438 = vst [vmem:[#allocation2 + $0x20] sm:$0xff] %v3305_v0  ;;  %439 = vst [vmem:[#allocation2 + $0x98] sm:$0xff] %v3305_v0 }
  0x5e   : > { %440 = vst [vmem:[#allocation3 + $0x80] sm:$0xff] %v3305_v0  ;;  %441 = vst [vmem:[#allocation3 + $0xc8] sm:$0xff] %v3305_v0 }
  0x5f   : > { %442 = vst [vmem:[#allocation3 + $0xe8] sm:$0xff] %v3305_v0  ;;  %443 = vst [vmem:[#allocation3 + $0x78] sm:$0xff] %v3305_v0 }
  0x60   : > { %444 = vst [vmem:[#allocation3 + $0x8] sm:$0xff] %v3305_v0  ;;  %445 = vst [vmem:[#allocation3 + $0x90] sm:$0xff] %v3305_v0 }
  0x61   : > { %446 = vst [vmem:[#allocation3 + $0x58] sm:$0xff] %v3305_v0  ;;  %447 = vst [vmem:[#allocation3 + $0xa8] sm:$0xff] %v3305_v0 }
  0x62   : > { %448 = vst [vmem:[#allocation3 + $0xd0] sm:$0xff] %v3305_v0  ;;  %449 = vst [vmem:[#allocation3 + $0xb0] sm:$0xff] %v3305_v0 }
  0x63   : > { %450 = vst [vmem:[#allocation3 + $0x38] sm:$0xff] %v3305_v0  ;;  %451 = vst [vmem:[#allocation3 + $0x40] sm:$0xff] %v3305_v0 }
  0x64   : > { %452 = vst [vmem:[#allocation3 + $0xe0] sm:$0xff] %v3305_v0  ;;  %453 = vst [vmem:[#allocation3 + $0x60] sm:$0xff] %v3305_v0 }
  0x65   : > { %454 = vst [vmem:[#allocation3 + $0x18] sm:$0xff] %v3305_v0  ;;  %455 = vst [vmem:[#allocation3 + $0x68] sm:$0xff] %v3305_v0 }
  0x66   : > { %456 = vst [vmem:[#allocation3 + $0x10] sm:$0xff] %v3305_v0  ;;  %457 = vst [vmem:[#allocation3 + $0x70] sm:$0xff] %v3305_v0 }
  0x67   : > { %458 = vst [vmem:[#allocation3 + $0x50] sm:$0xff] %v3305_v0  ;;  %459 = vst [vmem:[#allocation3 + $0xa0] sm:$0xff] %v3305_v0 }
  0x68   : > { %460 = vst [vmem:[#allocation3 + $0xd8] sm:$0xff] %v3305_v0  ;;  %461 = vst [vmem:[#allocation3 + $0x30] sm:$0xff] %v3305_v0 }
  0x69   : > { %462 = vst [vmem:[#allocation3 + $0x20] sm:$0xff] %v3305_v0  ;;  %463 = vst [vmem:[#allocation3 + $0xf0] sm:$0xff] %v3305_v0 }
  0x6a   : > { %464 = vst [vmem:[#allocation3 + $0x88] sm:$0xff] %v3305_v0  ;;  %465 = vst [vmem:[#allocation3 + $0x48] sm:$0xff] %v3305_v0 }
  0x6b   : > { %466 = vst [vmem:[#allocation3 + $0xf8] sm:$0xff] %v3305_v0  ;;  %467 = vst [vmem:[#allocation3 + $0xc0] sm:$0xff] %v3305_v0 }
  0x6c   : > { %468 = vst [vmem:[#allocation3 + $0xb8] sm:$0xff] %v3305_v0  ;;  %469 = vst [vmem:[#allocation3] sm:$0xff] %v3305_v0 }
  0x6d   : > { %470 = vst [vmem:[#allocation3 + $0x28] sm:$0xff] %v3305_v0  ;;  %471 = vst [vmem:[#allocation3 + $0x98] sm:$0xff] %v3305_v0 }
  0x6e   : > { %473 = vst.msk [vmem:[#allocation4] sm:$0xff] %vm472_vm0, %v3305_v0  ;;  %474 = vst.msk [vmem:[#allocation4 + $0x8] sm:$0xff] %vm472_vm0, %v3305_v0 }
  0x6f   : > { %475 = vst.msk [vmem:[#allocation4 + $0x10] sm:$0xff] %vm472_vm0, %v3305_v0  ;;  %476 = vst.msk [vmem:[#allocation4 + $0x18] sm:$0xff] %vm472_vm0, %v3305_v0 }
  0x70   : > { %477 = vst.msk [vmem:[#allocation4 + $0x20] sm:$0xff] %vm472_vm0, %v3305_v0  ;;  %478 = vst.msk [vmem:[#allocation4 + $0x28] sm:$0xff] %vm472_vm0, %v3305_v0 }
  0x71   : > { %479 = vst.msk [vmem:[#allocation4 + $0x30] sm:$0xff] %vm472_vm0, %v3305_v0  ;;  %480 = vst.msk [vmem:[#allocation4 + $0x38] sm:$0xff] %vm472_vm0, %v3305_v0 }
  0x72   : > { %481 = vst.msk [vmem:[#allocation4 + $0x40] sm:$0xff] %vm472_vm0, %v3305_v0  ;;  %482 = vst.msk [vmem:[#allocation4 + $0x48] sm:$0xff] %vm472_vm0, %v3305_v0 }
  0x73   : > { %483 = vst.msk [vmem:[#allocation4 + $0x50] sm:$0xff] %vm472_vm0, %v3305_v0  ;;  %484 = vst.msk [vmem:[#allocation4 + $0x58] sm:$0xff] %vm472_vm0, %v3305_v0 }
  0x74   : > { %485 = vst.msk [vmem:[#allocation4 + $0x60] sm:$0xff] %vm472_vm0, %v3305_v0  ;;  %486 = vst.msk [vmem:[#allocation4 + $0x68] sm:$0xff] %vm472_vm0, %v3305_v0 }
  0x75   : > { %487 = vst.msk [vmem:[#allocation4 + $0x70] sm:$0xff] %vm472_vm0, %v3305_v0  ;;  %488 = vst.msk [vmem:[#allocation4 + $0x78] sm:$0xff] %vm472_vm0, %v3305_v0 }
  0x76 PF: > { %v520_v1 = vld [vmem:[%s3541_s15 + $0xf8] sm:$0xff]  ;;  %v717_v3 = vlaneseq  ;;  %v715_v6 = vld [vmem:[%s4878_s2] sm:$0x3]  ;;  %v519_v8 = vld [vmem:[%s3541_s15 + $0xf0] sm:$0xff]  ;;  %v4881_v10 = vmov 0.0   ;;  %vm2369_vm1 = vcmask 15360  }
  0x77   : > { %v2637_v2 = vld [vmem:[%s3541_s15 + $0x1f8] sm:$0xff]  ;;  %v650_v4 = vmul.f32 %v520_v1, %v520_v1  ;;  %v2636_v9 = vld [vmem:[%s3541_s15 + $0x1f0] sm:$0xff]  ;;  %920 = vmatprep.mubr.f32.mxu1 %v4881_v10  ;;  %872 = vmatprep.mubr.f32.mxu0 %v4881_v10  ;;  %v649_v12 = vmul.f32 %v519_v8, %v519_v8  ;;  %v806_v14 = vld [vmem:[#allocation2 + $0x20] sm:$0xff] }
  0x78   : > { %v682_v5 = vmul.f32 %v2637_v2, %v2637_v2  ;;  %v807_v7 = vld [vmem:[#allocation2 + $0x98] sm:$0xff]  ;;  %v3649_v11 = vshrl.u32 %v717_v3, 7  ;;  %v681_v13 = vmul.f32 %v2636_v9, %v2636_v9  ;;  %v518_v15 = vld [vmem:[%s3541_s15 + $0xe8] sm:$0xff]  ;;  %v517_v21 = vld [vmem:[%s3541_s15 + $0xe0] sm:$0xff] }
  0x79   : > { %3027 = vmatprep.subr.mxu1 %v807_v7  ;;  %v2635_v16 = vld [vmem:[%s3541_s15 + $0x1e8] sm:$0xff]  ;;  %808 = vmatprep.subr.mxu0 %v807_v7  ;;  %v648_v18 = vmul.f32 %v518_v15, %v518_v15  ;;  %v805_v20 = vld [vmem:[#allocation2 + $0xf8] sm:$0xff]  ;;  %v2634_v22 = vld [vmem:[%s3541_s15 + $0x1e0] sm:$0xff]  ;;  %v647_v26 = vmul.f32 %v517_v21, %v517_v21 }
  0x7a   : > { %4925 = vst [vmem:[#allocation6_spill] sm:$0xff] %v3649_v11  ;;  %v714_v17 = vadd.f32 %v682_v5, %v650_v4  ;;  %3043 = vmatpush1.msra.mxu1 %v806_v14  ;;  %v680_v19 = vmul.f32 %v2635_v16, %v2635_v16  ;;  %809 = vmatpush1.msra.mxu0 %v806_v14  ;;  %v723_v23 = vsub.s32 1, %v3649_v11  ;;  %v719_v25 = vsub.s32 0, %v3649_v11  ;;  %v3657_v27 = vld [vmem:[#allocation2 + $0xa0] sm:$0xff]  ;;  %v516_v28 = vld [vmem:[%s3541_s15 + $0xd8] sm:$0xff]  ;;  %v3662_v34 = vld [vmem:[#allocation2 + $0x28] sm:$0xff] }
  0x7b   : > { %v713_v24 = vadd.f32 %v681_v13, %v649_v12  ;;  %3028 = vmatprep.subr.mxu1 %v805_v20  ;;  %v2633_v29 = vld [vmem:[%s3541_s15 + $0x1d8] sm:$0xff]  ;;  %810 = vmatprep.subr.mxu0 %v805_v20  ;;  %v679_v31 = vmul.f32 %v2634_v22, %v2634_v22  ;;  %v646_v32 = vmul.f32 %v516_v28, %v516_v28  ;;  %v515_v35 = vld [vmem:[%s3541_s15 + $0xd0] sm:$0xff]  ;;  %v514_v42 = vld [vmem:[%s3541_s15 + $0xc8] sm:$0xff] }
  0x7c   : > { %v712_v30 = vadd.f32 %v680_v19, %v648_v18  ;;  %3044 = vmatpush1.msra.mxu1 %v3657_v27  ;;  %v678_v33 = vmul.f32 %v2633_v29, %v2633_v29  ;;  %v2632_v36 = vld [vmem:[%s3541_s15 + $0x1d0] sm:$0xff]  ;;  %v3666_v37 = vrot.slane %v715_v6, %v723_v23  ;;  %v3668_v38 = vrot.slane %v715_v6, %v719_v25  ;;  %v2631_v43 = vld [vmem:[%s3541_s15 + $0x1c8] sm:$0xff]  ;;  %v513_v49 = vld [vmem:[%s3541_s15 + $0xc0] sm:$0xff] }
  0x7d   : > { %3029 = vmatprep.subr.mxu1 %v3662_v34  ;;  %v645_v39 = vmul.f32 %v515_v35, %v515_v35  ;;  %v677_v40 = vmul.f32 %v2632_v36, %v2632_v36  ;;  %v3671_v41 = vld [vmem:[#allocation2 + $0x10] sm:$0xff]  ;;  %v711_v44 = vadd.f32 %v679_v31, %v647_v26  ;;  %v644_v46 = vmul.f32 %v514_v42, %v514_v42  ;;  %v2630_v50 = vld [vmem:[%s3541_s15 + $0x1c0] sm:$0xff]  ;;  %v3690_v55 = vld [vmem:[#allocation2 + $0xa8] sm:$0xff] }
  0x7e   : > { %v710_v45 = vadd.f32 %v678_v33, %v646_v32  ;;  %3045 = vmatpush1.msra.mxu1 %v3671_v41  ;;  %v676_v47 = vmul.f32 %v2631_v43, %v2631_v43  ;;  %v3676_v48 = vld [vmem:[#allocation2 + $0xd0] sm:$0xff]  ;;  %v3681_v51 = vmul.f32 %v3666_v37, %v714_v17  ;;  %v3684_v52 = vmul.f32 %v3668_v38, %v713_v24  ;;  %v512_v56 = vld [vmem:[%s3541_s15 + $0xb8] sm:$0xff]  ;;  %v3701_v62 = vld [vmem:[#allocation2 + $0xc0] sm:$0xff] }
  0x7f   : > { %v3687_v53 = vmul.f32 %v3666_v37, %v712_v30  ;;  %v709_v54 = vadd.f32 %v677_v40, %v645_v39  ;;  %3030 = vmatprep.subr.mxu1 %v3676_v48  ;;  %v2629_v57 = vld [vmem:[%s3541_s15 + $0x1b8] sm:$0xff]  ;;  %v3695_v58 = vmul.f32 %v3668_v38, %v711_v44  ;;  %v643_v61 = vmul.f32 %v513_v49, %v513_v49  ;;  %v511_v63 = vld [vmem:[%s3541_s15 + $0xb0] sm:$0xff]  ;;  %v510_v6 = vld [vmem:[%s3541_s15 + $0xa8] sm:$0xff] }
  0x80   : > { %v3698_v59 = vmul.f32 %v3666_v37, %v710_v45  ;;  %v708_v60 = vadd.f32 %v676_v47, %v644_v46  ;;  %3046 = vmatpush1.msra.mxu1 %v3690_v55  ;;  %v2628_v0 = vld [vmem:[%s3541_s15 + $0x1b0] sm:$0xff]  ;;  %2336 = vst [vmem:[#allocation2 + $0x98] sm:$0xff] %v3681_v51  ;;  %2335 = vst [vmem:[#allocation2 + $0x20] sm:$0xff] %v3684_v52  ;;  %v675_v2 = vmul.f32 %v2630_v50, %v2630_v50  ;;  %v2627_v7 = vld [vmem:[%s3541_s15 + $0x1a8] sm:$0xff] }
  0x81   : > { %2334 = vst [vmem:[#allocation2 + $0xf8] sm:$0xff] %v3687_v53  ;;  %v3709_v1 = vmul.f32 %v3668_v38, %v709_v54  ;;  %v642_v3 = vmul.f32 %v512_v56, %v512_v56  ;;  %v674_v4 = vmul.f32 %v2629_v57, %v2629_v57  ;;  %3031 = vmatprep.subr.mxu1 %v3701_v62  ;;  %v3712_v5 = vld [vmem:[#allocation2 + $0x70] sm:$0xff]  ;;  %2333 = vst [vmem:[#allocation2 + $0xa0] sm:$0xff] %v3695_v58  ;;  %v509_v15 = vld [vmem:[%s3541_s15 + $0xa0] sm:$0xff] }
  0x82   : > { %2332 = vst [vmem:[#allocation2 + $0x28] sm:$0xff] %v3698_v59  ;;  %v3719_v8 = vmul.f32 %v3666_v37, %v708_v60  ;;  %v641_v9 = vmul.f32 %v511_v63, %v511_v63  ;;  %v673_v12 = vmul.f32 %v2628_v0, %v2628_v0  ;;  %3047 = vmatpush1.msra.mxu1 %v3712_v5  ;;  %v3722_v14 = vld [vmem:[#allocation2 + $0x90] sm:$0xff]  ;;  %v2626_v16 = vld [vmem:[%s3541_s15 + $0x1a0] sm:$0xff]  ;;  %v508_v22 = vld [vmem:[%s3541_s15 + $0x98] sm:$0xff] }
  0x83   : > { %v640_v13 = vmul.f32 %v510_v6, %v510_v6  ;;  %2331 = vst [vmem:[#allocation2 + $0x10] sm:$0xff] %v3709_v1  ;;  %v707_v17 = vadd.f32 %v675_v2, %v643_v61  ;;  %v706_v18 = vadd.f32 %v674_v4, %v642_v3  ;;  %v672_v19 = vmul.f32 %v2627_v7, %v2627_v7  ;;  %v3728_v21 = vld [vmem:[#allocation2 + $0xe0] sm:$0xff]  ;;  %v2625_v23 = vld [vmem:[%s3541_s15 + $0x198] sm:$0xff]  ;;  %v3734_v29 = vld [vmem:[#allocation2 + $0xc8] sm:$0xff] }
  0x84   : > { %3032 = vmatprep.subr.mxu1 %v3722_v14  ;;  %v639_v20 = vmul.f32 %v509_v15, %v509_v15  ;;  %2330 = vst [vmem:[#allocation2 + $0xd0] sm:$0xff] %v3719_v8  ;;  %v705_v24 = vadd.f32 %v673_v12, %v641_v9  ;;  %v671_v25 = vmul.f32 %v2626_v16, %v2626_v16  ;;  %v507_v30 = vld [vmem:[%s3541_s15 + $0x90] sm:$0xff]  ;;  %v3745_v39 = vld [vmem:[#allocation2 + $0x40] sm:$0xff]  ;;  %v506_v40 = vld [vmem:[%s3541_s15 + $0x88] sm:$0xff] }
  0x85   : > { %3048 = vmatpush1.msra.mxu1 %v3728_v21  ;;  %v638_v26 = vmul.f32 %v508_v22, %v508_v22  ;;  %v670_v28 = vmul.f32 %v2625_v23, %v2625_v23  ;;  %v2624_v31 = vld [vmem:[%s3541_s15 + $0x190] sm:$0xff]  ;;  %v3739_v32 = vmul.f32 %v3668_v38, %v707_v17  ;;  %v3742_v33 = vmul.f32 %v3666_v37, %v706_v18  ;;  %v2623_v42 = vld [vmem:[%s3541_s15 + $0x188] sm:$0xff]  ;;  %v3753_v47 = vld [vmem:[#allocation2 + $0x58] sm:$0xff] }
  0x86   : > { %v704_v35 = vadd.f32 %v672_v19, %v640_v13  ;;  %3033 = vmatprep.subr.mxu1 %v3734_v29  ;;  %v637_v36 = vmul.f32 %v507_v30, %v507_v30  ;;  %v3750_v43 = vmul.f32 %v3668_v38, %v705_v24  ;;  %v703_v44 = vadd.f32 %v671_v25, %v639_v20  ;;  %v505_v49 = vld [vmem:[%s3541_s15 + $0x80] sm:$0xff]  ;;  %v3763_v61 = vld [vmem:[#allocation2 + $0x38] sm:$0xff]  ;;  %v503_v9 = vld [vmem:[%s3541_s15 + $0x70] sm:$0xff] }
  0x87   : > { %v702_v45 = vadd.f32 %v670_v28, %v638_v26  ;;  %v669_v46 = vmul.f32 %v2624_v31, %v2624_v31  ;;  %3049 = vmatpush1.msra.mxu1 %v3745_v39  ;;  %v2622_v50 = vld [vmem:[%s3541_s15 + $0x180] sm:$0xff]  ;;  %2329 = vst [vmem:[#allocation2 + $0xa8] sm:$0xff] %v3739_v32  ;;  %2328 = vst [vmem:[#allocation2 + $0xc0] sm:$0xff] %v3742_v33  ;;  %v636_v56 = vmul.f32 %v506_v40, %v506_v40  ;;  %v504_v63 = vld [vmem:[%s3541_s15 + $0x78] sm:$0xff] }
  0x88   : > { %v3760_v54 = vmul.f32 %v3666_v37, %v704_v35  ;;  %v668_v57 = vmul.f32 %v2623_v42, %v2623_v42  ;;  %3034 = vmatprep.subr.mxu1 %v3753_v47  ;;  %v635_v60 = vmul.f32 %v505_v49, %v505_v49  ;;  %v2621_v0 = vld [vmem:[%s3541_s15 + $0x178] sm:$0xff]  ;;  %2327 = vst [vmem:[#allocation2 + $0x70] sm:$0xff] %v3750_v43  ;;  %v2620_v12 = vld [vmem:[%s3541_s15 + $0x170] sm:$0xff]  ;;  %v3781_v18 = vld [vmem:[#allocation2 + $0x8] sm:$0xff] }
  0x89   : > { %v3769_v2 = vmul.f32 %v3668_v38, %v703_v44  ;;  %v3772_v3 = vmul.f32 %v3666_v37, %v702_v45  ;;  %v701_v4 = vadd.f32 %v669_v46, %v637_v36  ;;  %v667_v6 = vmul.f32 %v2622_v50, %v2622_v50  ;;  %3050 = vmatpush1.msra.mxu1 %v3763_v61  ;;  %v3775_v7 = vld [vmem:[#allocation2 + $0x78] sm:$0xff]  ;;  %v502_v19 = vld [vmem:[%s3541_s15 + $0x68] sm:$0xff]  ;;  %v3791_v26 = vld [vmem:[#allocation2 + $0xf0] sm:$0xff] }
  0x8a   : > { %2326 = vst [vmem:[#allocation2 + $0x90] sm:$0xff] %v3760_v54  ;;  %v700_v13 = vadd.f32 %v668_v57, %v636_v56  ;;  %v634_v15 = vmul.f32 %v504_v63, %v504_v63  ;;  %v666_v16 = vmul.f32 %v2621_v0, %v2621_v0  ;;  %3035 = vmatprep.subr.mxu1 %v3775_v7  ;;  %v2619_v20 = vld [vmem:[%s3541_s15 + $0x168] sm:$0xff]  ;;  %v501_v28 = vld [vmem:[%s3541_s15 + $0x60] sm:$0xff]  ;;  %v500_v44 = vld [vmem:[%s3541_s15 + $0x58] sm:$0xff] }
  0x8b   : > { %v633_v17 = vmul.f32 %v503_v9, %v503_v9  ;;  %2325 = vst [vmem:[#allocation2 + $0xe0] sm:$0xff] %v3769_v2  ;;  %2324 = vst [vmem:[#allocation2 + $0xc8] sm:$0xff] %v3772_v3  ;;  %v3788_v22 = vmul.f32 %v3668_v38, %v701_v4  ;;  %v699_v23 = vadd.f32 %v667_v6, %v635_v60  ;;  %3051 = vmatpush1.msra.mxu1 %v3781_v18  ;;  %v2618_v30 = vld [vmem:[%s3541_s15 + $0x160] sm:$0xff]  ;;  %v2617_v45 = vld [vmem:[%s3541_s15 + $0x158] sm:$0xff] }
  0x8c   : > { %v665_v24 = vmul.f32 %v2620_v12, %v2620_v12  ;;  %v632_v25 = vmul.f32 %v502_v19, %v502_v19  ;;  %v3796_v31 = vmul.f32 %v3666_v37, %v700_v13  ;;  %v698_v35 = vadd.f32 %v666_v16, %v634_v15  ;;  %3036 = vmatprep.subr.mxu1 %v3791_v26  ;;  %v3799_v42 = vld [vmem:[#allocation2 + $0x60] sm:$0xff]  ;;  %v3808_v57 = vld [vmem:[#allocation2 + $0xb8] sm:$0xff]  ;;  %v499_v60 = vld [vmem:[%s3541_s15 + $0x50] sm:$0xff] }
  0x8d   : > { %v664_v36 = vmul.f32 %v2619_v20, %v2619_v20  ;;  %v631_v40 = vmul.f32 %v501_v28, %v501_v28  ;;  %2323 = vst [vmem:[#allocation2 + $0x40] sm:$0xff] %v3788_v22  ;;  %v3805_v46 = vmul.f32 %v3668_v38, %v699_v23  ;;  %v663_v50 = vmul.f32 %v2618_v30, %v2618_v30  ;;  %v2616_v63 = vld [vmem:[%s3541_s15 + $0x150] sm:$0xff]  ;;  %v3817_v12 = vld [vmem:[#allocation2 + $0xe8] sm:$0xff] }
  0x8e   : > { %v697_v49 = vadd.f32 %v665_v24, %v633_v17  ;;  %3052 = vmatpush1.msra.mxu1 %v3799_v42  ;;  %v630_v56 = vmul.f32 %v500_v44, %v500_v44  ;;  %2322 = vst [vmem:[#allocation2 + $0x58] sm:$0xff] %v3796_v31  ;;  %v3814_v0 = vmul.f32 %v3666_v37, %v698_v35  ;;  %4926 = vst [vmem:[#allocation7_spill] sm:$0xff] %v3817_v12  ;;  %v498_v13 = vld [vmem:[%s3541_s15 + $0x48] sm:$0xff]  ;;  %v497_v24 = vld [vmem:[%s3541_s15 + $0x40] sm:$0xff] }
  0x8f   : > { %v696_v4 = vadd.f32 %v664_v36, %v632_v25  ;;  %v662_v6 = vmul.f32 %v2617_v45, %v2617_v45  ;;  %3037 = vmatprep.subr.mxu1 %v3808_v57  ;;  %v629_v9 = vmul.f32 %v499_v60, %v499_v60  ;;  %v2615_v15 = vld [vmem:[%s3541_s15 + $0x148] sm:$0xff]  ;;  %2321 = vst [vmem:[#allocation2 + $0x38] sm:$0xff] %v3805_v46  ;;  %v2614_v25 = vld [vmem:[%s3541_s15 + $0x140] sm:$0xff]  ;;  %v496_v44 = vld [vmem:[%s3541_s15 + $0x38] sm:$0xff] }
  0x90   : > { %v3823_v16 = vmul.f32 %v3668_v38, %v697_v49  ;;  %v695_v17 = vadd.f32 %v663_v50, %v631_v40  ;;  %v661_v19 = vmul.f32 %v2616_v63, %v2616_v63  ;;  %3053 = vmatpush1.msra.mxu1 %v3817_v12  ;;  %v628_v20 = vmul.f32 %v498_v13, %v498_v13  ;;  %v3826_v23 = vld [vmem:[#allocation2 + $0x88] sm:$0xff]  ;;  %v3835_v40 = vld [vmem:[#allocation2 + $0x80] sm:$0xff]  ;;  %v2613_v45 = vld [vmem:[%s3541_s15 + $0x138] sm:$0xff] }
  0x91   : > { %4927 = vst [vmem:[#allocation8_spill] sm:$0xff] %v3826_v23  ;;  %2320 = vst [vmem:[#allocation2 + $0x78] sm:$0xff] %v3814_v0  ;;  %v3832_v28 = vmul.f32 %v3666_v37, %v696_v4  ;;  %v694_v30 = vadd.f32 %v662_v6, %v630_v56  ;;  %v660_v35 = vmul.f32 %v2615_v15, %v2615_v15  ;;  %3038 = vmatprep.subr.mxu1 %v3826_v23  ;;  %v3844_v63 = vld [vmem:[#allocation2 + $0x48] sm:$0xff]  ;;  %v495_v4 = vld [vmem:[%s3541_s15 + $0x30] sm:$0xff] }
  0x92   : > { %v627_v36 = vmul.f32 %v497_v24, %v497_v24  ;;  %4928 = vst [vmem:[#allocation9_spill] sm:$0xff] %v3835_v40  ;;  %2319 = vst [vmem:[#allocation2 + $0x8] sm:$0xff] %v3823_v16  ;;  %v3841_v49 = vmul.f32 %v3668_v38, %v695_v17  ;;  %v693_v50 = vadd.f32 %v661_v19, %v629_v9  ;;  %3054 = vmatpush1.msra.mxu1 %v3835_v40  ;;  %v2612_v6 = vld [vmem:[%s3541_s15 + $0x130] sm:$0xff]  ;;  %v494_v24 = vld [vmem:[%s3541_s15 + $0x28] sm:$0xff] }
  0x93   : > { %v659_v60 = vmul.f32 %v2614_v25, %v2614_v25  ;;  %v626_v56 = vmul.f32 %v496_v44, %v496_v44  ;;  %4929 = vst [vmem:[#allocation10_spill] sm:$0xff] %v3844_v63  ;;  %2318 = vst [vmem:[#allocation2 + $0xf0] sm:$0xff] %v3832_v28  ;;  %v3850_v13 = vmul.f32 %v3666_v37, %v694_v30  ;;  %3039 = vmatprep.subr.mxu1 %v3844_v63  ;;  %v3853_v19 = vld [vmem:[#allocation2 + $0x30] sm:$0xff]  ;;  %v2611_v25 = vld [vmem:[%s3541_s15 + $0x128] sm:$0xff] }
  0x94   : > { %v692_v15 = vadd.f32 %v660_v35, %v628_v20  ;;  %v658_v17 = vmul.f32 %v2613_v45, %v2613_v45  ;;  %v625_v9 = vmul.f32 %v495_v4, %v495_v4  ;;  %4930 = vst [vmem:[#allocation11_spill] sm:$0xff] %v3853_v19  ;;  %2317 = vst [vmem:[#allocation2 + $0x60] sm:$0xff] %v3841_v49  ;;  %3055 = vmatpush1.msra.mxu1 %v3853_v19  ;;  %v3862_v35 = vld [vmem:[#allocation2 + $0x68] sm:$0xff]  ;;  %v493_v45 = vld [vmem:[%s3541_s15 + $0x20] sm:$0xff] }
  0x95   : > { %v3859_v44 = vmul.f32 %v3668_v38, %v693_v50  ;;  %v691_v10 = vadd.f32 %v659_v60, %v627_v36  ;;  %v657_v30 = vmul.f32 %v2612_v6, %v2612_v6  ;;  %v624_v20 = vmul.f32 %v494_v24, %v494_v24  ;;  %4932 = vst [vmem:[#allocation13_spill] sm:$0xff] %v3862_v35  ;;  %v2610_v4 = vld [vmem:[%s3541_s15 + $0x120] sm:$0xff]  ;;  %v3871_v60 = vld [vmem:[#allocation2 + $0x50] sm:$0xff]  ;;  %v492_v6 = vld [vmem:[%s3541_s15 + $0x18] sm:$0xff] }
  0x96   : > { %2316 = vst [vmem:[#allocation2 + $0xb8] sm:$0xff] %v3850_v13  ;;  %v3868_v11 = vmul.f32 %v3666_v37, %v692_v15  ;;  %v690_v63 = vadd.f32 %v658_v17, %v626_v56  ;;  %v656_v50 = vmul.f32 %v2611_v25, %v2611_v25  ;;  %3040 = vmatprep.subr.mxu1 %v3862_v35  ;;  %4934 = vst [vmem:[#allocation15_spill] sm:$0xff] %v3871_v60  ;;  %v2609_v24 = vld [vmem:[%s3541_s15 + $0x118] sm:$0xff]  ;;  %v491_v25 = vld [vmem:[%s3541_s15 + $0x10] sm:$0xff] }
  0x97   : > { %4931 = vst [vmem:[#allocation12_spill] sm:$0xff] %v3859_v44  ;;  %v623_v36 = vmul.f32 %v493_v45, %v493_v45  ;;  %2315 = vst [vmem:[#allocation2 + $0xe8] sm:$0xff] %v3859_v44  ;;  %v3877_v19 = vmul.f32 %v3668_v38, %v691_v10  ;;  %v689_v40 = vadd.f32 %v657_v30, %v625_v9  ;;  %3056 = vmatpush1.msra.mxu1 %v3871_v60  ;;  %v3880_v17 = vld [vmem:[#allocation2 + $0x18] sm:$0xff]  ;;  %v2608_v45 = vld [vmem:[%s3541_s15 + $0x110] sm:$0xff] }
  0x98   : > { %4933 = vst [vmem:[#allocation14_spill] sm:$0xff] %v3868_v11  ;;  %v655_v15 = vmul.f32 %v2610_v4, %v2610_v4  ;;  %v622_v56 = vmul.f32 %v492_v6, %v492_v6  ;;  %4936 = vst [vmem:[#allocation17_spill] sm:$0xff] %v3880_v17  ;;  %v3886_v35 = vmul.f32 %v3666_v37, %v690_v63  ;;  %3041 = vmatprep.subr.mxu1 %v3880_v17  ;;  %v3889_v30 = vld [vmem:[#allocation2 + $0xd8] sm:$0xff]  ;;  %v490_v4 = vld [vmem:[%s3541_s15 + $0x8] sm:$0xff] }
  0x99   : > { %4935 = vst [vmem:[#allocation16_spill] sm:$0xff] %v3877_v19  ;;  %2314 = vst [vmem:[#allocation2 + $0x88] sm:$0xff] %v3868_v11  ;;  %v688_v23 = vadd.f32 %v656_v50, %v624_v20  ;;  %v654_v10 = vmul.f32 %v2609_v24, %v2609_v24  ;;  %v621_v9 = vmul.f32 %v491_v25, %v491_v25  ;;  %v2607_v6 = vld [vmem:[%s3541_s15 + $0x108] sm:$0xff]  ;;  %3057 = vmatpush1.msra.mxu1 %v3889_v30  ;;  %v3898_v20 = vld [vmem:[#allocation2] sm:$0xff] }
  0x9a   : > { %2313 = vst [vmem:[#allocation2 + $0x80] sm:$0xff] %v3877_v19  ;;  %v3895_v60 = vmul.f32 %v3668_v38, %v689_v40  ;;  %v687_v11 = vadd.f32 %v655_v15, %v623_v36  ;;  %v653_v44 = vmul.f32 %v2608_v45, %v2608_v45  ;;  %v620_v63 = vmul.f32 %v490_v4, %v490_v4  ;;  %v489_v50 = vld [vmem:[%s3541_s15] sm:$0xff]  ;;  %v3907_v12 = vld [vmem:[#allocation2 + $0xb0] sm:$0xff] }
  0x9b   : > { %v2606_v24 = vld [vmem:[%s3541_s15 + $0x100] sm:$0xff]  ;;  %2312 = vst [vmem:[#allocation2 + $0x48] sm:$0xff] %v3886_v35  ;;  %v3904_v25 = vmul.f32 %v3666_v37, %v688_v23  ;;  %v686_v17 = vadd.f32 %v654_v10, %v622_v56  ;;  %v652_v19 = vmul.f32 %v2607_v6, %v2607_v6  ;;  %3042 = vmatprep.subr.mxu1 %v3898_v20  ;;  %v4937_v10 = vmov 0.0   ;;  %v4082_v6 = vld [vmem:[%s4879_s3 + $0xe8] sm:$0xff] }
  0x9c   : > { %v619_v40 = vmul.f32 %v489_v50, %v489_v50  ;;  %v2662_v36 = vld [vmem:[%s3534_s6 + $0xc0] sm:$0xff]  ;;  %2311 = vst [vmem:[#allocation2 + $0x30] sm:$0xff] %v3895_v60  ;;  %v3912_v15 = vmul.f32 %v3668_v38, %v687_v11  ;;  %v685_v45 = vadd.f32 %v653_v44, %v621_v9  ;;  %v651_v4 = vmul.f32 %v2606_v24, %v2606_v24  ;;  %v4073_v9 = vld [vmem:[%s4879_s3 + $0x70] sm:$0xff]  ;;  %v4107_v24 = vld [vmem:[%s4879_s3 + $0xd8] sm:$0xff] }
  0x9d   : > { %3058 = vmatpush1.msra.mxu1 %v3907_v12  ;;  %811 = vmatpush1.msra.mxu0 %v3657_v27  ;;  %2310 = vst [vmem:[#allocation2 + $0x68] sm:$0xff] %v3904_v25  ;;  %v3918_v23 = vmul.f32 %v3666_v37, %v686_v17  ;;  %v684_v56 = vadd.f32 %v652_v19, %v620_v63  ;;  %v2663_v27 = vld [vmem:[%s3534_s6 + $0xc8] sm:$0xff]  ;;  %v4056_v19 = vld [vmem:[%s4879_s3 + $0xf8] sm:$0xff]  ;;  %v4099_v50 = vld [vmem:[%s4879_s3 + $0x60] sm:$0xff] }
  0x9e   : > { %921 = vmatmul.mubr.f32.vlgmr.msra.gmra.mxu1 %v2662_v36  ;;  %969 = vmatprep.subr.mxu1 %v3681_v51  ;;  %2309 = vst [vmem:[#allocation2 + $0x50] sm:$0xff] %v3912_v15  ;;  %v3923_v11 = vmul.f32 %v3668_v38, %v685_v45  ;;  %v683_v44 = vadd.f32 %v651_v4, %v619_v40  ;;  %v4087_v63 = vld [vmem:[%s4879_s3 + $0x68] sm:$0xff]  ;;  %v4119_v40 = vld [vmem:[%s4879_s3 + $0xd0] sm:$0xff]  ;;  %v4143_v4 = vld [vmem:[%s4879_s3 + $0xc0] sm:$0xff] }
  0x9f   : > { %970 = vmatpush1.msra.mxu1 %v3684_v52  ;;  %926 = vmatprep.mubr.f32.mxu1 %v4937_v10  ;;  %2308 = vst [vmem:[#allocation2 + $0x18] sm:$0xff] %v3918_v23  ;;  %v3930_v17 = vmul.f32 %v3666_v37, %v684_v56  ;;  %v2665_v37 = vld [vmem:[%s3534_s6 + $0xd8] sm:$0xff]  ;;  %v4939_v52 = vld [vmem:[#allocation12_spill] sm:$0xff]  ;;  %v4137_v45 = vld [vmem:[%s4879_s3 + $0x48] sm:$0xff] }
  0xa0   : > { %971 = vmatprep.subr.mxu1 %v3687_v53  ;;  %812 = vmatprep.subr.mxu0 %v3662_v34  ;;  %2307 = vst [vmem:[#allocation2 + $0xd8] sm:$0xff] %v3923_v11  ;;  %v3936_v51 = vmul.f32 %v3668_v38, %v683_v44  ;;  %v2664_v34 = vld [vmem:[%s3534_s6 + $0xd0] sm:$0xff]  ;;  %v2666_v38 = vld [vmem:[%s3534_s6 + $0xe0] sm:$0xff]  ;;  %v4155_v56 = vld [vmem:[%s4879_s3 + $0xb8] sm:$0xff] }
  0xa1   : > { %972 = vmatpush1.msra.mxu1 %v3695_v58  ;;  %813 = vmatpush1.msra.mxu0 %v3671_v41  ;;  %2306 = vst [vmem:[#allocation2] sm:$0xff] %v3930_v17  ;;  %v2667_v41 = vld [vmem:[%s3534_s6 + $0xe8] sm:$0xff]  ;;  %v4940_v53 = vld [vmem:[#allocation8_spill] sm:$0xff]  ;;  %v4941_v58 = vld [vmem:[#allocation14_spill] sm:$0xff] }
  0xa2   : > { %927 = vmatmul.mubr.f32.gmra.mxu1 %v2663_v27  ;;  %973 = vmatprep.subr.mxu1 %v3698_v59  ;;  %2305 = vst [vmem:[#allocation2 + $0xb0] sm:$0xff] %v3936_v51  ;;  %v4942_v59 = vld [vmem:[#allocation9_spill] sm:$0xff]  ;;  %v4125_v36 = vld [vmem:[%s4879_s3 + $0x50] sm:$0xff]  ;;  %4951 = vst [vmem:[#allocation8_spill] sm:$0xff] %v4155_v56 }
  0xa3   : > { %974 = vmatpush1.msra.mxu1 %v3709_v1  ;;  %814 = vmatprep.subr.mxu0 %v3676_v48  ;;  %v4938_v48 = vld [vmem:[#allocation7_spill] sm:$0xff]  ;;  %v4944_v1 = vld [vmem:[#allocation10_spill] sm:$0xff]  ;;  %v4167_v44 = vld [vmem:[%s4879_s3 + $0xb0] sm:$0xff] }
  0xa4   : > { %975 = vmatprep.subr.mxu1 %v3719_v8  ;;  %815 = vmatpush1.msra.mxu0 %v3690_v55  ;;  %v2668_v55 = vld [vmem:[%s3534_s6 + $0xf0] sm:$0xff]  ;;  %v4946_v8 = vld [vmem:[#allocation13_spill] sm:$0xff]  ;;  %4949 = vst [vmem:[#allocation7_spill] sm:$0xff] %v4143_v4  ;;  %4953 = vst [vmem:[#allocation9_spill] sm:$0xff] %v4167_v44 }
  0xa5   : > { %932 = vmatprep.mubr.f32.mxu1 %v4937_v10  ;;  %976 = vmatpush1.msra.mxu1 %v3739_v32  ;;  %v2654_v32 = vld [vmem:[%s3534_s6 + $0x80] sm:$0xff]  ;;  %v4173_v27 = vld [vmem:[%s4879_s3 + $0x30] sm:$0xff] }
  0xa6   : > { %816 = vmatprep.subr.mxu0 %v3701_v62  ;;  %933 = vmatmul.mubr.f32.gmra.mxu1 %v2664_v34  ;;  %v4943_v62 = vld [vmem:[#allocation16_spill] sm:$0xff]  ;;  %v4191_v34 = vld [vmem:[%s4879_s3 + $0xa0] sm:$0xff] }
  0xa7   : > { %977 = vmatprep.subr.mxu1 %v3742_v33  ;;  %817 = vmatpush1.msra.mxu0 %v3712_v5  ;;  %v4945_v5 = vld [vmem:[#allocation11_spill] sm:$0xff]  ;;  %v586_v33 = vld [vmem:[%s3534_s6] sm:$0xff]  ;;  %4954 = vst [vmem:[#allocation16_spill] sm:$0xff] %v4173_v27  ;;  %4957 = vst [vmem:[#allocation13_spill] sm:$0xff] %v4191_v34 }
  0xa8   : > { %978 = vmatpush1.msra.mxu1 %v3750_v43  ;;  %818 = vmatprep.subr.mxu0 %v3722_v14  ;;  %v2669_v14 = vld [vmem:[%s3534_s6 + $0xf8] sm:$0xff]  ;;  %v587_v43 = vld [vmem:[%s3534_s6 + $0x8] sm:$0xff] }
  0xa9   : > { %979 = vmatprep.subr.mxu1 %v3760_v54  ;;  %819 = vmatpush1.msra.mxu0 %v3728_v21  ;;  %v4947_v21 = vld [vmem:[#allocation15_spill] sm:$0xff]  ;;  %v588_v54 = vld [vmem:[%s3534_s6 + $0x10] sm:$0xff] }
  0xaa   : > { %938 = vmatprep.mubr.f32.mxu1 %v4937_v10  ;;  %980 = vmatpush1.msra.mxu1 %v3769_v2  ;;  %v589_v2 = vld [vmem:[%s3534_s6 + $0x18] sm:$0xff] }
  0xab   : > { %820 = vmatprep.subr.mxu0 %v3734_v29  ;;  %939 = vmatmul.mubr.f32.gmra.mxu1 %v2665_v37  ;;  %v4948_v29 = vld [vmem:[#allocation17_spill] sm:$0xff]  ;;  %v4197_v37 = vld [vmem:[%s4879_s3 + $0x20] sm:$0xff] }
  0xac   : > { %981 = vmatprep.subr.mxu1 %v3772_v3  ;;  %821 = vmatpush1.msra.mxu0 %v3745_v39  ;;  %v2655_v39 = vld [vmem:[%s3534_s6 + $0x88] sm:$0xff]  ;;  %v2658_v3 = vld [vmem:[%s3534_s6 + $0xa0] sm:$0xff]  ;;  %4958 = vst [vmem:[#allocation15_spill] sm:$0xff] %v4197_v37 }
  0xad   : > { %982 = vmatpush1.msra.mxu1 %v3788_v22  ;;  %822 = vmatprep.subr.mxu0 %v3753_v47  ;;  %v2656_v47 = vld [vmem:[%s3534_s6 + $0x90] sm:$0xff]  ;;  %v591_v22 = vld [vmem:[%s3534_s6 + $0x28] sm:$0xff] }
  0xae   : > { %983 = vmatprep.subr.mxu1 %v3796_v31  ;;  %823 = vmatpush1.msra.mxu0 %v3763_v61  ;;  %v2657_v61 = vld [vmem:[%s3534_s6 + $0x98] sm:$0xff]  ;;  %v592_v31 = vld [vmem:[%s3534_s6 + $0x30] sm:$0xff] }
  0xaf   : > { %944 = vmatprep.mubr.f32.mxu1 %v4937_v10  ;;  %984 = vmatpush1.msra.mxu1 %v3805_v46  ;;  %v593_v46 = vld [vmem:[%s3534_s6 + $0x38] sm:$0xff] }
  0xb0   : > { %824 = vmatprep.subr.mxu0 %v3775_v7  ;;  %945 = vmatmul.mubr.f32.gmra.mxu1 %v2666_v38  ;;  %v590_v7 = vld [vmem:[%s3534_s6 + $0x20] sm:$0xff]  ;;  %v4203_v38 = vld [vmem:[%s4879_s3 + $0x98] sm:$0xff] }
  0xb1   : > { %985 = vmatprep.subr.mxu1 %v3814_v0  ;;  %825 = vmatpush1.msra.mxu0 %v3781_v18  ;;  %v2659_v18 = vld [vmem:[%s3534_s6 + $0xa8] sm:$0xff]  ;;  %4959 = vst [vmem:[#allocation17_spill] sm:$0xff] %v4203_v38 }
  0xb2   : > { %986 = vmatpush1.msra.mxu1 %v3823_v16  ;;  %826 = vmatprep.subr.mxu0 %v3791_v26  ;;  %v2660_v26 = vld [vmem:[%s3534_s6 + $0xb0] sm:$0xff]  ;;  %v595_v0 = vld [vmem:[%s3534_s6 + $0x48] sm:$0xff]  ;;  %v597_v16 = vld [vmem:[%s3534_s6 + $0x58] sm:$0xff] }
  0xb3   : > { %987 = vmatprep.subr.mxu1 %v3832_v28  ;;  %827 = vmatpush1.msra.mxu0 %v3799_v42  ;;  %v2661_v42 = vld [vmem:[%s3534_s6 + $0xb8] sm:$0xff]  ;;  %v598_v28 = vld [vmem:[%s3534_s6 + $0x60] sm:$0xff] }
  0xb4   : > { %950 = vmatprep.mubr.f32.mxu1 %v4937_v10  ;;  %988 = vmatpush1.msra.mxu1 %v3841_v49  ;;  %v599_v49 = vld [vmem:[%s3534_s6 + $0x68] sm:$0xff] }
  0xb5   : > { %828 = vmatprep.subr.mxu0 %v3808_v57  ;;  %951 = vmatmul.mubr.f32.gmra.mxu1 %v2667_v41  ;;  %v594_v57 = vld [vmem:[%s3534_s6 + $0x40] sm:$0xff]  ;;  %v4209_v41 = vld [vmem:[%s4879_s3 + $0x18] sm:$0xff] }
  0xb6   : > { %989 = vmatprep.subr.mxu1 %v3850_v13  ;;  %829 = vmatpush1.msra.mxu0 %v4938_v48  ;;  %v600_v13 = vld [vmem:[%s3534_s6 + $0x70] sm:$0xff]  ;;  %4960 = vst [vmem:[#allocation18_spill] sm:$0xff] %v4209_v41 }
  0xb7   : > { %990 = vmatpush1.msra.mxu1 %v4939_v52  ;;  %830 = vmatprep.subr.mxu0 %v4940_v53  ;;  %v4215_v48 = vld [vmem:[%s4879_s3 + $0x90] sm:$0xff]  ;;  %v571_v53 = vld [vmem:[%s4879_s3 + $0x88] sm:$0xff] }
  0xb8   : > { %991 = vmatprep.subr.mxu1 %v4941_v58  ;;  %831 = vmatpush1.msra.mxu0 %v4942_v59  ;;  %4961 = vst [vmem:[#allocation19_spill] sm:$0xff] %v4215_v48  ;;  %v4221_v52 = vld [vmem:[%s4879_s3 + $0x10] sm:$0xff]  ;;  %v570_v58 = vld [vmem:[%s4879_s3 + $0x80] sm:$0xff] }
  0xb9   : > { %956 = vmatprep.mubr.f32.mxu1 %v4937_v10  ;;  %992 = vmatpush1.msra.mxu1 %v4943_v62  ;;  %4962 = vst [vmem:[#allocation20_spill] sm:$0xff] %v4221_v52  ;;  %v554_v59 = vld [vmem:[%s4879_s3] sm:$0xff]  ;;  %v1419_v62 = vld [vmem:[#allocation3 + $0x98] sm:$0xff] }
  0xba   : > { %832 = vmatprep.subr.mxu0 %v4944_v1  ;;  %957 = vmatmul.mubr.f32.gmra.mxu1 %v2668_v55  ;;  %v555_v55 = vld [vmem:[%s4879_s3 + $0x8] sm:$0xff] }
  0xbb   : > { %993 = vmatprep.subr.mxu1 %v3886_v35  ;;  %833 = vmatpush1.msra.mxu0 %v4945_v5  ;;  %v4061_v35 = vld [vmem:[%s4879_s3 + $0x78] sm:$0xff]  ;;  %v1418_v1 = vld [vmem:[#allocation3 + $0x28] sm:$0xff]  ;;  %v1417_v5 = vld [vmem:[#allocation3] sm:$0xff] }
  0xbc   : > { %994 = vmatpush1.msra.mxu1 %v3895_v60  ;;  %834 = vmatprep.subr.mxu0 %v4946_v8  ;;  %v4068_v60 = vld [vmem:[%s4879_s3 + $0xf0] sm:$0xff]  ;;  %v1416_v8 = vld [vmem:[#allocation3 + $0xb8] sm:$0xff] }
  0xbd   : > { %995 = vmatprep.subr.mxu1 %v3904_v25  ;;  %835 = vmatpush1.msra.mxu0 %v4947_v21  ;;  %v4113_v25 = vld [vmem:[%s4879_s3 + $0x58] sm:$0xff] }
  0xbe   : > { %962 = vmatprep.mubr.f32.mxu1 %v4937_v10  ;;  %996 = vmatpush1.msra.mxu1 %v3912_v15  ;;  %v4131_v15 = vld [vmem:[%s4879_s3 + $0xc8] sm:$0xff]  ;;  %v1414_v21 = vld [vmem:[#allocation3 + $0xf8] sm:$0xff] }
  0xbf   : > { %836 = vmatprep.subr.mxu0 %v4948_v29  ;;  %963 = vmatmul.mubr.f32.gmra.mxu1 %v2669_v14  ;;  %v1415_v14 = vld [vmem:[#allocation3 + $0xc0] sm:$0xff]  ;;  %v1413_v29 = vld [vmem:[#allocation3 + $0x48] sm:$0xff] }
  0xc0   : > { %997 = vmatprep.subr.mxu1 %v3918_v23  ;;  %837 = vmatpush1.msra.mxu0 %v3889_v30  ;;  %v601_v30 = vld [vmem:[%s3534_s6 + $0x78] sm:$0xff]  ;;  %v4149_v23 = vld [vmem:[%s4879_s3 + $0x40] sm:$0xff] }
  0xc1   : > { %998 = vmatpush1.msra.mxu1 %v3923_v11  ;;  %838 = vmatprep.subr.mxu0 %v3898_v20  ;;  %v4094_v20 = vld [vmem:[%s4879_s3 + $0xe0] sm:$0xff]  ;;  %4950 = vst [vmem:[#allocation12_spill] sm:$0xff] %v4149_v23  ;;  %v4161_v11 = vld [vmem:[%s4879_s3 + $0x38] sm:$0xff] }
  0xc2   : > { %999 = vmatprep.subr.mxu1 %v3930_v17  ;;  %839 = vmatpush1.msra.mxu0 %v3907_v12  ;;  %v596_v12 = vld [vmem:[%s3534_s6 + $0x50] sm:$0xff]  ;;  %4952 = vst [vmem:[#allocation14_spill] sm:$0xff] %v4161_v11  ;;  %v4179_v17 = vld [vmem:[%s4879_s3 + $0xa8] sm:$0xff] }
  0xc3   : > { %1000 = vmatpush1.msra.mxu1 %v3936_v51  ;;  %1033 = vmatprep.mubr.f32.mxu1 %v4937_v10  ;;  %4955 = vst [vmem:[#allocation10_spill] sm:$0xff] %v4179_v17  ;;  %v4185_v51 = vld [vmem:[%s4879_s3 + $0x28] sm:$0xff] }
  0xc4   : > { %873 = vmatmul.mubr.f32.vlgmr.msra.gmra.mxu0 %v2654_v32  ;;  %1034 = vmatmul.mubr.f32.vlgmr.msra.gmra.mxu1 %v586_v33  ;;  %4956 = vst [vmem:[#allocation11_spill] sm:$0xff] %v4185_v51  ;;  %v1412_v32 = vld [vmem:[#allocation3 + $0x88] sm:$0xff]  ;;  %v1411_v33 = vld [vmem:[#allocation3 + $0xf0] sm:$0xff] }
  0xc5   : > { %878 = vmatprep.mubr.f32.mxu0 %v4937_v10  ;;  %1039 = vmatprep.mubr.f32.mxu1 %v4937_v10 }
  0xc6   : > { %2691 = vmatprep.subr.mxu0 %v4056_v19  ;;  %1420 = vmatprep.subr.mxu1 %v1419_v62 }
  0xc7   : > { %2692 = vmatpush3.msra.mxu0 %v4061_v35  ;;  %1421 = vmatpush1.msra.mxu1 %v1418_v1  ;;  %v4245_v1 = vld [vmem:[%s3534_s6 + $0x180] sm:$0xff] }
  0xc8   : > { %879 = vmatmul.mubr.f32.gmra.mxu0 %v2655_v39  ;;  %1040 = vmatmul.mubr.f32.gmra.mxu1 %v587_v43  ;;  %v1410_v39 = vld [vmem:[#allocation3 + $0x20] sm:$0xff]  ;;  %v1409_v43 = vld [vmem:[#allocation3 + $0x30] sm:$0xff] }
  0xc9   : > { %884 = vmatprep.mubr.f32.mxu0 %v4937_v10  ;;  %1045 = vmatprep.mubr.f32.mxu1 %v4937_v10 }
  0xca   : > { %2693 = vmatprep.subr.mxu0 %v4068_v60  ;;  %1422 = vmatprep.subr.mxu1 %v1417_v5 }
  0xcb   : > { %2694 = vmatpush3.msra.mxu0 %v4073_v9  ;;  %1423 = vmatpush1.msra.mxu1 %v1416_v8  ;;  %v4252_v8 = vld [vmem:[%s3534_s6 + $0x188] sm:$0xff] }
  0xcc   : > { %885 = vmatmul.mubr.f32.gmra.mxu0 %v2656_v47  ;;  %1046 = vmatmul.mubr.f32.gmra.mxu1 %v588_v54  ;;  %v1408_v47 = vld [vmem:[#allocation3 + $0xd8] sm:$0xff]  ;;  %v1407_v54 = vld [vmem:[#allocation3 + $0xa0] sm:$0xff]  ;;  %4963 = vst [vmem:[#allocation21_spill] sm:$0xff] %v4252_v8 }
  0xcd   : > { %890 = vmatprep.mubr.f32.mxu0 %v4937_v10  ;;  %1051 = vmatprep.mubr.f32.mxu1 %v4937_v10 }
  0xce   : > { %2695 = vmatprep.subr.mxu0 %v4082_v6  ;;  %1424 = vmatprep.subr.mxu1 %v1415_v14 }
  0xcf   : > { %2696 = vmatpush3.msra.mxu0 %v4087_v63  ;;  %1425 = vmatpush1.msra.mxu1 %v1414_v21 }
  0xd0   : > { %891 = vmatmul.mubr.f32.gmra.mxu0 %v2657_v61  ;;  %1052 = vmatmul.mubr.f32.gmra.mxu1 %v589_v2  ;;  %v1406_v61 = vld [vmem:[#allocation3 + $0x50] sm:$0xff] }
  0xd1   : > { %896 = vmatprep.mubr.f32.mxu0 %v4937_v10  ;;  %1057 = vmatprep.mubr.f32.mxu1 %v4937_v10  ;;  %v1405_v2 = vld [vmem:[#allocation3 + $0x70] sm:$0xff] }
  0xd2   : > { %2697 = vmatprep.subr.mxu0 %v4094_v20  ;;  %1426 = vmatprep.subr.mxu1 %v1413_v29  ;;  %v4261_v29 = vld [vmem:[%s3534_s6 + $0x190] sm:$0xff] }
  0xd3   : > { %2698 = vmatpush3.msra.mxu0 %v4099_v50  ;;  %1427 = vmatpush1.msra.mxu1 %v1412_v32  ;;  %4964 = vst [vmem:[#allocation22_spill] sm:$0xff] %v4261_v29 }
  0xd4   : > { %897 = vmatmul.mubr.f32.gmra.mxu0 %v2658_v3  ;;  %1058 = vmatmul.mubr.f32.gmra.mxu1 %v590_v7  ;;  %v1404_v3 = vld [vmem:[#allocation3 + $0x10] sm:$0xff]  ;;  %v1403_v7 = vld [vmem:[#allocation3 + $0x68] sm:$0xff] }
  0xd5   : > { %902 = vmatprep.mubr.f32.mxu0 %v4937_v10  ;;  %1063 = vmatprep.mubr.f32.mxu1 %v4937_v10 }
  0xd6   : > { %2699 = vmatprep.subr.mxu0 %v4107_v24  ;;  %1428 = vmatprep.subr.mxu1 %v1411_v33  ;;  %v4268_v33 = vld [vmem:[%s3534_s6 + $0x198] sm:$0xff] }
  0xd7   : > { %2700 = vmatpush3.msra.mxu0 %v4113_v25  ;;  %1429 = vmatpush1.msra.mxu1 %v1410_v39  ;;  %4965 = vst [vmem:[#allocation23_spill] sm:$0xff] %v4268_v33 }
  0xd8   : > { %903 = vmatmul.mubr.f32.gmra.mxu0 %v2659_v18  ;;  %1064 = vmatmul.mubr.f32.gmra.mxu1 %v591_v22  ;;  %v1402_v18 = vld [vmem:[#allocation3 + $0x18] sm:$0xff]  ;;  %v1401_v22 = vld [vmem:[#allocation3 + $0x60] sm:$0xff] }
  0xd9   : > { %908 = vmatprep.mubr.f32.mxu0 %v4937_v10  ;;  %1069 = vmatprep.mubr.f32.mxu1 %v4937_v10 }
  0xda   : > { %2701 = vmatprep.subr.mxu0 %v4119_v40  ;;  %1430 = vmatprep.subr.mxu1 %v1409_v43 }
  0xdb   : > { %2702 = vmatpush3.msra.mxu0 %v4125_v36  ;;  %1431 = vmatpush1.msra.mxu1 %v1408_v47  ;;  %v4277_v47 = vld [vmem:[%s3534_s6 + $0x1a0] sm:$0xff] }
  0xdc   : > { %909 = vmatmul.mubr.f32.gmra.mxu0 %v2660_v26  ;;  %1070 = vmatmul.mubr.f32.gmra.mxu1 %v592_v31  ;;  %v1400_v26 = vld [vmem:[#allocation3 + $0xe0] sm:$0xff]  ;;  %4966 = vst [vmem:[#allocation24_spill] sm:$0xff] %v4277_v47 }
  0xdd   : > { %914 = vmatprep.mubr.f32.mxu0 %v4937_v10  ;;  %1075 = vmatprep.mubr.f32.mxu1 %v4937_v10  ;;  %v1399_v31 = vld [vmem:[#allocation3 + $0x40] sm:$0xff] }
  0xde   : > { %2703 = vmatprep.subr.mxu0 %v4131_v15  ;;  %1432 = vmatprep.subr.mxu1 %v1407_v54 }
  0xdf   : > { %2704 = vmatpush3.msra.mxu0 %v4137_v45  ;;  %1433 = vmatpush1.msra.mxu1 %v1406_v61 }
  0xe0   : > { %915 = vmatmul.mubr.f32.gmra.mxu0 %v2661_v42  ;;  %1076 = vmatmul.mubr.f32.gmra.mxu1 %v593_v46  ;;  %v1398_v42 = vld [vmem:[#allocation3 + $0x38] sm:$0xff]  ;;  %v1397_v46 = vld [vmem:[#allocation3 + $0xb0] sm:$0xff] }
  0xe1   : > { %1081 = vmatprep.mubr.f32.mxu1 %v4937_v10  ;;  %2705 = vmatprep.subr.mxu0 %v4143_v4 }
  0xe2   : > { %2706 = vmatpush3.msra.mxu0 %v4149_v23  ;;  %1434 = vmatprep.subr.mxu1 %v1405_v2  ;;  %v4286_v2 = vld [vmem:[%s3534_s6 + $0x1a8] sm:$0xff] }
  0xe3   : > { %2707 = vmatprep.subr.mxu0 %v4155_v56  ;;  %1435 = vmatpush1.msra.mxu1 %v1404_v3  ;;  %4967 = vst [vmem:[#allocation25_spill] sm:$0xff] %v4286_v2 }
  0xe4   : > { %1082 = vmatmul.mubr.f32.gmra.mxu1 %v594_v57  ;;  %2708 = vmatpush3.msra.mxu0 %v4161_v11  ;;  %v1396_v57 = vld [vmem:[#allocation3 + $0xd0] sm:$0xff] }
  0xe5   : > { %1087 = vmatprep.mubr.f32.mxu1 %v4937_v10  ;;  %2709 = vmatprep.subr.mxu0 %v4167_v44 }
  0xe6   : > { %2710 = vmatpush3.msra.mxu0 %v4173_v27  ;;  %1436 = vmatprep.subr.mxu1 %v1403_v7  ;;  %v4293_v7 = vld [vmem:[%s3534_s6 + $0x1b0] sm:$0xff] }
  0xe7   : > { %2711 = vmatprep.subr.mxu0 %v4179_v17  ;;  %1437 = vmatpush1.msra.mxu1 %v1402_v18  ;;  %4968 = vst [vmem:[#allocation26_spill] sm:$0xff] %v4293_v7 }
  0xe8   : > { %1088 = vmatmul.mubr.f32.gmra.mxu1 %v595_v0  ;;  %2712 = vmatpush3.msra.mxu0 %v4185_v51  ;;  %v1395_v0 = vld [vmem:[#allocation3 + $0xa8] sm:$0xff] }
  0xe9   : > { %1093 = vmatprep.mubr.f32.mxu1 %v4937_v10  ;;  %2713 = vmatprep.subr.mxu0 %v4191_v34 }
  0xea   : > { %2714 = vmatpush3.msra.mxu0 %v4197_v37  ;;  %1438 = vmatprep.subr.mxu1 %v1401_v22 }
  0xeb   : > { %2715 = vmatprep.subr.mxu0 %v4203_v38  ;;  %1439 = vmatpush1.msra.mxu1 %v1400_v26  ;;  %v4302_v26 = vld [vmem:[%s3534_s6 + $0x1b8] sm:$0xff] }
  0xec   : > { %1094 = vmatmul.mubr.f32.gmra.mxu1 %v596_v12  ;;  %2716 = vmatpush3.msra.mxu0 %v4209_v41  ;;  %v1394_v12 = vld [vmem:[#allocation3 + $0x58] sm:$0xff]  ;;  %4969 = vst [vmem:[#allocation27_spill] sm:$0xff] %v4302_v26 }
  0xed   : > { %1099 = vmatprep.mubr.f32.mxu1 %v4937_v10  ;;  %2717 = vmatprep.subr.mxu0 %v4215_v48  ;;  %v4372_v48 = vld [vmem:[%s3534_s6 + $0x1e8] sm:$0xff] }
  0xee   : > { %2718 = vmatpush3.msra.mxu0 %v4221_v52  ;;  %1440 = vmatprep.subr.mxu1 %v1399_v31  ;;  %4975 = vst [vmem:[#allocation33_spill] sm:$0xff] %v4372_v48 }
  0xef   : > { %2719 = vmatprep.subr.mxu0 %v571_v53  ;;  %1441 = vmatpush1.msra.mxu1 %v1398_v42  ;;  %v1390_v53 = vld [vmem:[#allocation3 + $0xe8] sm:$0xff]  ;;  %v4309_v42 = vld [vmem:[%s3534_s6 + $0x1c0] sm:$0xff] }
  0xf0   : > { %1100 = vmatmul.mubr.f32.gmra.mxu1 %v597_v16  ;;  %2720 = vmatpush3.msra.mxu0 %v555_v55  ;;  %4970 = vst [vmem:[#allocation28_spill] sm:$0xff] %v4309_v42 }
  0xf1   : > { %1105 = vmatprep.mubr.f32.mxu1 %v4937_v10  ;;  %2721 = vmatprep.subr.mxu0 %v570_v58  ;;  %v1389_v58 = vld [vmem:[#allocation3 + $0xc8] sm:$0xff] }
  0xf2   : > { %2722 = vmatpush3.msra.mxu0 %v554_v59  ;;  %1442 = vmatprep.subr.mxu1 %v1397_v46  ;;  %v1388_v59 = vld [vmem:[#allocation3 + $0x80] sm:$0xff] }
  0xf3   : > { %1443 = vmatpush1.msra.mxu1 %v1396_v57 }
  0xf4   : > { %1106 = vmatmul.mubr.f32.gmra.mxu1 %v598_v28  ;;  %1444 = vmatprep.subr.mxu1 %v1395_v0  ;;  %v1393_v28 = vld [vmem:[#allocation3 + $0x90] sm:$0xff] }
  0xf5   : > { %1111 = vmatprep.mubr.f32.mxu1 %v4937_v10  ;;  %1445 = vmatpush1.msra.mxu1 %v1394_v12 }
  0xf6   : > { %1446 = vmatprep.subr.mxu1 %v1393_v28 }
  0xf8   : > { %1112 = vmatmul.mubr.f32.gmra.mxu1 %v599_v49  ;;  %v1392_v49 = vld [vmem:[#allocation3 + $0x8] sm:$0xff] }
  0xf9   : > { %1117 = vmatprep.mubr.f32.mxu1 %v4937_v10  ;;  %1447 = vmatpush1.msra.mxu1 %v1392_v49 }
  0xfc   : > { %1118 = vmatmul.mubr.f32.gmra.mxu1 %v600_v13 }
  0xfd   : > { %1123 = vmatprep.mubr.f32.mxu1 %v4937_v10 }
 0x100   : > { %1124 = vmatmul.mubr.f32.gmra.mxu1 %v601_v30  ;;  %v1391_v30 = vld [vmem:[#allocation3 + $0x78] sm:$0xff] }
 0x101   : > { %1484 = vmatprep.mubr.f32.mxu1 %v4937_v10  ;;  %1448 = vmatprep.subr.mxu1 %v1391_v30 }
 0x102   : > { %1449 = vmatpush1.msra.mxu1 %v1390_v53  ;;  %v4320_v53 = vld [vmem:[%s3534_s6 + $0x1c8] sm:$0xff] }
 0x103   : > { %1450 = vmatprep.subr.mxu1 %v1389_v58  ;;  %4971 = vst [vmem:[#allocation29_spill] sm:$0xff] %v4320_v53 }
 0x104   : > { %1451 = vmatpush1.msra.mxu1 %v1388_v59 }
 0x105   : > { %1485 = vmatmul.mubr.f32.vlgmr.msra.gmra.mxu1 %v4245_v1 }
 0x106   : > { %1490 = vmatprep.mubr.f32.mxu1 %v4937_v10 }
 0x109   : > { %1491 = vmatmul.mubr.f32.gmra.mxu1 %v4252_v8 }
 0x10a   : > { %1496 = vmatprep.mubr.f32.mxu1 %v4937_v10 }
 0x10d   : > { %1497 = vmatmul.mubr.f32.gmra.mxu1 %v4261_v29  ;;  %v4359_v29 = vld [vmem:[%s3534_s6 + $0x1e0] sm:$0xff] }
 0x10e   : > { %1502 = vmatprep.mubr.f32.mxu1 %v4937_v10  ;;  %4974 = vst [vmem:[#allocation32_spill] sm:$0xff] %v4359_v29 }
 0x111   : > { %1503 = vmatmul.mubr.f32.gmra.mxu1 %v4268_v33 }
 0x112   : > { %1508 = vmatprep.mubr.f32.mxu1 %v4937_v10 }
 0x115   : > { %1509 = vmatmul.mubr.f32.gmra.mxu1 %v4277_v47  ;;  %v4346_v47 = vld [vmem:[%s3534_s6 + $0x1d8] sm:$0xff] }
 0x116   : > { %1514 = vmatprep.mubr.f32.mxu1 %v4937_v10  ;;  %4973 = vst [vmem:[#allocation31_spill] sm:$0xff] %v4346_v47 }
 0x119   : > { %1515 = vmatmul.mubr.f32.gmra.mxu1 %v4286_v2 }
 0x11a   : > { %1520 = vmatprep.mubr.f32.mxu1 %v4937_v10 }
 0x11d   : > { %1521 = vmatmul.mubr.f32.gmra.mxu1 %v4293_v7  ;;  %v4333_v7 = vld [vmem:[%s3534_s6 + $0x1d0] sm:$0xff] }
 0x11e   : > { %1526 = vmatprep.mubr.f32.mxu1 %v4937_v10  ;;  %4972 = vst [vmem:[#allocation30_spill] sm:$0xff] %v4333_v7 }
 0x121   : > { %1527 = vmatmul.mubr.f32.gmra.mxu1 %v4302_v26 }
 0x122   : > { %1532 = vmatprep.mubr.f32.mxu1 %v4937_v10 }
 0x125   : > { %1533 = vmatmul.mubr.f32.gmra.mxu1 %v4309_v42 }
 0x126   : > { %1538 = vmatprep.mubr.f32.mxu1 %v4937_v10 }
 0x129   : > { %1539 = vmatmul.mubr.f32.gmra.mxu1 %v4320_v53 }
 0x12a   : > { %1544 = vmatprep.mubr.f32.mxu1 %v4937_v10 }
 0x12d   : > { %1545 = vmatmul.mubr.f32.gmra.mxu1 %v4333_v7 }
 0x12e   : > { %1550 = vmatprep.mubr.f32.mxu1 %v4937_v10 }
 0x131   : > { %1551 = vmatmul.mubr.f32.gmra.mxu1 %v4346_v47 }
 0x132   : > { %1556 = vmatprep.mubr.f32.mxu1 %v4937_v10 }
 0x135   : > { %1557 = vmatmul.mubr.f32.gmra.mxu1 %v4359_v29 }
 0x136   : > { %1562 = vmatprep.mubr.f32.mxu1 %v4937_v10 }
 0x139   : > { %1563 = vmatmul.mubr.f32.gmra.mxu1 %v4372_v48 }
 0x13a   : > { %1568 = vmatprep.mubr.f32.mxu1 %v4937_v10 }
 0x15e   : > { %v4236_v16 = vpop.f32.mrf.mxu1 }
 0x160   : > { %v4238_v13 = vpop.f32.mrf.mxu1 }
 0x162   : > { %v4240_v55 = vpop.f32.mrf.mxu1 }
 0x164   : > { %v4242_v62 = vpop.f32.mrf.mxu1 }
 0x166   : > { %v4248_v5 = vpop.f32.mrf.mxu1 }
 0x168   : > { %v4254_v14 = vpop.f32.mrf.mxu1 }
 0x16b   : > { %v4258_v21 = vpop.f32.mrf.mxu1 }
 0x16d   : > { %v4263_v32 = vpop.f32.mrf.mxu1 }
 0x170   : > { %v4270_v39 = vpop.f32.mrf.mxu1 }
 0x172   : > { %v4273_v43 = vpop.f32.mrf.mxu1 }
 0x175   : > { %v4279_v54 = vpop.f32.mrf.mxu1 }
 0x177   : > { %v4283_v61 = vpop.f32.mrf.mxu1 }
 0x17a   : > { %v4289_v3 = vpop.f32.mrf.mxu1 }
 0x17c   : > { %v4295_v18 = vpop.f32.mrf.mxu1 }
 0x17f   : > { %v4299_v22 = vpop.f32.mrf.mxu1 }
 0x181   : > { %v4304_v31 = vpop.f32.mrf.mxu1 }
 0x184   : > { %v874_v46 = vpop.f32.mrf.mxu0  ;;  %v1035_v57 = vpop.f32.mrf.mxu1 }
 0x185   : > { %v4311_v0 = vadd.f32 %v1035_v57, %v874_v46 }
 0x186   : > { %v876_v12 = vpop.f32.mrf.mxu0  ;;  %v1037_v28 = vpop.f32.mrf.mxu1 }
 0x187   : > { %v1130_v49 = vadd.f32 1e-05, %v4311_v0  ;;  %v4316_v30 = vadd.f32 %v1037_v28, %v876_v12  ;;  %2337 = vst [vmem:[#allocation3 + $0x80] sm:$0xff] %v4311_v0 }
 0x188   : > { %v880_v58 = vpop.f32.mrf.mxu0  ;;  %v1041_v59 = vpop.f32.mrf.mxu1 }
 0x189   : > { %v1131_v46 = vadd.f32 1e-05, %v4316_v30  ;;  %v4323_v57 = vadd.f32 %v1041_v59, %v880_v58  ;;  %2338 = vst [vmem:[#allocation3 + $0xc8] sm:$0xff] %v4316_v30  ;;  %3117 = vlog2.f32 %v1130_v49 }
 0x18a   : > { %v882_v42 = vpop.f32.mrf.mxu0  ;;  %v1043_v26 = vpop.f32.mrf.mxu1 }
 0x18b   : > { %3119 = vlog2.f32 %v1131_v46  ;;  %v1132_v12 = vadd.f32 1e-05, %v4323_v57  ;;  %v4329_v28 = vadd.f32 %v1043_v26, %v882_v42  ;;  %2339 = vst [vmem:[#allocation3 + $0xe8] sm:$0xff] %v4323_v57 }
 0x18c   : > { %v886_v58 = vpop.f32.mrf.mxu0  ;;  %v1047_v59 = vpop.f32.mrf.mxu1 }
 0x18d   : > { %v1133_v2 = vadd.f32 1e-05, %v4329_v28  ;;  %v4336_v53 = vadd.f32 %v1047_v59, %v886_v58  ;;  %2340 = vst [vmem:[#allocation3 + $0x78] sm:$0xff] %v4329_v28  ;;  %3121 = vlog2.f32 %v1132_v12 }
 0x18e   : > { %v888_v49 = vpop.f32.mrf.mxu0  ;;  %v1049_v46 = vpop.f32.mrf.mxu1 }
 0x18f   : > { %3123 = vlog2.f32 %v1133_v2  ;;  %v1134_v26 = vadd.f32 1e-05, %v4336_v53  ;;  %v4342_v42 = vadd.f32 %v1049_v46, %v888_v49  ;;  %2341 = vst [vmem:[#allocation3 + $0x8] sm:$0xff] %v4336_v53 }
 0x190   : > { %v892_v58 = vpop.f32.mrf.mxu0  ;;  %v1053_v59 = vpop.f32.mrf.mxu1 }
 0x191   : > { %v1135_v33 = vadd.f32 1e-05, %v4342_v42  ;;  %v4349_v7 = vadd.f32 %v1053_v59, %v892_v58  ;;  %2342 = vst [vmem:[#allocation3 + $0x90] sm:$0xff] %v4342_v42  ;;  %3125 = vlog2.f32 %v1134_v26 }
 0x192   : > { %v894_v2 = vpop.f32.mrf.mxu0  ;;  %v1055_v12 = vpop.f32.mrf.mxu1 }
 0x193   : > { %3127 = vlog2.f32 %v1135_v33  ;;  %v1136_v49 = vadd.f32 1e-05, %v4349_v7  ;;  %v4355_v46 = vadd.f32 %v1055_v12, %v894_v2  ;;  %2343 = vst [vmem:[#allocation3 + $0x58] sm:$0xff] %v4349_v7 }
 0x194   : > { %v898_v58 = vpop.f32.mrf.mxu0  ;;  %v1059_v59 = vpop.f32.mrf.mxu1 }
 0x195   : > { %v1137_v8 = vadd.f32 1e-05, %v4355_v46  ;;  %v4362_v47 = vadd.f32 %v1059_v59, %v898_v58  ;;  %2344 = vst [vmem:[#allocation3 + $0xa8] sm:$0xff] %v4355_v46  ;;  %3129 = vlog2.f32 %v1136_v49 }
 0x196   : > { %v900_v33 = vpop.f32.mrf.mxu0  ;;  %v1061_v26 = vpop.f32.mrf.mxu1 }
 0x197   : > { %v3118_v2 = vpop.eup %3117  ;;  %3131 = vlog2.f32 %v1137_v8  ;;  %v1138_v12 = vadd.f32 1e-05, %v4362_v47  ;;  %v4368_v52 = vadd.f32 %v1061_v26, %v900_v33  ;;  %2345 = vst [vmem:[#allocation3 + $0xd0] sm:$0xff] %v4362_v47 }
 0x198   : > { %v3120_v58 = vpop.eup %3119  ;;  %v904_v59 = vpop.f32.mrf.mxu0  ;;  %v1163_v8 = vmul.f32 0.6931472, %v3118_v2 }
 0x199   : > { %v1065_v41 = vpop.f32.mrf.mxu1  ;;  %v1139_v29 = vadd.f32 1e-05, %v4368_v52  ;;  %v1165_v38 = vmul.f32 0.6931472, %v3120_v58  ;;  %2346 = vst [vmem:[#allocation3 + $0xb0] sm:$0xff] %v4368_v52  ;;  %3133 = vlog2.f32 %v1138_v12 }
 0x19a   : > { %v4375_v49 = vadd.f32 %v1065_v41, %v904_v59  ;;  %v906_v33 = vpop.f32.mrf.mxu0  ;;  %v3122_v37 = vpop.eup %3121  ;;  %v4385_v41 = vld [vmem:[%s3534_s6 + $0x1f0] sm:$0xff] }
 0x19b   : > { %v1067_v26 = vpop.f32.mrf.mxu1  ;;  %3135 = vlog2.f32 %v1139_v29  ;;  %1290 = vmatprep.mubr.f32.mxu0 %v1165_v38  ;;  %4976 = vst [vmem:[#allocation34_spill] sm:$0xff] %v4385_v41  ;;  %1569 = vmatmul.mubr.f32.gmra.mxu1 %v4385_v41 }
 0x19c   : > { %v1140_v34 = vadd.f32 1e-05, %v4375_v49  ;;  %v4381_v51 = vadd.f32 %v1067_v26, %v906_v33  ;;  %2347 = vst [vmem:[#allocation3 + $0x38] sm:$0xff] %v4375_v49  ;;  %v3124_v58 = vpop.eup %3123  ;;  %v910_v59 = vpop.f32.mrf.mxu0  ;;  %1291 = vmatmul.mubr.f32.vlgmr.msra.gmra.mxu0 %v1163_v8  ;;  %v1167_v33 = vmul.f32 0.6931472, %v3122_v37  ;;  %1574 = vmatprep.mubr.f32.mxu1 %v4937_v10 }
 0x19d   : > { %v1071_v48 = vpop.f32.mrf.mxu1  ;;  %v1169_v17 = vmul.f32 0.6931472, %v3124_v58 }
 0x19e   : > { %v1141_v2 = vadd.f32 1e-05, %v4381_v51  ;;  %v4388_v12 = vadd.f32 %v1071_v48, %v910_v59  ;;  %2348 = vst [vmem:[#allocation3 + $0x40] sm:$0xff] %v4381_v51  ;;  %3137 = vlog2.f32 %v1140_v34  ;;  %v912_v38 = vpop.f32.mrf.mxu0  ;;  %v3126_v26 = vpop.eup %3125  ;;  %v4398_v48 = vld [vmem:[%s3534_s6 + $0x1f8] sm:$0xff] }
 0x19f   : > { %v1073_v29 = vpop.f32.mrf.mxu1  ;;  %1295 = vmatprep.mubr.f32.mxu0 %v1169_v17  ;;  %4977 = vst [vmem:[#allocation35_spill] sm:$0xff] %v4398_v48  ;;  %1575 = vmatmul.mubr.f32.gmra.mxu1 %v4398_v48 }
 0x1a0   : > { %3139 = vlog2.f32 %v1141_v2  ;;  %v1142_v8 = vadd.f32 1e-05, %v4388_v12  ;;  %v4394_v27 = vadd.f32 %v1073_v29, %v912_v38  ;;  %2349 = vst [vmem:[#allocation3 + $0xe0] sm:$0xff] %v4388_v12  ;;  %v3128_v58 = vpop.eup %3127  ;;  %v916_v59 = vpop.f32.mrf.mxu0  ;;  %1296 = vmatmul.mubr.f32.gmra.mxu0 %v1167_v33  ;;  %v1171_v38 = vmul.f32 0.6931472, %v3126_v26  ;;  %2947 = vmatprep.mubr.f32.mxu1 %v4245_v1 }
 0x1a1   : > { %v1077_v41 = vpop.f32.mrf.mxu1  ;;  %v1173_v44 = vmul.f32 0.6931472, %v3128_v58 }
 0x1a2   : > { %v1143_v34 = vadd.f32 1e-05, %v4394_v27  ;;  %v4401_v37 = vadd.f32 %v1077_v41, %v916_v59  ;;  %2350 = vst [vmem:[#allocation3 + $0x60] sm:$0xff] %v4394_v27  ;;  %3141 = vlog2.f32 %v1142_v8  ;;  %v918_v2 = vpop.f32.mrf.mxu0  ;;  %v3130_v29 = vpop.eup %3129 }
 0x1a3   : > { %v1079_v17 = vpop.f32.mrf.mxu1  ;;  %1300 = vmatprep.mubr.f32.mxu0 %v1173_v44 }
 0x1a4   : > { %3143 = vlog2.f32 %v1143_v34  ;;  %v1144_v11 = vadd.f32 1e-05, %v4401_v37  ;;  %v4407_v33 = vadd.f32 %v1079_v17, %v918_v2  ;;  %2351 = vst [vmem:[#allocation3 + $0x18] sm:$0xff] %v4401_v37  ;;  %v3132_v41 = vpop.eup %3131  ;;  %1301 = vmatmul.mubr.f32.gmra.mxu0 %v1171_v38  ;;  %v1175_v34 = vmul.f32 0.6931472, %v3130_v29 }
 0x1a5   : > { %v1083_v58 = vpop.f32.mrf.mxu1  ;;  %v1177_v26 = vmul.f32 0.6931472, %v3132_v41 }
 0x1a6   : > { %v1145_v59 = vadd.f32 1e-05, %v4407_v33  ;;  %v4412_v8 = vadd.f32 %v1083_v58, %v4236_v16  ;;  %2352 = vst [vmem:[#allocation3 + $0x68] sm:$0xff] %v4407_v33  ;;  %3145 = vlog2.f32 %v1144_v11  ;;  %v3134_v48 = vpop.eup %3133 }
 0x1a7   : > { %v1085_v1 = vpop.f32.mrf.mxu1  ;;  %1305 = vmatprep.mubr.f32.mxu0 %v1177_v26  ;;  %v1179_v58 = vmul.f32 0.6931472, %v3134_v48 }
 0x1a8   : > { %3147 = vlog2.f32 %v1145_v59  ;;  %v1146_v44 = vadd.f32 1e-05, %v4412_v8  ;;  %v4417_v2 = vadd.f32 %v1085_v1, %v4238_v13  ;;  %2353 = vst [vmem:[#allocation3 + $0x10] sm:$0xff] %v4412_v8  ;;  %v3136_v17 = vpop.eup %3135  ;;  %1306 = vmatmul.mubr.f32.gmra.mxu0 %v1175_v34 }
 0x1a9   : > { %v1089_v38 = vpop.f32.mrf.mxu1  ;;  %v1181_v11 = vmul.f32 0.6931472, %v3136_v17 }
 0x1aa   : > { %v1147_v16 = vadd.f32 1e-05, %v4417_v2  ;;  %v4422_v41 = vadd.f32 %v1089_v38, %v4240_v55  ;;  %2354 = vst [vmem:[#allocation3 + $0x70] sm:$0xff] %v4417_v2  ;;  %3149 = vlog2.f32 %v1146_v44 }
 0x1ab   : > { %v1091_v29 = vpop.f32.mrf.mxu1  ;;  %v3138_v59 = vpop.eup %3137  ;;  %1310 = vmatprep.mubr.f32.mxu0 %v1181_v11 }
 0x1ac   : > { %3151 = vlog2.f32 %v1147_v16  ;;  %v1148_v13 = vadd.f32 1e-05, %v4422_v41  ;;  %v4427_v26 = vadd.f32 %v1091_v29, %v4242_v62  ;;  %2355 = vst [vmem:[#allocation3 + $0x50] sm:$0xff] %v4422_v41  ;;  %1311 = vmatmul.mubr.f32.gmra.mxu0 %v1179_v58  ;;  %v1183_v38 = vmul.f32 0.6931472, %v3138_v59 }
 0x1ad   : > { %v3140_v1 = vpop.eup %3139  ;;  %v1095_v34 = vpop.f32.mrf.mxu1 }
 0x1ae   : > { %v1149_v55 = vadd.f32 1e-05, %v4427_v26  ;;  %v4432_v17 = vadd.f32 %v1095_v34, %v4248_v5  ;;  %v1185_v44 = vmul.f32 0.6931472, %v3140_v1  ;;  %2356 = vst [vmem:[#allocation3 + $0xa0] sm:$0xff] %v4427_v26  ;;  %3153 = vlog2.f32 %v1148_v13 }
 0x1af   : > { %v1097_v48 = vpop.f32.mrf.mxu1  ;;  %v3142_v16 = vpop.eup %3141 }
 0x1b0   : > { %3155 = vlog2.f32 %v1149_v55  ;;  %v1150_v62 = vadd.f32 1e-05, %v4432_v17  ;;  %v4437_v11 = vadd.f32 %v1097_v48, %v4254_v14  ;;  %1315 = vmatprep.mubr.f32.mxu0 %v1185_v44  ;;  %2357 = vst [vmem:[#allocation3 + $0xd8] sm:$0xff] %v4432_v17  ;;  %v1187_v34 = vmul.f32 0.6931472, %v3142_v16 }
 0x1b1   : > { %v3144_v29 = vpop.eup %3143  ;;  %v1101_v58 = vpop.f32.mrf.mxu1  ;;  %1316 = vmatmul.mubr.f32.gmra.mxu0 %v1183_v38 }
 0x1b2   : > { %v1151_v5 = vadd.f32 1e-05, %v4437_v11  ;;  %v4442_v1 = vadd.f32 %v1101_v58, %v4258_v21  ;;  %v1189_v13 = vmul.f32 0.6931472, %v3144_v29  ;;  %2358 = vst [vmem:[#allocation3 + $0x30] sm:$0xff] %v4437_v11  ;;  %3157 = vlog2.f32 %v1150_v62 }
 0x1b3   : > { %v1103_v59 = vpop.f32.mrf.mxu1  ;;  %v3146_v55 = vpop.eup %3145 }
 0x1b4   : > { %3159 = vlog2.f32 %v1151_v5  ;;  %v1152_v14 = vadd.f32 1e-05, %v4442_v1  ;;  %v4447_v44 = vadd.f32 %v1103_v59, %v4263_v32  ;;  %1320 = vmatprep.mubr.f32.mxu0 %v1189_v13  ;;  %2359 = vst [vmem:[#allocation3 + $0x20] sm:$0xff] %v4442_v1  ;;  %v1191_v58 = vmul.f32 0.6931472, %v3146_v55 }
 0x1b5   : > { %v3148_v48 = vpop.eup %3147  ;;  %v1107_v38 = vpop.f32.mrf.mxu1  ;;  %1321 = vmatmul.mubr.f32.gmra.mxu0 %v1187_v34 }
 0x1b6   : > { %v1153_v21 = vadd.f32 1e-05, %v4447_v44  ;;  %v4452_v29 = vadd.f32 %v1107_v38, %v4270_v39  ;;  %v1193_v62 = vmul.f32 0.6931472, %v3148_v48  ;;  %2360 = vst [vmem:[#allocation3 + $0xf0] sm:$0xff] %v4447_v44  ;;  %3161 = vlog2.f32 %v1152_v14 }
 0x1b7   : > { %v1109_v16 = vpop.f32.mrf.mxu1  ;;  %v3150_v5 = vpop.eup %3149 }
 0x1b8   : > { %3163 = vlog2.f32 %v1153_v21  ;;  %v1154_v32 = vadd.f32 1e-05, %v4452_v29  ;;  %v4457_v13 = vadd.f32 %v1109_v16, %v4273_v43  ;;  %1325 = vmatprep.mubr.f32.mxu0 %v1193_v62  ;;  %2361 = vst [vmem:[#allocation3 + $0x88] sm:$0xff] %v4452_v29  ;;  %v1195_v38 = vmul.f32 0.6931472, %v3150_v5 }
 0x1b9   : > { %v3152_v59 = vpop.eup %3151  ;;  %v1113_v34 = vpop.f32.mrf.mxu1  ;;  %1326 = vmatmul.mubr.f32.gmra.mxu0 %v1191_v58 }
 0x1ba   : > { %v1155_v39 = vadd.f32 1e-05, %v4457_v13  ;;  %v4462_v48 = vadd.f32 %v1113_v34, %v4279_v54  ;;  %v1197_v14 = vmul.f32 0.6931472, %v3152_v59  ;;  %2362 = vst [vmem:[#allocation3 + $0x48] sm:$0xff] %v4457_v13  ;;  %3165 = vlog2.f32 %v1154_v32 }
 0x1bb   : > { %v1115_v55 = vpop.f32.mrf.mxu1  ;;  %v3154_v21 = vpop.eup %3153 }
 0x1bc   : > { %3167 = vlog2.f32 %v1155_v39  ;;  %v1156_v43 = vadd.f32 1e-05, %v4462_v48  ;;  %v1116_v62 = vadd.f32 %v1115_v55, %v4283_v61  ;;  %1330 = vmatprep.mubr.f32.mxu0 %v1197_v14  ;;  %2363 = vst [vmem:[#allocation3 + $0xf8] sm:$0xff] %v4462_v48  ;;  %v1199_v5 = vmul.f32 0.6931472, %v3154_v21 }
 0x1bd   : > { %v3156_v16 = vpop.eup %3155  ;;  %v1119_v58 = vpop.f32.mrf.mxu1  ;;  %1331 = vmatmul.mubr.f32.gmra.mxu0 %v1195_v38 }
 0x1be   : > { %v1157_v54 = vadd.f32 1e-05, %v1116_v62  ;;  %v1120_v59 = vadd.f32 %v1119_v58, %v4289_v3  ;;  %v1201_v34 = vmul.f32 0.6931472, %v3156_v16  ;;  %2364 = vst [vmem:[#allocation3 + $0xc0] sm:$0xff] %v1116_v62  ;;  %3169 = vlog2.f32 %v1156_v43 }
 0x1bf   : > { %v1121_v32 = vpop.f32.mrf.mxu1  ;;  %v3158_v56 = vpop.eup %3157 }
 0x1c0   : > { %3171 = vlog2.f32 %v1157_v54  ;;  %v1158_v39 = vadd.f32 1e-05, %v1120_v59  ;;  %v1122_v23 = vadd.f32 %v1121_v32, %v4295_v18  ;;  %1335 = vmatprep.mubr.f32.mxu0 %v1201_v34  ;;  %2365 = vst [vmem:[#allocation3 + $0xb8] sm:$0xff] %v1120_v59  ;;  %v1203_v43 = vmul.f32 0.6931472, %v3158_v56 }
 0x1c1   : > { %v3160_v61 = vpop.eup %3159  ;;  %v1125_v14 = vpop.f32.mrf.mxu1  ;;  %1336 = vmatmul.mubr.f32.gmra.mxu0 %v1199_v5 }
 0x1c2   : > { %v1159_v55 = vadd.f32 1e-05, %v1122_v23  ;;  %v1126_v38 = vadd.f32 %v1125_v14, %v4299_v22  ;;  %v1205_v4 = vmul.f32 0.6931472, %v3160_v61  ;;  %2366 = vst [vmem:[#allocation3] sm:$0xff] %v1122_v23  ;;  %3173 = vlog2.f32 %v1158_v39 }
 0x1c3   : > { %v1127_v3 = vpop.f32.mrf.mxu1  ;;  %v3162_v16 = vpop.eup %3161 }
 0x1c4   : > { %3175 = vlog2.f32 %v1159_v55  ;;  %v1160_v21 = vadd.f32 1e-05, %v1126_v38  ;;  %v1128_v58 = vadd.f32 %v1127_v3, %v4304_v31  ;;  %1340 = vmatprep.mubr.f32.mxu0 %v1205_v4  ;;  %2367 = vst [vmem:[#allocation3 + $0x28] sm:$0xff] %v1126_v38  ;;  %v1207_v22 = vmul.f32 0.6931472, %v3162_v16  ;;  %v3247_v55 = vld [vmem:[%s4879_s3 + $0x80] sm:$0xff] }
 0x1c5   : > { %v3164_v18 = vpop.eup %3163  ;;  %1341 = vmatmul.mubr.f32.gmra.mxu0 %v1203_v43  ;;  %v1748_v3 = vld [vmem:[#allocation4 + $0x30] sm:$0xff]  ;;  %v4596_v43 = vld [vmem:[%s3534_s6 + $0x158] sm:$0xff]  ;;  %v1747_v16 = vld [vmem:[#allocation4 + $0x28] sm:$0xff] }
 0x1c6   : > { %v1161_v54 = vadd.f32 1e-05, %v1128_v58  ;;  %2368 = vst [vmem:[#allocation3 + $0x98] sm:$0xff] %v1128_v58  ;;  %1581 = vmatprep.subr.mxu0 %v1128_v58  ;;  %v1209_v34 = vmul.f32 0.6931472, %v3164_v18  ;;  %3177 = vlog2.f32 %v1160_v21  ;;  %v1746_v21 = vld [vmem:[#allocation4 + $0x20] sm:$0xff] }
 0x1c7   : > { %1582 = vmatpush1.msra.mxu0 %v1126_v38  ;;  %v3166_v32 = vpop.eup %3165  ;;  %v3248_v38 = vld [vmem:[%s4879_s3] sm:$0xff]  ;;  %v1745_v18 = vld [vmem:[#allocation4 + $0x18] sm:$0xff] }
 0x1c8   : > { %3179 = vlog2.f32 %v1161_v54  ;;  %1345 = vmatprep.mubr.f32.mxu0 %v1209_v34  ;;  %1583 = vmatprep.subr.mxu0 %v1122_v23  ;;  %v1211_v4 = vmul.f32 0.6931472, %v3166_v32  ;;  %v4601_v58 = vld [vmem:[%s3534_s6 + $0x160] sm:$0xff]  ;;  %v1744_v54 = vld [vmem:[#allocation4 + $0x10] sm:$0xff]  ;;  %v4606_v34 = vld [vmem:[%s3534_s6 + $0x168] sm:$0xff] }
 0x1c9   : > { %v3168_v56 = vpop.eup %3167  ;;  %1346 = vmatmul.mubr.f32.gmra.mxu0 %v1207_v22  ;;  %v1743_v22 = vld [vmem:[#allocation4 + $0x8] sm:$0xff]  ;;  %v1742_v32 = vld [vmem:[#allocation4] sm:$0xff] }
 0x1ca   : > { %1584 = vmatpush1.msra.mxu0 %v1120_v59  ;;  %v1213_v5 = vmul.f32 0.6931472, %v3168_v56  ;;  %v4611_v56 = vld [vmem:[%s3534_s6 + $0x170] sm:$0xff] }
 0x1cb   : > { %1585 = vmatprep.subr.mxu0 %v1116_v62  ;;  %v3170_v31 = vpop.eup %3169 }
 0x1cc   : > { %1586 = vmatpush1.msra.mxu0 %v4462_v48  ;;  %1350 = vmatprep.mubr.f32.mxu0 %v1213_v5  ;;  %v1215_v23 = vmul.f32 0.6931472, %v3170_v31  ;;  %v4992_v5 = vld [vmem:[#allocation21_spill] sm:$0xff] }
 0x1cd   : > { %v3172_v39 = vpop.eup %3171  ;;  %1587 = vmatprep.subr.mxu0 %v4457_v13  ;;  %1351 = vmatmul.mubr.f32.gmra.mxu0 %v1211_v4  ;;  %v4993_v4 = vld [vmem:[#allocation22_spill] sm:$0xff]  ;;  %v4618_v31 = vld [vmem:[%s3534_s6 + $0x178] sm:$0xff] }
 0x1ce   : > { %1588 = vmatpush1.msra.mxu0 %v4452_v29  ;;  %v1217_v61 = vmul.f32 0.6931472, %v3172_v39  ;;  %v1749_v29 = vld [vmem:[#allocation4 + $0x38] sm:$0xff]  ;;  %v4994_v39 = vld [vmem:[#allocation23_spill] sm:$0xff] }
 0x1cf   : > { %1589 = vmatprep.subr.mxu0 %v4447_v44  ;;  %v3174_v14 = vpop.eup %3173 }
 0x1d0   : > { %1590 = vmatpush1.msra.mxu0 %v4442_v1  ;;  %1355 = vmatprep.mubr.f32.mxu0 %v1217_v61  ;;  %v1219_v13 = vmul.f32 0.6931472, %v3174_v14  ;;  %v4995_v61 = vld [vmem:[#allocation24_spill] sm:$0xff]  ;;  %v4997_v14 = vld [vmem:[#allocation26_spill] sm:$0xff] }
 0x1d1   : > { %v3176_v62 = vpop.eup %3175  ;;  %1591 = vmatprep.subr.mxu0 %v4437_v11  ;;  %1356 = vmatmul.mubr.f32.gmra.mxu0 %v1215_v23  ;;  %v4996_v23 = vld [vmem:[#allocation25_spill] sm:$0xff] }
 0x1d2   : > { %1592 = vmatpush1.msra.mxu0 %v4432_v17  ;;  %v1221_v48 = vmul.f32 0.6931472, %v3176_v62  ;;  %v4585_v17 = vld [vmem:[%s3534_s6 + $0x150] sm:$0xff]  ;;  %v4998_v62 = vld [vmem:[#allocation27_spill] sm:$0xff] }
 0x1d3   : > { %1593 = vmatprep.subr.mxu0 %v4427_v26  ;;  %v3178_v59 = vpop.eup %3177  ;;  %v1750_v26 = vld [vmem:[#allocation4 + $0x40] sm:$0xff] }
 0x1d4   : > { %1594 = vmatpush1.msra.mxu0 %v4422_v41  ;;  %1360 = vmatprep.mubr.f32.mxu0 %v1221_v48  ;;  %v1223_v11 = vmul.f32 0.6931472, %v3178_v59  ;;  %v3246_v41 = vld [vmem:[%s4879_s3 + $0x8] sm:$0xff]  ;;  %v4999_v48 = vld [vmem:[#allocation28_spill] sm:$0xff]  ;;  %v5001_v59 = vld [vmem:[#allocation30_spill] sm:$0xff] }
 0x1d5   : > { %v3180_v44 = vpop.eup %3179  ;;  %1595 = vmatprep.subr.mxu0 %v4417_v2  ;;  %1361 = vmatmul.mubr.f32.gmra.mxu0 %v1219_v13  ;;  %v3245_v2 = vld [vmem:[%s4879_s3 + $0x88] sm:$0xff]  ;;  %v5000_v13 = vld [vmem:[#allocation29_spill] sm:$0xff] }
 0x1d6   : > { %1596 = vmatpush1.msra.mxu0 %v4412_v8  ;;  %v1225_v1 = vmul.f32 0.6931472, %v3180_v44  ;;  %v1751_v8 = vld [vmem:[#allocation4 + $0x48] sm:$0xff]  ;;  %v5003_v44 = vld [vmem:[#allocation32_spill] sm:$0xff] }
 0x1d7   : > { %1597 = vmatprep.subr.mxu0 %v4407_v33  ;;  %v4574_v33 = vld [vmem:[%s3534_s6 + $0x148] sm:$0xff] }
 0x1d8   : > { %1598 = vmatpush1.msra.mxu0 %v4401_v37  ;;  %1365 = vmatprep.mubr.f32.mxu0 %v1225_v1  ;;  %v1752_v37 = vld [vmem:[#allocation4 + $0x50] sm:$0xff]  ;;  %v5004_v1 = vld [vmem:[#allocation33_spill] sm:$0xff] }
 0x1d9   : > { %1599 = vmatprep.subr.mxu0 %v4394_v27  ;;  %1366 = vmatmul.mubr.f32.gmra.mxu0 %v1223_v11  ;;  %v4499_v27 = vld [vmem:[%s3534_s6 + $0x100] sm:$0xff] }
 0x1da   : > { %1600 = vmatpush1.msra.mxu0 %v4388_v12  ;;  %1645 = vmatprep.mubr.f32.mxu0 %v4937_v10  ;;  %v4991_v12 = vld [vmem:[#allocation20_spill] sm:$0xff]  ;;  %v5005_v11 = vld [vmem:[#allocation34_spill] sm:$0xff] }
 0x1db   : > { %1601 = vmatprep.subr.mxu0 %v4381_v51  ;;  %v4507_v51 = vld [vmem:[%s3534_s6 + $0x108] sm:$0xff] }
 0x1dc   : > { %1602 = vmatpush1.msra.mxu0 %v4375_v49  ;;  %v4990_v49 = vld [vmem:[#allocation19_spill] sm:$0xff] }
 0x1dd   : > { %1603 = vmatprep.subr.mxu0 %v4368_v52  ;;  %v4516_v52 = vld [vmem:[%s3534_s6 + $0x110] sm:$0xff] }
 0x1de   : > { %1604 = vmatpush1.msra.mxu0 %v4362_v47  ;;  %v4987_v47 = vld [vmem:[#allocation15_spill] sm:$0xff] }
 0x1df   : > { %1605 = vmatprep.subr.mxu0 %v4355_v46  ;;  %v1753_v46 = vld [vmem:[#allocation4 + $0x58] sm:$0xff] }
 0x1e0   : > { %1606 = vmatpush1.msra.mxu0 %v4349_v7  ;;  %v1756_v7 = vld [vmem:[#allocation4 + $0x70] sm:$0xff] }
 0x1e1   : > { %1607 = vmatprep.subr.mxu0 %v4342_v42  ;;  %v4567_v42 = vld [vmem:[%s3534_s6 + $0x140] sm:$0xff] }
 0x1e2   : > { %1608 = vmatpush1.msra.mxu0 %v4336_v53  ;;  %v4988_v53 = vld [vmem:[#allocation17_spill] sm:$0xff] }
 0x1e3   : > { %1609 = vmatprep.subr.mxu0 %v4329_v28  ;;  %v1754_v28 = vld [vmem:[#allocation4 + $0x60] sm:$0xff] }
 0x1e4   : > { %1610 = vmatpush1.msra.mxu0 %v4323_v57  ;;  %v4989_v57 = vld [vmem:[#allocation18_spill] sm:$0xff] }
 0x1e5   : > { %1611 = vmatprep.subr.mxu0 %v4316_v30  ;;  %v1755_v30 = vld [vmem:[#allocation4 + $0x68] sm:$0xff] }
 0x1e6   : > { %1612 = vmatpush1.msra.mxu0 %v4311_v0  ;;  %v4560_v0 = vld [vmem:[%s3534_s6 + $0x138] sm:$0xff] }
 0x1e7   : > { %1646 = vmatmul.mubr.f32.vlgmr.msra.gmra.mxu0 %v4499_v27  ;;  %2835 = vmatprep.subr.mxu0 %v4056_v19  ;;  %v4525_v19 = vld [vmem:[%s3534_s6 + $0x118] sm:$0xff] }
 0x1e8   : > { %1651 = vmatprep.mubr.f32.mxu0 %v4937_v10  ;;  %2836 = vmatpush3.msra.mxu0 %v4061_v35  ;;  %v4534_v35 = vld [vmem:[%s3534_s6 + $0x120] sm:$0xff] }
 0x1e9   : > { %2837 = vmatprep.subr.mxu0 %v4068_v60  ;;  %v4978_v60 = vld [vmem:[#allocation7_spill] sm:$0xff] }
 0x1ea   : > { %2838 = vmatpush3.msra.mxu0 %v4073_v9  ;;  %v4979_v9 = vld [vmem:[#allocation12_spill] sm:$0xff] }
 0x1eb   : > { %1652 = vmatmul.mubr.f32.gmra.mxu0 %v4507_v51  ;;  %2839 = vmatprep.subr.mxu0 %v4082_v6  ;;  %v4980_v6 = vld [vmem:[#allocation8_spill] sm:$0xff] }
 0x1ec   : > { %1657 = vmatprep.mubr.f32.mxu0 %v4937_v10  ;;  %2840 = vmatpush3.msra.mxu0 %v4087_v63  ;;  %v4543_v63 = vld [vmem:[%s3534_s6 + $0x128] sm:$0xff] }
 0x1ed   : > { %2841 = vmatprep.subr.mxu0 %v4094_v20  ;;  %v4981_v20 = vld [vmem:[#allocation14_spill] sm:$0xff] }
 0x1ee   : > { %2842 = vmatpush3.msra.mxu0 %v4099_v50  ;;  %v4982_v50 = vld [vmem:[#allocation9_spill] sm:$0xff] }
 0x1ef   : > { %1658 = vmatmul.mubr.f32.gmra.mxu0 %v4516_v52  ;;  %2843 = vmatprep.subr.mxu0 %v4107_v24  ;;  %v4983_v24 = vld [vmem:[#allocation16_spill] sm:$0xff] }
 0x1f0   : > { %1663 = vmatprep.mubr.f32.mxu0 %v4937_v10  ;;  %2844 = vmatpush3.msra.mxu0 %v4113_v25  ;;  %v4984_v25 = vld [vmem:[#allocation10_spill] sm:$0xff] }
 0x1f1   : > { %2845 = vmatprep.subr.mxu0 %v4119_v40  ;;  %v4552_v40 = vld [vmem:[%s3534_s6 + $0x130] sm:$0xff]  ;;  %s2686_s6 = sshll.u32 %s3287_s17, 7 }
 0x1f2   : > { %2846 = vmatpush3.msra.mxu0 %v4125_v36  ;;  %v4985_v36 = vld [vmem:[#allocation11_spill] sm:$0xff] }
 0x1f3   : > { %1664 = vmatmul.mubr.f32.gmra.mxu0 %v4525_v19  ;;  %2847 = vmatprep.subr.mxu0 %v4131_v15  ;;  %v1757_v15 = vld [vmem:[#allocation4 + $0x78] sm:$0xff] }
 0x1f4   : > { %1669 = vmatprep.mubr.f32.mxu0 %v4937_v10  ;;  %2848 = vmatpush3.msra.mxu0 %v4137_v45  ;;  %v4986_v45 = vld [vmem:[#allocation13_spill] sm:$0xff] }
 0x1f5   : > { %2849 = vmatprep.subr.mxu0 %v4978_v60  ;;  %2915 = vmatprep.subr.mxu1 %v1757_v15  ;;  %v5006_v60 = vld [vmem:[#allocation35_spill] sm:$0xff] }
 0x1f6   : > { %2850 = vmatpush3.msra.mxu0 %v4979_v9  ;;  %2916 = vmatpush3.msra.mxu1 %v1757_v15 }
 0x1f7   : > { %1670 = vmatmul.mubr.f32.gmra.mxu0 %v4534_v35  ;;  %2851 = vmatprep.subr.mxu0 %v4980_v6 }
 0x1f8   : > { %1675 = vmatprep.mubr.f32.mxu0 %v4937_v10  ;;  %2852 = vmatpush3.msra.mxu0 %v4981_v20 }
 0x1f9   : > { %2853 = vmatprep.subr.mxu0 %v4982_v50  ;;  %2917 = vmatprep.subr.mxu1 %v1756_v7 }
 0x1fa   : > { %2854 = vmatpush3.msra.mxu0 %v4983_v24  ;;  %2918 = vmatpush3.msra.mxu1 %v1756_v7 }
 0x1fb   : > { %1676 = vmatmul.mubr.f32.gmra.mxu0 %v4543_v63  ;;  %2855 = vmatprep.subr.mxu0 %v4984_v25 }
 0x1fc   : > { %1681 = vmatprep.mubr.f32.mxu0 %v4937_v10  ;;  %2856 = vmatpush3.msra.mxu0 %v4985_v36 }
 0x1fd   : > { %2857 = vmatprep.subr.mxu0 %v4986_v45  ;;  %2919 = vmatprep.subr.mxu1 %v1755_v30 }
 0x1fe   : > { %2858 = vmatpush3.msra.mxu0 %v4987_v47  ;;  %2920 = vmatpush3.msra.mxu1 %v1755_v30  ;;  %v4645_v47 = vpop.f32.mrf.mxu1 }
 0x1ff   : > { %1682 = vmatmul.mubr.f32.gmra.mxu0 %v4552_v40  ;;  %2859 = vmatprep.subr.mxu0 %v4988_v53 }
 0x200   : > { %1687 = vmatprep.mubr.f32.mxu0 %v4937_v10  ;;  %2860 = vmatpush3.msra.mxu0 %v4989_v57  ;;  %v4651_v57 = vpop.f32.mrf.mxu1 }
 0x201   : > { %2921 = vmatprep.subr.mxu1 %v1754_v28  ;;  %2861 = vmatprep.subr.mxu0 %v4990_v49 }
 0x202   : > { %2922 = vmatpush3.msra.mxu1 %v1754_v28  ;;  %2862 = vmatpush3.msra.mxu0 %v4991_v12  ;;  %v4657_v12 = vpop.f32.mrf.mxu1 }
 0x203   : > { %1688 = vmatmul.mubr.f32.gmra.mxu0 %v4560_v0  ;;  %2923 = vmatprep.subr.mxu1 %v1753_v46 }
 0x204   : > { %1693 = vmatprep.mubr.f32.mxu0 %v4937_v10  ;;  %2924 = vmatpush3.msra.mxu1 %v1753_v46 }
 0x205   : > { %2925 = vmatprep.subr.mxu1 %v1752_v37  ;;  %2863 = vmatprep.subr.mxu0 %v3245_v2 }
 0x206   : > { %2926 = vmatpush3.msra.mxu1 %v1752_v37  ;;  %2864 = vmatpush3.msra.mxu0 %v3246_v41  ;;  %v4663_v41 = vpop.f32.mrf.mxu1 }
 0x207   : > { %1694 = vmatmul.mubr.f32.gmra.mxu0 %v4567_v42  ;;  %2927 = vmatprep.subr.mxu1 %v1751_v8 }
 0x208   : > { %1699 = vmatprep.mubr.f32.mxu0 %v4937_v10  ;;  %2928 = vmatpush3.msra.mxu1 %v1751_v8 }
 0x209   : > { %2929 = vmatprep.subr.mxu1 %v1750_v26  ;;  %2865 = vmatprep.subr.mxu0 %v3247_v55 }
 0x20a   : > { %2930 = vmatpush3.msra.mxu1 %v1750_v26  ;;  %2866 = vmatpush3.msra.mxu0 %v3248_v38  ;;  %v4669_v38 = vpop.f32.mrf.mxu1 }
 0x20b   : > { %1700 = vmatmul.mubr.f32.gmra.mxu0 %v4574_v33  ;;  %2931 = vmatprep.subr.mxu1 %v1749_v29 }
 0x20c   : > { %1705 = vmatprep.mubr.f32.mxu0 %v4937_v10  ;;  %2932 = vmatpush3.msra.mxu1 %v1749_v29 }
 0x20d   : > { %2933 = vmatprep.subr.mxu1 %v1748_v3 }
 0x20e   : > { %2934 = vmatpush3.msra.mxu1 %v1748_v3 }
 0x20f   : > { %1706 = vmatmul.mubr.f32.gmra.mxu0 %v4585_v17  ;;  %2935 = vmatprep.subr.mxu1 %v1747_v16 }
 0x210   : > { %1711 = vmatprep.mubr.f32.mxu0 %v4937_v10  ;;  %2936 = vmatpush3.msra.mxu1 %v1747_v16 }
 0x211   : > { %2937 = vmatprep.subr.mxu1 %v1746_v21 }
 0x212   : > { %2938 = vmatpush3.msra.mxu1 %v1746_v21 }
 0x213   : > { %1712 = vmatmul.mubr.f32.gmra.mxu0 %v4596_v43  ;;  %2939 = vmatprep.subr.mxu1 %v1745_v18 }
 0x214   : > { %1717 = vmatprep.mubr.f32.mxu0 %v4937_v10  ;;  %2940 = vmatpush3.msra.mxu1 %v1745_v18  ;;  %v4675_v18 = vpop.f32.mrf.mxu1 }
 0x215   : > { %2941 = vmatprep.subr.mxu1 %v1744_v54 }
 0x216   : > { %2942 = vmatpush3.msra.mxu1 %v1744_v54 }
 0x217   : > { %1718 = vmatmul.mubr.f32.gmra.mxu0 %v4601_v58  ;;  %2943 = vmatprep.subr.mxu1 %v1743_v22 }
 0x218   : > { %1723 = vmatprep.mubr.f32.mxu0 %v4937_v10  ;;  %2944 = vmatpush3.msra.mxu1 %v1743_v22 }
 0x219   : > { %2945 = vmatprep.subr.mxu1 %v1742_v32 }
 0x21a   : > { %2946 = vmatpush3.msra.mxu1 %v1742_v32 }
 0x21b   : > { %1724 = vmatmul.mubr.f32.gmra.mxu0 %v4606_v34  ;;  %2948 = vmatmul.mubr.f32.vlgmr.msra.gmra.mxu1 %v4992_v5  ;;  %v4681_v5 = vpop.f32.mrf.mxu1 }
 0x21c   : > { %1729 = vmatprep.mubr.f32.mxu0 %v4937_v10  ;;  %2950 = vmatprep.mubr.f32.mxu1 %v4993_v4 }
 0x21f   : > { %1730 = vmatmul.mubr.f32.gmra.mxu0 %v4611_v56  ;;  %2951 = vmatmul.mubr.f32.gmra.mxu1 %v4994_v39 }
 0x220   : > { %1735 = vmatprep.mubr.f32.mxu0 %v4937_v10  ;;  %2953 = vmatprep.mubr.f32.mxu1 %v4995_v61  ;;  %v5002_v10 = vld [vmem:[#allocation31_spill] sm:$0xff] }
 0x223   : > { %1736 = vmatmul.mubr.f32.gmra.mxu0 %v4618_v31  ;;  %2954 = vmatmul.mubr.f32.gmra.mxu1 %v4996_v23  ;;  %v4685_v23 = vpop.f32.mrf.mxu1 }
 0x224   : > { %2956 = vmatprep.mubr.f32.mxu1 %v4997_v14 }
 0x227   : > { %2957 = vmatmul.mubr.f32.gmra.mxu1 %v4998_v62 }
 0x228   : > { %2959 = vmatprep.mubr.f32.mxu1 %v4999_v48 }
 0x22b   : > { %2960 = vmatmul.mubr.f32.gmra.mxu1 %v5000_v13  ;;  %v4688_v13 = vpop.f32.mrf.mxu1 }
 0x22c   : > { %2962 = vmatprep.mubr.f32.mxu1 %v5001_v59 }
 0x22f   : > { %2963 = vmatmul.mubr.f32.gmra.mxu1 %v5002_v10 }
 0x230   : > { %2965 = vmatprep.mubr.f32.mxu1 %v5003_v44 }
 0x233   : > { %2966 = vmatmul.mubr.f32.gmra.mxu1 %v5004_v1  ;;  %v4691_v1 = vpop.f32.mrf.mxu1 }
 0x234   : > { %2968 = vmatprep.mubr.f32.mxu1 %v5005_v11 }
 0x237   : > { %2969 = vmatmul.mubr.f32.gmra.mxu1 %v5006_v60 }
 0x238   : > { %3003 = vmatprep.mubr.f32.mxu1 %v4499_v27 }
 0x25c   : > { %v2723_v9 = vpop.f32.mrf.mxu0 }
 0x25e   : > { %v2724_v6 = vpop.f32.mrf.mxu0 }
 0x25f   : > { %v4635_v20 = vadd.f32 %v2724_v6, %v2723_v9  ;;  %v4694_v6 = vpop.f32.mrf.mxu1 }
 0x260   : > { %v2726_v50 = vpop.f32.mrf.mxu0 }
 0x261   : > { %2370 = vst.msk [vmem:[#allocation4] sm:$0xff] %vm2369_vm1, %v4635_v20 }
 0x262   : > { %v2727_v24 = vpop.f32.mrf.mxu0 }
 0x263   : > { %v4639_v25 = vadd.f32 %v2727_v24, %v2726_v50 }
 0x264   : > { %v2729_v36 = vpop.f32.mrf.mxu0 }
 0x265   : > { %2371 = vst.msk [vmem:[#allocation4 + $0x8] sm:$0xff] %vm2369_vm1, %v4639_v25 }
 0x266   : > { %v2730_v15 = vpop.f32.mrf.mxu0 }
 0x267   : > { %v4643_v45 = vadd.f32 %v2730_v15, %v2729_v36  ;;  %v4697_v15 = vpop.f32.mrf.mxu1 }
 0x268   : > { %v2732_v27 = vpop.f32.mrf.mxu0 }
 0x269   : > { %2372 = vst.msk [vmem:[#allocation4 + $0x10] sm:$0xff] %vm2369_vm1, %v4643_v45 }
 0x26a   : > { %v2733_v7 = vpop.f32.mrf.mxu0 }
 0x26b   : > { %v4649_v30 = vadd.f32 %v2733_v7, %v2732_v27 }
 0x26c   : > { %v2735_v53 = vpop.f32.mrf.mxu0 }
 0x26d   : > { %2373 = vst.msk [vmem:[#allocation4 + $0x18] sm:$0xff] %vm2369_vm1, %v4649_v30 }
 0x26e   : > { %v2736_v28 = vpop.f32.mrf.mxu0 }
 0x26f   : > { %v4655_v46 = vadd.f32 %v2736_v28, %v2735_v53  ;;  %v4700_v28 = vpop.f32.mrf.mxu1 }
 0x271   : > { %v2738_v49 = vpop.f32.mrf.mxu0  ;;  %2374 = vst.msk [vmem:[#allocation4 + $0x20] sm:$0xff] %vm2369_vm1, %v4655_v46 }
 0x273   : > { %v2739_v37 = vpop.f32.mrf.mxu0 }
 0x274   : > { %v4661_v8 = vadd.f32 %v2739_v37, %v2738_v49 }
 0x275   : > { %v2741_v2 = vpop.f32.mrf.mxu0 }
 0x276   : > { %2375 = vst.msk [vmem:[#allocation4 + $0x28] sm:$0xff] %vm2369_vm1, %v4661_v8 }
 0x277   : > { %v2742_v26 = vpop.f32.mrf.mxu0 }
 0x278   : > { %v4667_v29 = vadd.f32 %v2742_v26, %v2741_v2  ;;  %v4703_v2 = vpop.f32.mrf.mxu1 }
 0x279   : > { %v2744_v55 = vpop.f32.mrf.mxu0 }
 0x27a   : > { %2376 = vst.msk [vmem:[#allocation4 + $0x30] sm:$0xff] %vm2369_vm1, %v4667_v29  ;;  %v4706_v26 = vpop.f32.mrf.mxu1 }
 0x27b   : > { %v2745_v3 = vpop.f32.mrf.mxu0 }
 0x27c   : > { %v4673_v16 = vadd.f32 %v2745_v3, %v2744_v55  ;;  %v4708_v55 = vpop.f32.mrf.mxu1 }
 0x27d   : > { %v2747_v21 = vpop.f32.mrf.mxu0 }
 0x27e   : > { %2377 = vst.msk [vmem:[#allocation4 + $0x38] sm:$0xff] %vm2369_vm1, %v4673_v16 }
 0x27f   : > { %v2748_v54 = vpop.f32.mrf.mxu0 }
 0x280   : > { %v4679_v22 = vadd.f32 %v2748_v54, %v2747_v21 }
 0x281   : > { %v2750_v32 = vpop.f32.mrf.mxu0 }
 0x282   : > { %2378 = vst.msk [vmem:[#allocation4 + $0x40] sm:$0xff] %vm2369_vm1, %v4679_v22 }
 0x283   : > { %v2751_v4 = vpop.f32.mrf.mxu0 }
 0x284   : > { %v2752_v39 = vadd.f32 %v2751_v4, %v2750_v32  ;;  %v4711_v32 = vpop.f32.mrf.mxu1 }
 0x285   : > { %v2753_v61 = vpop.f32.mrf.mxu0 }
 0x286   : > { %2379 = vst.msk [vmem:[#allocation4 + $0x48] sm:$0xff] %vm2369_vm1, %v2752_v39 }
 0x287   : > { %v2754_v14 = vpop.f32.mrf.mxu0 }
 0x288   : > { %v2755_v62 = vadd.f32 %v2754_v14, %v2753_v61 }
 0x289   : > { %v2756_v48 = vpop.f32.mrf.mxu0 }
 0x28a   : > { %2380 = vst.msk [vmem:[#allocation4 + $0x50] sm:$0xff] %vm2369_vm1, %v2755_v62 }
 0x28b   : > { %v2757_v59 = vpop.f32.mrf.mxu0 }
 0x28c   : > { %v2758_v10 = vadd.f32 %v2757_v59, %v2756_v48 }
 0x28d   : > { %v2759_v44 = vpop.f32.mrf.mxu0 }
 0x28e   : > { %2381 = vst.msk [vmem:[#allocation4 + $0x58] sm:$0xff] %vm2369_vm1, %v2758_v10 }
 0x28f   : > { %v2760_v11 = vpop.f32.mrf.mxu0 }
 0x290   : > { %v2761_v60 = vadd.f32 %v2760_v11, %v2759_v44 }
 0x291   : > { %v2762_v9 = vpop.f32.mrf.mxu0 }
 0x292   : > { %2382 = vst.msk [vmem:[#allocation4 + $0x60] sm:$0xff] %vm2369_vm1, %v2761_v60 }
 0x293   : > { %v2763_v50 = vpop.f32.mrf.mxu0 }
 0x294   : > { %v2764_v24 = vadd.f32 %v2763_v50, %v2762_v9 }
 0x295   : > { %v2765_v36 = vpop.f32.mrf.mxu0 }
 0x296   : > { %2383 = vst.msk [vmem:[#allocation4 + $0x68] sm:$0xff] %vm2369_vm1, %v2764_v24 }
 0x297   : > { %v2766_v27 = vpop.f32.mrf.mxu0 }
 0x298   : > { %v2767_v7 = vadd.f32 %v2766_v27, %v2765_v36 }
 0x299   : > { %v2768_v53 = vpop.f32.mrf.mxu0 }
 0x29a   : > { %2384 = vst.msk [vmem:[#allocation4 + $0x70] sm:$0xff] %vm2369_vm1, %v2767_v7 }
 0x29b   : > { %v2769_v49 = vpop.f32.mrf.mxu0 }
 0x29c   : > { %v2770_v37 = vadd.f32 %v2769_v49, %v2768_v53 }
 0x29e   : > { %2385 = vst.msk [vmem:[#allocation4 + $0x78] sm:$0xff] %vm2369_vm1, %v2770_v37  ;;  %2971 = vmatprep.subr.mxu1 %v2770_v37 }
 0x29f   : > { %2972 = vmatpush3.msra.mxu1 %v2770_v37 }
 0x2a0   : > { %2973 = vmatprep.subr.mxu1 %v2767_v7 }
 0x2a1   : > { %2974 = vmatpush3.msra.mxu1 %v2767_v7 }
 0x2a2   : > { %2975 = vmatprep.subr.mxu1 %v2764_v24 }
 0x2a3   : > { %2976 = vmatpush3.msra.mxu1 %v2764_v24 }
 0x2a4   : > { %2977 = vmatprep.subr.mxu1 %v2761_v60 }
 0x2a5   : > { %2978 = vmatpush3.msra.mxu1 %v2761_v60 }
 0x2a6   : > { %2979 = vmatprep.subr.mxu1 %v2758_v10 }
 0x2a7   : > { %v1647_v3 = vpop.f32.mrf.mxu0  ;;  %2980 = vmatpush3.msra.mxu1 %v2758_v10 }
 0x2a8   : > { %v1648_v21 = vadd.f32 %v1647_v3, %v4645_v47  ;;  %2981 = vmatprep.subr.mxu1 %v2755_v62  ;;  %v4717_v47 = vpop.f32.mrf.mxu1 }
 0x2a9   : > { %v1649_v54 = vpop.f32.mrf.mxu0  ;;  %2982 = vmatpush3.msra.mxu1 %v2755_v62 }
 0x2aa   : > { %v2048_v4 = vadd.f32 1e-05, %v1648_v21  ;;  %v1650_v61 = vadd.f32 %v1649_v54, %v4651_v57  ;;  %2983 = vmatprep.subr.mxu1 %v2752_v39 }
 0x2ab   : > { %v1653_v14 = vpop.f32.mrf.mxu0  ;;  %2984 = vmatpush3.msra.mxu1 %v2752_v39 }
 0x2ac   : > { %v2049_v48 = vadd.f32 1e-05, %v1650_v61  ;;  %v1654_v59 = vadd.f32 %v1653_v14, %v4657_v12  ;;  %2985 = vmatprep.subr.mxu1 %v4679_v22  ;;  %3181 = vlog2.f32 %v2048_v4 }
 0x2ad   : > { %v1655_v10 = vpop.f32.mrf.mxu0  ;;  %2986 = vmatpush3.msra.mxu1 %v4679_v22  ;;  %v4725_v22 = vpop.f32.mrf.mxu1 }
 0x2ae   : > { %3183 = vlog2.f32 %v2049_v48  ;;  %v2050_v62 = vadd.f32 1e-05, %v1654_v59  ;;  %v1656_v44 = vadd.f32 %v1655_v10, %v4663_v41  ;;  %2987 = vmatprep.subr.mxu1 %v4673_v16 }
 0x2af   : > { %v1659_v57 = vpop.f32.mrf.mxu0  ;;  %2988 = vmatpush3.msra.mxu1 %v4673_v16 }
 0x2b0   : > { %v2051_v39 = vadd.f32 1e-05, %v1656_v44  ;;  %v1660_v12 = vadd.f32 %v1659_v57, %v4669_v38  ;;  %2989 = vmatprep.subr.mxu1 %v4667_v29  ;;  %3185 = vlog2.f32 %v2050_v62 }
 0x2b1   : > { %v1661_v11 = vpop.f32.mrf.mxu0  ;;  %2990 = vmatpush3.msra.mxu1 %v4667_v29  ;;  %v4733_v29 = vpop.f32.mrf.mxu1 }
 0x2b2   : > { %3187 = vlog2.f32 %v2051_v39  ;;  %v2052_v60 = vadd.f32 1e-05, %v1660_v12  ;;  %v1662_v41 = vadd.f32 %v1661_v11, %v4675_v18  ;;  %2991 = vmatprep.subr.mxu1 %v4661_v8 }
 0x2b3   : > { %v1665_v9 = vpop.f32.mrf.mxu0  ;;  %2992 = vmatpush3.msra.mxu1 %v4661_v8 }
 0x2b4   : > { %v2053_v16 = vadd.f32 1e-05, %v1662_v41  ;;  %v1666_v38 = vadd.f32 %v1665_v9, %v4681_v5  ;;  %2993 = vmatprep.subr.mxu1 %v4655_v46  ;;  %3189 = vlog2.f32 %v2052_v60 }
 0x2b5   : > { %v1667_v50 = vpop.f32.mrf.mxu0  ;;  %2994 = vmatpush3.msra.mxu1 %v4655_v46  ;;  %v4741_v46 = vpop.f32.mrf.mxu1 }
 0x2b6   : > { %3191 = vlog2.f32 %v2053_v16  ;;  %v2054_v24 = vadd.f32 1e-05, %v1666_v38  ;;  %v1668_v18 = vadd.f32 %v1667_v50, %v4685_v23  ;;  %2995 = vmatprep.subr.mxu1 %v4649_v30 }
 0x2b7   : > { %v1671_v36 = vpop.f32.mrf.mxu0  ;;  %2996 = vmatpush3.msra.mxu1 %v4649_v30  ;;  %v4749_v54 = vpop.f32.mrf.mxu1 }
 0x2b8   : > { %v2055_v8 = vadd.f32 1e-05, %v1668_v18  ;;  %v1672_v5 = vadd.f32 %v1671_v36, %v4688_v13  ;;  %2997 = vmatprep.subr.mxu1 %v4643_v45  ;;  %3193 = vlog2.f32 %v2054_v24 }
 0x2b9   : > { %v1673_v27 = vpop.f32.mrf.mxu0  ;;  %2998 = vmatpush3.msra.mxu1 %v4643_v45  ;;  %v3182_v7 = vpop.eup %3181 }
 0x2ba   : > { %3195 = vlog2.f32 %v2055_v8  ;;  %v2056_v53 = vadd.f32 1e-05, %v1672_v5  ;;  %v1674_v23 = vadd.f32 %v1673_v27, %v4691_v1  ;;  %2999 = vmatprep.subr.mxu1 %v4639_v25  ;;  %v2081_v45 = vmul.f32 0.6931472, %v3182_v7  ;;  %v4755_v62 = vpop.f32.mrf.mxu1 }
 0x2bb   : > { %v3184_v49 = vpop.eup %3183  ;;  %v1677_v30 = vpop.f32.mrf.mxu0  ;;  %3000 = vmatpush3.msra.mxu1 %v4639_v25 }
 0x2bc   : > { %v2057_v13 = vadd.f32 1e-05, %v1674_v23  ;;  %v1678_v37 = vadd.f32 %v1677_v30, %v4694_v6  ;;  %3001 = vmatprep.subr.mxu1 %v4635_v20  ;;  %v2083_v3 = vmul.f32 0.6931472, %v3184_v49  ;;  %3197 = vlog2.f32 %v2056_v53  ;;  %v4761_v41 = vpop.f32.mrf.mxu1 }
 0x2bd   : > { %v1679_v21 = vpop.f32.mrf.mxu0  ;;  %3002 = vmatpush3.msra.mxu1 %v4635_v20  ;;  %v3186_v1 = vpop.eup %3185 }
 0x2be   : > { %3199 = vlog2.f32 %v2057_v13  ;;  %v2058_v4 = vadd.f32 1e-05, %v1678_v37  ;;  %v1680_v61 = vadd.f32 %v1679_v21, %v4697_v15  ;;  %2208 = vmatprep.mubr.f32.mxu0 %v2083_v3  ;;  %3004 = vmatmul.mubr.f32.vlgmr.msra.gmra.mxu1 %v4507_v51  ;;  %v2085_v10 = vmul.f32 0.6931472, %v3186_v1  ;;  %v4767_v36 = vpop.f32.mrf.mxu1 }
 0x2bf   : > { %v3188_v25 = vpop.eup %3187  ;;  %v1683_v6 = vpop.f32.mrf.mxu0  ;;  %2209 = vmatmul.mubr.f32.vlgmr.msra.gmra.mxu0 %v2081_v45  ;;  %3006 = vmatprep.mubr.f32.mxu1 %v4516_v52 }
 0x2c0   : > { %v2059_v14 = vadd.f32 1e-05, %v1680_v61  ;;  %v1684_v48 = vadd.f32 %v1683_v6, %v4700_v28  ;;  %v2087_v59 = vmul.f32 0.6931472, %v3188_v25  ;;  %3201 = vlog2.f32 %v2058_v4  ;;  %v1560_v49 = vpop.f32.mrf.mxu1 }
 0x2c1   : > { %v1685_v20 = vpop.f32.mrf.mxu0  ;;  %v3190_v44 = vpop.eup %3189 }
 0x2c2   : > { %3203 = vlog2.f32 %v2059_v14  ;;  %v2060_v15 = vadd.f32 1e-05, %v1684_v48  ;;  %v1686_v57 = vadd.f32 %v1685_v20, %v4703_v2  ;;  %2213 = vmatprep.mubr.f32.mxu0 %v2087_v59  ;;  %3007 = vmatmul.mubr.f32.gmra.mxu1 %v4525_v19  ;;  %v2089_v60 = vmul.f32 0.6931472, %v3190_v44  ;;  %v1564_v1 = vpop.f32.mrf.mxu1 }
 0x2c3   : > { %v3192_v51 = vpop.eup %3191  ;;  %v1689_v39 = vpop.f32.mrf.mxu0  ;;  %2214 = vmatmul.mubr.f32.gmra.mxu0 %v2085_v10  ;;  %3009 = vmatprep.mubr.f32.mxu1 %v4534_v35 }
 0x2c4   : > { %v2061_v52 = vadd.f32 1e-05, %v1686_v57  ;;  %v1690_v28 = vadd.f32 %v1689_v39, %v4706_v26  ;;  %v2091_v12 = vmul.f32 0.6931472, %v3192_v51  ;;  %3205 = vlog2.f32 %v2060_v15  ;;  %v1566_v59 = vpop.f32.mrf.mxu1 }
 0x2c5   : > { %v1691_v11 = vpop.f32.mrf.mxu0  ;;  %v3194_v9 = vpop.eup %3193 }
 0x2c6   : > { %3207 = vlog2.f32 %v2061_v52  ;;  %v2062_v2 = vadd.f32 1e-05, %v1690_v28  ;;  %v1692_v16 = vadd.f32 %v1691_v11, %v4708_v55  ;;  %2218 = vmatprep.mubr.f32.mxu0 %v2091_v12  ;;  %3010 = vmatmul.mubr.f32.gmra.mxu1 %v4543_v63  ;;  %v2093_v18 = vmul.f32 0.6931472, %v3194_v9  ;;  %v1570_v39 = vpop.f32.mrf.mxu1 }
 0x2c7   : > { %v3196_v19 = vpop.eup %3195  ;;  %v1695_v38 = vpop.f32.mrf.mxu0  ;;  %2219 = vmatmul.mubr.f32.gmra.mxu0 %v2089_v60  ;;  %3012 = vmatprep.mubr.f32.mxu1 %v4552_v40 }
 0x2c8   : > { %v2063_v35 = vadd.f32 1e-05, %v1692_v16  ;;  %v1696_v26 = vadd.f32 %v1695_v38, %v4711_v32  ;;  %v2095_v50 = vmul.f32 0.6931472, %v3196_v19  ;;  %3209 = vlog2.f32 %v2062_v2  ;;  %v1572_v16 = vpop.f32.mrf.mxu1 }
 0x2c9   : > { %v1697_v24 = vpop.f32.mrf.mxu0  ;;  %v3198_v8 = vpop.eup %3197 }
 0x2ca   : > { %3211 = vlog2.f32 %v2063_v35  ;;  %v2064_v55 = vadd.f32 1e-05, %v1696_v26  ;;  %v1698_v5 = vadd.f32 %v1697_v24, %v4717_v47  ;;  %2223 = vmatprep.mubr.f32.mxu0 %v2095_v50  ;;  %3013 = vmatmul.mubr.f32.gmra.mxu1 %v4560_v0  ;;  %v2097_v23 = vmul.f32 0.6931472, %v3198_v8  ;;  %v1576_v8 = vpop.f32.mrf.mxu1 }
 0x2cb   : > { %v3200_v63 = vpop.eup %3199  ;;  %v1701_v27 = vpop.f32.mrf.mxu0  ;;  %2224 = vmatmul.mubr.f32.gmra.mxu0 %v2093_v18  ;;  %3015 = vmatprep.mubr.f32.mxu1 %v4567_v42 }
 0x2cc   : > { %v2065_v40 = vadd.f32 1e-05, %v1698_v5  ;;  %v1702_v32 = vadd.f32 %v1701_v27, %v4725_v22  ;;  %v2099_v7 = vmul.f32 0.6931472, %v3200_v63  ;;  %3213 = vlog2.f32 %v2064_v55 }
 0x2cd   : > { %v1703_v53 = vpop.f32.mrf.mxu0  ;;  %v3202_v30 = vpop.eup %3201 }
 0x2ce   : > { %3215 = vlog2.f32 %v2065_v40  ;;  %v2066_v13 = vadd.f32 1e-05, %v1702_v32  ;;  %v1704_v47 = vadd.f32 %v1703_v53, %v4733_v29  ;;  %2228 = vmatprep.mubr.f32.mxu0 %v2099_v7  ;;  %3016 = vmatmul.mubr.f32.gmra.mxu1 %v4574_v33  ;;  %v2101_v21 = vmul.f32 0.6931472, %v3202_v30 }
 0x2cf   : > { %v3204_v0 = vpop.eup %3203  ;;  %v1707_v37 = vpop.f32.mrf.mxu0  ;;  %2229 = vmatmul.mubr.f32.gmra.mxu0 %v2097_v23  ;;  %3018 = vmatprep.mubr.f32.mxu1 %v4585_v17 }
 0x2d0   : > { %v2067_v42 = vadd.f32 1e-05, %v1704_v47  ;;  %v1708_v22 = vadd.f32 %v1707_v37, %v4741_v46  ;;  %v2103_v3 = vmul.f32 0.6931472, %v3204_v0  ;;  %3217 = vlog2.f32 %v2066_v13 }
 0x2d1   : > { %v1709_v45 = vpop.f32.mrf.mxu0  ;;  %v3206_v4 = vpop.eup %3205 }
 0x2d2   : > { %3219 = vlog2.f32 %v2067_v42  ;;  %v2068_v61 = vadd.f32 1e-05, %v1708_v22  ;;  %v1710_v29 = vadd.f32 %v1709_v45, %v4749_v54  ;;  %2233 = vmatprep.mubr.f32.mxu0 %v2103_v3  ;;  %3019 = vmatmul.mubr.f32.gmra.mxu1 %v4596_v43  ;;  %v2105_v48 = vmul.f32 0.6931472, %v3206_v4 }
 0x2d3   : > { %v3208_v33 = vpop.eup %3207  ;;  %v1713_v25 = vpop.f32.mrf.mxu0  ;;  %2234 = vmatmul.mubr.f32.gmra.mxu0 %v2101_v21  ;;  %3021 = vmatprep.mubr.f32.mxu1 %v4601_v58 }
 0x2d4   : > { %v2069_v17 = vadd.f32 1e-05, %v1710_v29  ;;  %v1714_v46 = vadd.f32 %v1713_v25, %v4755_v62  ;;  %v2107_v6 = vmul.f32 0.6931472, %v3208_v33  ;;  %3221 = vlog2.f32 %v2068_v61 }
 0x2d5   : > { %v1715_v14 = vpop.f32.mrf.mxu0  ;;  %v3210_v20 = vpop.eup %3209 }
 0x2d6   : > { %3223 = vlog2.f32 %v2069_v17  ;;  %v2070_v10 = vadd.f32 1e-05, %v1714_v46  ;;  %v1716_v54 = vadd.f32 %v1715_v14, %v4761_v41  ;;  %2238 = vmatprep.mubr.f32.mxu0 %v2107_v6  ;;  %3022 = vmatmul.mubr.f32.gmra.mxu1 %v4606_v34  ;;  %v2109_v51 = vmul.f32 0.6931472, %v3210_v20 }
 0x2d7   : > { %v3212_v43 = vpop.eup %3211  ;;  %v1719_v44 = vpop.f32.mrf.mxu0  ;;  %2239 = vmatmul.mubr.f32.gmra.mxu0 %v2105_v48  ;;  %3024 = vmatprep.mubr.f32.mxu1 %v4611_v56 }
 0x2d8   : > { %v2071_v58 = vadd.f32 1e-05, %v1716_v54  ;;  %v1720_v62 = vadd.f32 %v1719_v44, %v4767_v36  ;;  %v2111_v15 = vmul.f32 0.6931472, %v3212_v43  ;;  %3225 = vlog2.f32 %v2070_v10 }
 0x2d9   : > { %v1721_v57 = vpop.f32.mrf.mxu0  ;;  %v3214_v52 = vpop.eup %3213 }
 0x2da   : > { %3227 = vlog2.f32 %v2071_v58  ;;  %v2072_v28 = vadd.f32 1e-05, %v1720_v62  ;;  %v1722_v12 = vadd.f32 %v1721_v57, %v1560_v49  ;;  %2243 = vmatprep.mubr.f32.mxu0 %v2111_v15  ;;  %3025 = vmatmul.mubr.f32.gmra.mxu1 %v4618_v31  ;;  %v2113_v2 = vmul.f32 0.6931472, %v3214_v52  ;;  %v1578_v49 = vpop.f32.mrf.mxu1 }
 0x2db   : > { %v3216_v34 = vpop.eup %3215  ;;  %v1725_v11 = vpop.f32.mrf.mxu0  ;;  %2244 = vmatmul.mubr.f32.gmra.mxu0 %v2109_v51 }
 0x2dc   : > { %v2073_v60 = vadd.f32 1e-05, %v1722_v12  ;;  %v1726_v56 = vadd.f32 %v1725_v11, %v1564_v1  ;;  %v2115_v41 = vmul.f32 0.6931472, %v3216_v34  ;;  %3229 = vlog2.f32 %v2072_v28  ;;  %v2949_v43 = vpop.f32.mrf.mxu1 }
 0x2dd   : > { %v1727_v9 = vpop.f32.mrf.mxu0  ;;  %v3218_v19 = vpop.eup %3217 }
 0x2de   : > { %3231 = vlog2.f32 %v2073_v60  ;;  %v2074_v38 = vadd.f32 1e-05, %v1726_v56  ;;  %v1728_v35 = vadd.f32 %v1727_v9, %v1566_v59  ;;  %2248 = vmatprep.mubr.f32.mxu0 %v2115_v41  ;;  %v2117_v55 = vmul.f32 0.6931472, %v3218_v19  ;;  %v1824_v44 = vpop.f32.mrf.mxu1  ;;  %v5007_v19 = vld [vmem:[#allocation6_spill] sm:$0xff] }
 0x2df   : > { %v3220_v26 = vpop.eup %3219  ;;  %v1731_v50 = vpop.f32.mrf.mxu0  ;;  %2249 = vmatmul.mubr.f32.gmra.mxu0 %v2113_v2  ;;  %v4809_v9 = vstv %s2686_s6 }
 0x2e0   : > { %v2075_v24 = vadd.f32 1e-05, %v1728_v35  ;;  %v1732_v31 = vadd.f32 %v1731_v50, %v1570_v39  ;;  %v2119_v18 = vmul.f32 0.6931472, %v3220_v26  ;;  %3233 = vlog2.f32 %v2074_v38  ;;  %v2952_v58 = vpop.f32.mrf.mxu1 }
 0x2e1   : > { %v1733_v36 = vpop.f32.mrf.mxu0  ;;  %v3222_v5 = vpop.eup %3221  ;;  %v2405_v38 = vadd.s32 %v4809_v9, %v5007_v19  ;;  %v2389_v35 = vadd.s32 8, %v5007_v19 }
 0x2e2   : > { %3235 = vlog2.f32 %v2075_v24  ;;  %v2076_v63 = vadd.f32 1e-05, %v1732_v31  ;;  %v1734_v27 = vadd.f32 %v1733_v36, %v1572_v16  ;;  %2253 = vmatprep.mubr.f32.mxu0 %v2119_v18  ;;  %v2121_v13 = vmul.f32 0.6931472, %v3222_v5  ;;  %v1834_v62 = vpop.f32.mrf.mxu1 }
 0x2e3   : > { %v3224_v40 = vpop.eup %3223  ;;  %v1737_v32 = vpop.f32.mrf.mxu0  ;;  %2254 = vmatmul.mubr.f32.gmra.mxu0 %v2117_v55  ;;  %vm2421_vm2 = vcmp.eq.s32.totalorder %v2405_v38, 0  ;;  %v2390_v55 = vadd.s32 16, %v5007_v19 }
 0x2e4   : > { %v2077_v7 = vadd.f32 1e-05, %v1734_v27  ;;  %v1738_v53 = vadd.f32 %v1737_v32, %v1576_v8  ;;  %v2123_v23 = vmul.f32 0.6931472, %v3224_v40  ;;  %3237 = vlog2.f32 %v2076_v63  ;;  %v4786_v15 = vpop.f32.mrf.mxu1 }
 0x2e5   : > { %v1739_v30 = vpop.f32.mrf.mxu0  ;;  %v3226_v47 = vpop.eup %3225  ;;  %v2406_v8 = vadd.s32 %v4809_v9, %v2389_v35 }
 0x2e6   : > { %3239 = vlog2.f32 %v2077_v7  ;;  %v2078_v0 = vadd.f32 1e-05, %v1738_v53  ;;  %v1740_v37 = vadd.f32 %v1739_v30, %v1578_v49  ;;  %2258 = vmatprep.mubr.f32.mxu0 %v2123_v23  ;;  %v2125_v45 = vmul.f32 0.6931472, %v3226_v47  ;;  %v1844_v57 = vpop.f32.mrf.mxu1 }
 0x2e7   : > { %v3228_v42 = vpop.eup %3227  ;;  %2259 = vmatmul.mubr.f32.gmra.mxu0 %v2121_v13  ;;  %vm2422_vm3 = vcmp.eq.s32.totalorder %v2406_v8, 0  ;;  %v2407_v23 = vadd.s32 %v4809_v9, %v2390_v55  ;;  %v2391_v49 = vadd.s32 24, %v5007_v19 }
 0x2e8   : > { %v2079_v22 = vadd.f32 1e-05, %v1740_v37  ;;  %v2127_v3 = vmul.f32 0.6931472, %v3228_v42  ;;  %3241 = vlog2.f32 %v2078_v0  ;;  %v4788_v51 = vpop.f32.mrf.mxu1 }
 0x2e9   : > { %v3230_v21 = vpop.eup %3229  ;;  %vm2423_vm4 = vcmp.eq.s32.totalorder %v2407_v23, 0 }
 0x2ea   : > { %3243 = vlog2.f32 %v2079_v22  ;;  %2263 = vmatprep.mubr.f32.mxu0 %v2127_v3  ;;  %v2129_v61 = vmul.f32 0.6931472, %v3230_v21  ;;  %v4790_v39 = vpop.f32.mrf.mxu1  ;;  %v2408_v3 = vadd.s32 %v4809_v9, %v2391_v49 }
 0x2eb   : > { %v3232_v1 = vpop.eup %3231  ;;  %2264 = vmatmul.mubr.f32.gmra.mxu0 %v2125_v45  ;;  %v2392_v45 = vadd.s32 32, %v5007_v19 }
 0x2ec   : > { %v2131_v4 = vmul.f32 0.6931472, %v3232_v1  ;;  %v4792_v52 = vpop.f32.mrf.mxu1  ;;  %vm2424_vm5 = vcmp.eq.s32.totalorder %v2408_v3, 0 }
 0x2ed   : > { %v3234_v29 = vpop.eup %3233 }
 0x2ee   : > { %2268 = vmatprep.mubr.f32.mxu0 %v2131_v4  ;;  %v2133_v17 = vmul.f32 0.6931472, %v3234_v29  ;;  %v4794_v28 = vpop.f32.mrf.mxu1 }
 0x2ef   : > { %v3236_v33 = vpop.eup %3235  ;;  %2269 = vmatmul.mubr.f32.gmra.mxu0 %v2129_v61 }
 0x2f0   : > { %v2135_v25 = vmul.f32 0.6931472, %v3236_v33  ;;  %v4796_v12 = vpop.f32.mrf.mxu1 }
 0x2f1   : > { %v3238_v46 = vpop.eup %3237 }
 0x2f2   : > { %2273 = vmatprep.mubr.f32.mxu0 %v2135_v25  ;;  %v2137_v48 = vmul.f32 0.6931472, %v3238_v46  ;;  %v4798_v34 = vpop.f32.mrf.mxu1  ;;  %v2393_v46 = vadd.s32 40, %v5007_v19 }
 0x2f3   : > { %v3240_v6 = vpop.eup %3239  ;;  %2274 = vmatmul.mubr.f32.gmra.mxu0 %v2133_v17  ;;  %v2409_v17 = vadd.s32 %v4809_v9, %v2392_v45  ;;  %v2398_v45 = vadd.s32 80, %v5007_v19 }
 0x2f4   : > { %v2139_v14 = vmul.f32 0.6931472, %v3240_v6  ;;  %v4800_v11 = vpop.f32.mrf.mxu1 }
 0x2f5   : > { %v3242_v59 = vpop.eup %3241  ;;  %vm2425_vm6 = vcmp.eq.s32.totalorder %v2409_v17, 0  ;;  %v2399_v17 = vadd.s32 88, %v5007_v19 }
 0x2f6   : > { %2278 = vmatprep.mubr.f32.mxu0 %v2139_v14  ;;  %v2141_v54 = vmul.f32 0.6931472, %v3242_v59  ;;  %v4802_v60 = vpop.f32.mrf.mxu1 }
 0x2f7   : > { %v3244_v20 = vpop.eup %3243  ;;  %2279 = vmatmul.mubr.f32.gmra.mxu0 %v2137_v48 }
 0x2f8   : > { %v2143_v10 = vmul.f32 0.6931472, %v3244_v20  ;;  %v4804_v56 = vpop.f32.mrf.mxu1 }
 0x2fa   : > { %2283 = vmatprep.mubr.f32.mxu0 %v2143_v10  ;;  %v4807_v41 = vpop.f32.mrf.mxu1 }
 0x2fb   : > { %2284 = vmatmul.mubr.f32.gmra.mxu0 %v2141_v54 }
 0x37e   : > { %v3005_v2 = vpop.f32.mrf.mxu1 }
 0x37f   : > { %v2867_v16 = vpop.f32.mrf.mxu0  ;;  %v1975_v27 = vadd.f32 %v3005_v2, %v2949_v43  ;;  %v2410_v43 = vadd.s32 %v4809_v9, %v2393_v46 }
 0x380   : > { %v1969_v26 = vpop.f32.mrf.mxu1 }
 0x381   : > { %v1970_v50 = vadd.f32 %v1969_v26, %v1824_v44  ;;  %v2868_v24 = vpop.f32.mrf.mxu0  ;;  %v2394_v44 = vadd.s32 48, %v5007_v19  ;;  %vm2426_vm7 = vcmp.eq.s32.totalorder %v2410_v43, 0 }
 0x382   : > { %v2869_v31 = vadd.f32 %v2868_v24, %v2867_v16  ;;  %v3008_v18 = vpop.f32.mrf.mxu1 }
 0x383   : > { %v2870_v36 = vpop.f32.mrf.mxu0  ;;  %v1985_v4 = vadd.f32 %v3008_v18, %v2952_v58 }
 0x384   : > { %v2289_v5 = vsub.f32 %v1970_v50, %v2869_v31  ;;  %v1979_v7 = vpop.f32.mrf.mxu1  ;;  %v2395_v50 = vadd.s32 56, %v5007_v19 }
 0x385   : > { %v2871_v63 = vpop.f32.mrf.mxu0  ;;  %v1980_v47 = vadd.f32 %v1979_v7, %v1834_v62 }
 0x386   : > { %v2872_v40 = vadd.f32 %v2871_v63, %v2870_v36  ;;  %v2437_v32 = vsel %vm2421_vm2, 0.0, %v2289_v5  ;;  %v3011_v42 = vpop.f32.mrf.mxu1  ;;  %v2396_v63 = vadd.s32 64, %v5007_v19 }
 0x387   : > { %v2873_v53 = vpop.f32.mrf.mxu0  ;;  %2453 = vxpose.xlu0.b32.start [1/16] (narrow) %v2437_v32, 8  ;;  %v1995_v2 = vadd.f32 %v3011_v42, %v4786_v15  ;;  %v2412_v15 = vadd.s32 %v4809_v9, %v2395_v50 }
 0x388   : > { %v2290_v30 = vsub.f32 %v1975_v27, %v2872_v40  ;;  %v1989_v33 = vpop.f32.mrf.mxu1 }
 0x389   : > { %v2874_v13 = vpop.f32.mrf.mxu0  ;;  %v1990_v48 = vadd.f32 %v1989_v33, %v1844_v57  ;;  %v2411_v57 = vadd.s32 %v4809_v9, %v2394_v44  ;;  %vm2428_vm9 = vcmp.eq.s32.totalorder %v2412_v15, 0 }
 0x38a   : > { %v2875_v0 = vadd.f32 %v2874_v13, %v2873_v53  ;;  %v2438_v37 = vsel %vm2422_vm3, 0.0, %v2290_v30  ;;  %v3014_v10 = vpop.f32.mrf.mxu1  ;;  %v2397_v30 = vadd.s32 72, %v5007_v19 }
 0x38b   : > { %v2876_v22 = vpop.f32.mrf.mxu0  ;;  %2454 = vxpose.xlu0.b32.cont [2/16] (narrow) %v2438_v37, 8  ;;  %vm2427_vm8 = vcmp.eq.s32.totalorder %v2411_v57, 0  ;;  %v2005_v32 = vadd.f32 %v3014_v10, %v4788_v51 }
 0x38c   : > { %v2291_v21 = vsub.f32 %v1980_v47, %v2875_v0  ;;  %v1999_v35 = vpop.f32.mrf.mxu1  ;;  %v2414_v51 = vadd.s32 %v4809_v9, %v2397_v30 }
 0x38d   : > { %v2877_v1 = vpop.f32.mrf.mxu0  ;;  %v2000_v18 = vadd.f32 %v1999_v35, %v4790_v39  ;;  %v2413_v39 = vadd.s32 %v4809_v9, %v2396_v63  ;;  %v2401_v35 = vadd.s32 104, %v5007_v19 }
 0x38e   : > { %v2878_v61 = vadd.f32 %v2877_v1, %v2876_v22  ;;  %v2439_v29 = vsel %vm2423_vm4, 0.0, %v2291_v21  ;;  %v3017_v55 = vpop.f32.mrf.mxu1  ;;  %vm2430_vm11 = vcmp.eq.s32.totalorder %v2414_v51, 0 }
 0x38f   : > { %v2879_v25 = vpop.f32.mrf.mxu0  ;;  %2455 = vxpose.xlu0.b32.cont [3/16] (narrow) %v2439_v29, 8  ;;  %vm2429_vm10 = vcmp.eq.s32.totalorder %v2413_v39, 0 }
 0x390   : > { %v2292_v6 = vsub.f32 %v1985_v4, %v2878_v61  ;;  %v2009_v23 = vpop.f32.mrf.mxu1  ;;  %v2015_v4 = vadd.f32 %v3017_v55, %v4792_v52  ;;  %v2416_v52 = vadd.s32 %v4809_v9, %v2399_v17 }
 0x391   : > { %v2880_v14 = vpop.f32.mrf.mxu0  ;;  %v2010_v0 = vadd.f32 %v2009_v23, %v4794_v28  ;;  %v2415_v28 = vadd.s32 %v4809_v9, %v2398_v45 }
 0x392   : > { %v2881_v59 = vadd.f32 %v2880_v14, %v2879_v25  ;;  %v2440_v20 = vsel %vm2424_vm5, 0.0, %v2292_v6  ;;  %v3020_v22 = vpop.f32.mrf.mxu1  ;;  %vm2432_vm13 = vcmp.eq.s32.totalorder %v2416_v52, 0 }
 0x393   : > { %v2882_v54 = vpop.f32.mrf.mxu0  ;;  %2456 = vxpose.xlu0.b32.cont [4/16] (narrow) %v2440_v20, 8  ;;  %vm2431_vm12 = vcmp.eq.s32.totalorder %v2415_v28, 0 }
 0x394   : > { %v2293_v58 = vsub.f32 %v1990_v48, %v2881_v59  ;;  %v2019_v33 = vpop.f32.mrf.mxu1 }
 0x395   : > { %v2883_v62 = vpop.f32.mrf.mxu0  ;;  %v2020_v14 = vadd.f32 %v2019_v33, %v4798_v34 }
 0x396   : > { %v2884_v16 = vadd.f32 %v2883_v62, %v2882_v54  ;;  %v2441_v38 = vsel %vm2425_vm6, 0.0, %v2293_v58  ;;  %v3023_v20 = vpop.f32.mrf.mxu1  ;;  %v2400_v54 = vadd.s32 96, %v5007_v19  ;;  %v2025_v58 = vadd.f32 %v3020_v22, %v4796_v12 }
 0x397   : > { %v2885_v26 = vpop.f32.mrf.mxu0  ;;  %2457 = vxpose.xlu0.b32.cont [5/16] (narrow) %v2441_v38, 8  ;;  %v2418_v12 = vadd.s32 %v4809_v9, %v2401_v35  ;;  %v2035_v15 = vadd.f32 %v3023_v20, %v4800_v11 }
 0x398   : > { %v2294_v24 = vsub.f32 %v1995_v2, %v2884_v16  ;;  %v2029_v16 = vpop.f32.mrf.mxu1  ;;  %v2417_v34 = vadd.s32 %v4809_v9, %v2400_v54 }
 0x399   : > { %v2886_v31 = vpop.f32.mrf.mxu0  ;;  %v2030_v50 = vadd.f32 %v2029_v16, %v4802_v60  ;;  %vm2434_vm15 = vcmp.eq.s32.totalorder %v2418_v12, 0 }
 0x39a   : > { %v2887_v36 = vadd.f32 %v2886_v31, %v2885_v26  ;;  %v2442_v8 = vsel %vm2426_vm7, 0.0, %v2294_v24  ;;  %vm2433_vm14 = vcmp.eq.s32.totalorder %v2417_v34, 0 }
 0x39b   : > { %v2888_v5 = vpop.f32.mrf.mxu0  ;;  %2458 = vxpose.xlu0.b32.cont [6/16] (narrow) %v2442_v8, 8  ;;  %v2402_v8 = vadd.s32 112, %v5007_v19 }
 0x39c   : > { %v2295_v27 = vsub.f32 %v2000_v18, %v2887_v36  ;;  %v3026_v18 = vpop.f32.mrf.mxu1 }
 0x39d   : > { %v2889_v40 = vpop.f32.mrf.mxu0  ;;  %v2419_v60 = vadd.s32 %v4809_v9, %v2402_v8 }
 0x39e   : > { %v2890_v7 = vadd.f32 %v2889_v40, %v2888_v5  ;;  %v2443_v53 = vsel %vm2427_vm8, 0.0, %v2295_v27  ;;  %v2039_v40 = vpop.f32.mrf.mxu1 }
 0x39f   : > { %v2891_v49 = vpop.f32.mrf.mxu0  ;;  %2459 = vxpose.xlu0.b32.cont [7/16] (narrow) %v2443_v53, 8  ;;  %vm2435_vm0 = vcmp.eq.s32.totalorder %v2419_v60, 0 }
 0x3a0   : > { %v2296_v13 = vsub.f32 %v2005_v32, %v2890_v7  ;;  %v2403_v7 = vadd.s32 120, %v5007_v19 }
 0x3a1   : > { %v2892_v47 = vpop.f32.mrf.mxu0 }
 0x3a2   : > { %v2893_v37 = vadd.f32 %v2892_v47, %v2891_v49  ;;  %v2444_v42 = vsel %vm2428_vm9, 0.0, %v2296_v13  ;;  %v2040_v49 = vadd.f32 %v2039_v40, %v4807_v41  ;;  %v2420_v11 = vadd.s32 %v4809_v9, %v2403_v7 }
 0x3a3   : > { %v2894_v3 = vpop.f32.mrf.mxu0  ;;  %2460 = vxpose.xlu0.b32.cont [8/16] (narrow) %v2444_v42, 8 }
 0x3a4   : > { %v2297_v21 = vsub.f32 %v2010_v0, %v2893_v37  ;;  %v2045_v37 = vadd.f32 %v3026_v18, %v4804_v56  ;;  %vm2436_vm1 = vcmp.eq.s32.totalorder %v2420_v11, 0 }
 0x3a5   : > { %v2895_v1 = vpop.f32.mrf.mxu0 }
 0x3a6   : > { %v2896_v61 = vadd.f32 %v2895_v1, %v2894_v3  ;;  %v2445_v29 = vsel %vm2429_vm10, 0.0, %v2297_v21 }
 0x3a7   : > { %v2897_v25 = vpop.f32.mrf.mxu0  ;;  %2461 = vxpose.xlu0.b32.cont [9/16] (narrow) %v2445_v29, 8 }
 0x3a8   : > { %v2298_v46 = vsub.f32 %v2015_v4, %v2896_v61 }
 0x3a9   : > { %v2898_v6 = vpop.f32.mrf.mxu0 }
 0x3aa   : > { %v2899_v48 = vadd.f32 %v2898_v6, %v2897_v25  ;;  %v2446_v59 = vsel %vm2430_vm11, 0.0, %v2298_v46 }
 0x3ab   : > { %v2900_v10 = vpop.f32.mrf.mxu0  ;;  %2462 = vxpose.xlu0.b32.cont [10/16] (narrow) %v2446_v59, 8 }
 0x3ac   : > { %v2299_v43 = vsub.f32 %v2020_v14, %v2899_v48 }
 0x3ad   : > { %v2901_v44 = vpop.f32.mrf.mxu0 }
 0x3ae   : > { %v2902_v62 = vadd.f32 %v2901_v44, %v2900_v10  ;;  %v2447_v2 = vsel %vm2431_vm12, 0.0, %v2299_v43 }
 0x3af   : > { %v2903_v38 = vpop.f32.mrf.mxu0  ;;  %2463 = vxpose.xlu0.b32.cont [11/16] (narrow) %v2447_v2, 8 }
 0x3b0   : > { %v2300_v26 = vsub.f32 %v2025_v58, %v2902_v62 }
 0x3b1   : > { %v2904_v57 = vpop.f32.mrf.mxu0 }
 0x3b2   : > { %v2905_v24 = vadd.f32 %v2904_v57, %v2903_v38  ;;  %v2448_v31 = vsel %vm2432_vm13, 0.0, %v2300_v26 }
 0x3b3   : > { %v2906_v36 = vpop.f32.mrf.mxu0  ;;  %2464 = vxpose.xlu0.b32.cont [12/16] (narrow) %v2448_v31, 8 }
 0x3b4   : > { %v2301_v55 = vsub.f32 %v2030_v50, %v2905_v24 }
 0x3b5   : > { %v2907_v5 = vpop.f32.mrf.mxu0 }
 0x3b6   : > { %v2908_v63 = vadd.f32 %v2907_v5, %v2906_v36  ;;  %v2449_v27 = vsel %vm2433_vm14, 0.0, %v2301_v55 }
 0x3b7   : > { %v2909_v32 = vpop.f32.mrf.mxu0  ;;  %2465 = vxpose.xlu0.b32.cont [13/16] (narrow) %v2449_v27, 8 }
 0x3b8   : > { %v2302_v53 = vsub.f32 %v2035_v15, %v2908_v63 }
 0x3b9   : > { %v2910_v23 = vpop.f32.mrf.mxu0 }
 0x3ba   : > { %v2911_v39 = vadd.f32 %v2910_v23, %v2909_v32  ;;  %v2450_v30 = vsel %vm2434_vm15, 0.0, %v2302_v53 }
 0x3bb   : > { %v2912_v13 = vpop.f32.mrf.mxu0  ;;  %2466 = vxpose.xlu0.b32.cont [14/16] (narrow) %v2450_v30, 8 }
 0x3bc   : > { %v2303_v47 = vsub.f32 %v2040_v49, %v2911_v39 }
 0x3bd   : > { %v2913_v0 = vpop.f32.mrf.mxu0 }
 0x3be   : > { %v2914_v42 = vadd.f32 %v2913_v0, %v2912_v13  ;;  %v2451_v22 = vsel %vm2435_vm0, 0.0, %v2303_v47 }
 0x3bf   : > { %2467 = vxpose.xlu0.b32.cont [15/16] (narrow) %v2451_v22, 8 }
 0x3c0   : > { %v2304_v19 = vsub.f32 %v2045_v37, %v2914_v42 }
 0x3c2   : > { %v2452_v3 = vsel %vm2436_vm1, 0.0, %v2304_v19 }
 0x3c3   : > { %2468 = vxpose.xlu0.b32.end [16/16] (narrow) %v2452_v3, 8 }
 0x403   : > { %v2469_v41 = vpop.trf.xlu0 }
 0x404   : > { %2485 = vst [vmem:[%s3539_s10] sm:$0x3] %v2469_v41 }
 0x405 PF: > { %s14_s21 = sadd.s32 1, %s3303_s21   ;;  %s5008_s15 = smov %s3283_s16 }
 0x406   : > { %p11_p13 = scmp.ge.s32.totalorder %s14_s21, 6   ;;  %s5009_s16 = smov %s3383_s28 }
 0x407   : > { %s5010_s17 = smov %s3295_s19  ;;  %s5011_s18 = smov %s3299_s20 }
 0x408   : > { %s5012_s19 = smov %s5015_s22  ;;  %s5013_s20 = smov %s5019_s23 }
 0x409   :  { %13 = sbr.rel (!%p11_p13) target bundleno = 4 (0x4), region = 105 }

</bundles_post_ra>
